<compile_context>
chip_gen: v7x
topology: tpu7x:2x2x1
jax: 0.10.0
libtpu: 0.0.40
codegen_flags: <defaults>
</compile_context>

<pallas_src>
import jax
import jax.numpy as jnp
from jax.experimental import pallas as pl
from jax.experimental.pallas import tpu as pltpu


def _round_up(x: int, m: int) -> int:
    return ((x + m - 1) // m) * m


def _pick_tm(n_rows: int) -> int:
    """Large row tiles amortize grid-step overhead, but keep >= ~4 grid steps
    so both TensorCores (v7x) get work and the DMA pipeline can overlap."""
    tm = 512
    while tm > 128 and n_rows < 4 * tm:
        tm //= 2
    return tm


def make_wire_kernel(scale: float, omega: float, half: int):
    s2 = float(scale) * float(scale)
    om = float(omega)

    def wire_kernel(xr_ref, xi_ref, wa_ref, wb_ref, b_ref, or_ref, oi_ref):
        # Complex linear packed into two MXU dots over a resident weight slab:
        #   z_cat = [zr | zi]  with  zr = xr@wr - xi@wi + br,  zi = xr@wi + xi@wr + bi
        z = (jnp.dot(xr_ref[...], wa_ref[...], preferred_element_type=jnp.float32)
             + jnp.dot(xi_ref[...], wb_ref[...], preferred_element_type=jnp.float32)
             + b_ref[...])
        zr = z[:, :half]          # 128-aligned static slices -> free
        zi = z[:, half:]

        # exp(1j*omega*z - |scale*z|^2) = exp(u) * (cos v + 1j sin v)
        #   u = -omega*Im(z) - scale^2*|z|^2 ,  v = omega*Re(z)
        u = -om * zi - s2 * (zr * zr + zi * zi)
        v = om * zr
        e = jnp.exp(u)
        or_ref[...] = e * jnp.cos(v)
        oi_ref[...] = e * jnp.sin(v)

    return wire_kernel


def wire_layer_forward(xr, xi, wr, wi, br, bi, *, scale, omega, tm=None):
    """xr/xi: (N, in_f) f32; wr/wi: (in_f, out_f) f32; br/bi: (1, out_f) f32.
    Returns (out_real, out_imag), each (N, out_f) f32."""
    N, in_f = xr.shape
    out_f = wr.shape[1]

    out_f_pad = _round_up(out_f, 128)            # lane-dense output halves
    if tm is None:
        tm = _pick_tm(N)
    n_pad = _round_up(max(N, tm), tm)

    # ---- x side: pass xr / xi directly; pad rows only if N % tm != 0 -------
    if n_pad != N:
        row_pad = ((0, n_pad - N), (0, 0))
        xr_k = jnp.pad(xr, row_pad)
        xi_k = jnp.pad(xi, row_pad)
    else:
        xr_k, xi_k = xr, xi

    # ---- parameter side: tiny one-time packing (resident in VMEM) ----------
    if out_f_pad != out_f:
        col_pad = ((0, 0), (0, out_f_pad - out_f))
        wr_p, wi_p = jnp.pad(wr, col_pad), jnp.pad(wi, col_pad)
        br_p, bi_p = jnp.pad(br, col_pad), jnp.pad(bi, col_pad)
    else:
        wr_p, wi_p, br_p, bi_p = wr, wi, br, bi
    w_a = jnp.concatenate([wr_p, wi_p], axis=1)        # (in_f, 2*out_f_pad)
    w_b = jnp.concatenate([-wi_p, wr_p], axis=1)        # (in_f, 2*out_f_pad)
    b_pk = jnp.concatenate([br_p, bi_p], axis=1)         # (1,   2*out_f_pad)

    kernel = make_wire_kernel(scale, omega, out_f_pad)
    grid = (n_pad // tm,)

    grid_spec = pltpu.PrefetchScalarGridSpec(
        num_scalar_prefetch=0,
        grid=grid,
        in_specs=[
            pl.BlockSpec((tm, in_f), lambda i: (i, 0)),                # xr tile
            pl.BlockSpec((tm, in_f), lambda i: (i, 0)),                # xi tile
            pl.BlockSpec((in_f, 2 * out_f_pad), lambda i: (0, 0)),     # W_a (resident)
            pl.BlockSpec((in_f, 2 * out_f_pad), lambda i: (0, 0)),     # W_b (resident)
            pl.BlockSpec((1, 2 * out_f_pad), lambda i: (0, 0)),        # bias (resident)
        ],
        out_specs=[
            pl.BlockSpec((tm, out_f_pad), lambda i: (i, 0)),           # out real
            pl.BlockSpec((tm, out_f_pad), lambda i: (i, 0)),           # out imag
        ],
    )

    # VMEM budget: double-buffered x/out tiles + resident weight/bias blocks.
    vmem_need = 4 * (2 * 2 * tm * in_f                 # xr, xi
                     + 2 * 2 * tm * out_f_pad          # out_r, out_i
                     + 2 * 2 * in_f * 2 * out_f_pad    # W_a, W_b
                     + 2 * 2 * 2 * out_f_pad)          # bias
    vmem_limit = int(min(max(2 * vmem_need, 32 << 20), 48 << 20))

    flops = 2 * 2 * n_pad * in_f * 2 * out_f_pad + 10 * n_pad * out_f_pad
    transcendentals = 3 * n_pad * out_f_pad
    bytes_accessed = 4 * (2 * N * in_f + 2 * in_f * 2 * out_f_pad
                          + 2 * out_f_pad + 2 * n_pad * out_f_pad)

    out_r, out_i = pl.pallas_call(
        kernel,
        out_shape=(jax.ShapeDtypeStruct((n_pad, out_f_pad), jnp.float32),
                   jax.ShapeDtypeStruct((n_pad, out_f_pad), jnp.float32)),
        grid_spec=grid_spec,
        compiler_params=pltpu.CompilerParams(
            dimension_semantics=("parallel",),
            vmem_limit_bytes=vmem_limit),
        cost_estimate=pl.CostEstimate(
            flops=flops,
            transcendentals=transcendentals,
            bytes_accessed=bytes_accessed),
    )(xr_k, xi_k, w_a, w_b, b_pk)

    # Slice off padding only when it was actually added (otherwise return the
    # kernel outputs untouched -> no extra HBM round trip).
    if n_pad != N or out_f_pad != out_f:
        out_r = out_r[:N, :out_f]
        out_i = out_i[:N, :out_f]
    return out_r, out_i


def reference_forward(xr, xi, wr, wi, br, bi, *, scale, omega):
    """Plain-JAX complex reference (mirrors the PyTorch module)."""
    x = (xr + 1j * xi).astype(jnp.complex64)
    w = (wr + 1j * wi).astype(jnp.complex64)
    b = (br + 1j * bi).astype(jnp.complex64)
    z = x @ w + b
    return jnp.exp(1j * omega * z - jnp.abs(scale * z) ** 2)


if __name__ == "__main__":
    # Small shapes consistent with the module: N coordinate points through a
    # complex linear in_features -> out_features plus the WIRE activation.
    N, in_features, out_features = 512, 32, 32
    scale, omega = 10.0, 20.0
    weight_init, bias_init = 1.0, 2.0

    key = jax.random.PRNGKey(0)
    k_xr, k_xi, k_wr, k_wi, k_br, k_bi = jax.random.split(key, 6)

    # Deterministic synthetic parameters (scaled by weight_init / bias_init),
    # standing in for Initializer.wire_init (no checkpoint load).
    bound = weight_init / in_features
    xr = jax.random.normal(k_xr, (N, in_features), jnp.float32)
    xi = jax.random.normal(k_xi, (N, in_features), jnp.float32)
    wr = jax.random.uniform(k_wr, (in_features, out_features), jnp.float32,
                            -bound, bound)
    wi = jax.random.uniform(k_wi, (in_features, out_features), jnp.float32,
                            -bound, bound)
    br = bias_init * jax.random.uniform(k_br, (1, out_features), jnp.float32,
                                        -0.01, 0.01)
    bi = bias_init * jax.random.uniform(k_bi, (1, out_features), jnp.float32,
                                        -0.01, 0.01)

    out_r, out_i = wire_layer_forward(xr, xi, wr, wi, br, bi,
                                      scale=scale, omega=omega)
    jax.block_until_ready((out_r, out_i))

    ref = reference_forward(xr, xi, wr, wi, br, bi, scale=scale, omega=omega)
    assert out_r.shape == (N, out_features) and out_i.shape == (N, out_features)
    assert jnp.allclose(out_r, jnp.real(ref), atol=1e-4, rtol=1e-4)
    assert jnp.allclose(out_i, jnp.imag(ref), atol=1e-4, rtol=1e-4)

    print("KERNEL_OK")
</pallas_src>

<mosaic_0001>
module attributes {stable_mosaic.version = 11 : i64} {
  func.func @wire_kernel(%arg0: i32, %arg1: memref<128x32xf32, #tpu.memory_space<vmem>>, %arg2: memref<128x32xf32, #tpu.memory_space<vmem>>, %arg3: memref<32x256xf32, #tpu.memory_space<vmem>>, %arg4: memref<32x256xf32, #tpu.memory_space<vmem>>, %arg5: memref<1x256xf32, #tpu.memory_space<vmem>>, %arg6: memref<128x128xf32, #tpu.memory_space<vmem>>, %arg7: memref<128x128xf32, #tpu.memory_space<vmem>>) attributes {dimension_semantics = [#tpu.dimension_semantics<parallel>], iteration_bounds = array<i64: 4>, scalar_prefetch = 0 : i64, scratch_operands = 0 : i64, tpu.core_type = #tpu.core_type<tc>, window_params = [{transform_indices = @transform_0, window_bounds = array<i64: 128, 32>}, {transform_indices = @transform_1, window_bounds = array<i64: 128, 32>}, {pipeline_mode = #tpu.pipeline_mode<synchronous>, transform_indices = @transform_2, window_bounds = array<i64: 32, 256>}, {pipeline_mode = #tpu.pipeline_mode<synchronous>, transform_indices = @transform_3, window_bounds = array<i64: 32, 256>}, {pipeline_mode = #tpu.pipeline_mode<synchronous>, transform_indices = @transform_4, window_bounds = array<i64: 1, 256>}, {transform_indices = @transform_5, window_bounds = array<i64: 128, 128>}, {transform_indices = @transform_6, window_bounds = array<i64: 128, 128>}]} {
    %c0 = arith.constant 0 : index
    %c0_0 = arith.constant 0 : index
    %0 = vector.load %arg1[%c0, %c0_0] : memref<128x32xf32, #tpu.memory_space<vmem>>, vector<128x32xf32>
    %c0_1 = arith.constant 0 : index
    %c0_2 = arith.constant 0 : index
    %1 = vector.load %arg3[%c0_1, %c0_2] : memref<32x256xf32, #tpu.memory_space<vmem>>, vector<32x256xf32>
    %cst = arith.constant dense<0.000000e+00> : vector<128x256xf32>
    %2 = tpu.matmul %0, %1, %cst {dimension_numbers = #tpu.dot_dimension_numbers<[1], [0], [0], [1], [0, 0, 1, 1], [], []>} : vector<128x32xf32>, vector<32x256xf32>, vector<128x256xf32> -> vector<128x256xf32>
    %c0_3 = arith.constant 0 : index
    %c0_4 = arith.constant 0 : index
    %3 = vector.load %arg2[%c0_3, %c0_4] : memref<128x32xf32, #tpu.memory_space<vmem>>, vector<128x32xf32>
    %c0_5 = arith.constant 0 : index
    %c0_6 = arith.constant 0 : index
    %4 = vector.load %arg4[%c0_5, %c0_6] : memref<32x256xf32, #tpu.memory_space<vmem>>, vector<32x256xf32>
    %cst_7 = arith.constant dense<0.000000e+00> : vector<128x256xf32>
    %5 = tpu.matmul %3, %4, %cst_7 {dimension_numbers = #tpu.dot_dimension_numbers<[1], [0], [0], [1], [0, 0, 1, 1], [], []>} : vector<128x32xf32>, vector<32x256xf32>, vector<128x256xf32> -> vector<128x256xf32>
    %6 = arith.addf %2, %5 : vector<128x256xf32>
    %c0_8 = arith.constant 0 : index
    %c0_9 = arith.constant 0 : index
    %7 = vector.load %arg5[%c0_8, %c0_9] : memref<1x256xf32, #tpu.memory_space<vmem>>, vector<1x256xf32>
    %8 = vector.broadcast %7 : vector<1x256xf32> to vector<128x256xf32>
    %9 = arith.addf %6, %8 : vector<128x256xf32>
    %10 = vector.extract_strided_slice %9 {offsets = [0, 0], sizes = [128, 128], strides = [1, 1]} : vector<128x256xf32> to vector<128x128xf32>
    %11 = vector.extract_strided_slice %9 {offsets = [0, 128], sizes = [128, 128], strides = [1, 1]} : vector<128x256xf32> to vector<128x128xf32>
    %cst_10 = arith.constant -2.000000e+01 : f32
    %12 = vector.broadcast %cst_10 : f32 to vector<128x128xf32>
    %13 = arith.mulf %12, %11 : vector<128x128xf32>
    %14 = arith.mulf %10, %10 : vector<128x128xf32>
    %15 = arith.mulf %11, %11 : vector<128x128xf32>
    %16 = arith.addf %14, %15 : vector<128x128xf32>
    %cst_11 = arith.constant 1.000000e+02 : f32
    %17 = vector.broadcast %cst_11 : f32 to vector<128x128xf32>
    %18 = arith.mulf %17, %16 : vector<128x128xf32>
    %19 = arith.subf %13, %18 : vector<128x128xf32>
    %cst_12 = arith.constant 2.000000e+01 : f32
    %20 = vector.broadcast %cst_12 : f32 to vector<128x128xf32>
    %21 = arith.mulf %20, %10 : vector<128x128xf32>
    %22 = math.exp %19 : vector<128x128xf32>
    %23 = math.cos %21 : vector<128x128xf32>
    %24 = arith.mulf %22, %23 : vector<128x128xf32>
    %c0_13 = arith.constant 0 : index
    %c0_14 = arith.constant 0 : index
    %25 = vector.load %arg6[%c0_13, %c0_14] : memref<128x128xf32, #tpu.memory_space<vmem>>, vector<128x128xf32>
    tpu.vector_store %arg6[%c0_13, %c0_14], %24 {strides = array<i32>} : memref<128x128xf32, #tpu.memory_space<vmem>>, vector<128x128xf32>,
    %26 = math.sin %21 : vector<128x128xf32>
    %27 = arith.mulf %22, %26 : vector<128x128xf32>
    %c0_15 = arith.constant 0 : index
    %c0_16 = arith.constant 0 : index
    %28 = vector.load %arg7[%c0_15, %c0_16] : memref<128x128xf32, #tpu.memory_space<vmem>>, vector<128x128xf32>
    tpu.vector_store %arg7[%c0_15, %c0_16], %27 {strides = array<i32>} : memref<128x128xf32, #tpu.memory_space<vmem>>, vector<128x128xf32>,
    return
  }
  func.func @transform_0(%arg0: i32) -> (i32, i32) {
    %c0_i32 = arith.constant 0 : i32
    %c0_i32_0 = arith.constant 0 : i32
    return %arg0, %c0_i32 : i32, i32
  }
  func.func @transform_1(%arg0: i32) -> (i32, i32) {
    %c0_i32 = arith.constant 0 : i32
    %c0_i32_0 = arith.constant 0 : i32
    return %arg0, %c0_i32 : i32, i32
  }
  func.func @transform_2(%arg0: i32) -> (i32, i32) {
    %c0_i32 = arith.constant 0 : i32
    %c0_i32_0 = arith.constant 0 : i32
    %c0_i32_1 = arith.constant 0 : i32
    return %c0_i32, %c0_i32_0 : i32, i32
  }
  func.func @transform_3(%arg0: i32) -> (i32, i32) {
    %c0_i32 = arith.constant 0 : i32
    %c0_i32_0 = arith.constant 0 : i32
    %c0_i32_1 = arith.constant 0 : i32
    return %c0_i32, %c0_i32_0 : i32, i32
  }
  func.func @transform_4(%arg0: i32) -> (i32, i32) {
    %c0_i32 = arith.constant 0 : i32
    %c0_i32_0 = arith.constant 0 : i32
    %c0_i32_1 = arith.constant 0 : i32
    return %c0_i32, %c0_i32_0 : i32, i32
  }
  func.func @transform_5(%arg0: i32) -> (i32, i32) {
    %c0_i32 = arith.constant 0 : i32
    %c0_i32_0 = arith.constant 0 : i32
    return %arg0, %c0_i32 : i32, i32
  }
  func.func @transform_6(%arg0: i32) -> (i32, i32) {
    %c0_i32 = arith.constant 0 : i32
    %c0_i32_0 = arith.constant 0 : i32
    return %arg0, %c0_i32 : i32, i32
  }
}

</mosaic_0001>

<bundles_post_ra>
// kernel: tpu_custom_call.1
= control target key start
LH: loop header
LB: loop body
LE: loop exit
PB: predicated region body
PF: predicated region fallthrough
CT: control target
= control target key end

     0   :  { %12 = vsyncpa [#allocation3], 0  ;;  %s7372_s0 = inlined_call_operand.vmem [shape: f32[512,32], index: 0, kind: input, shape index: {}]   ;;  %s7373_s1 = inlined_call_operand.vmem [shape: f32[512,32], index: 1, kind: input, shape index: {}]   ;;  %s7374_s2 = inlined_call_operand.vmem [shape: f32[32,256], index: 2, kind: input, shape index: {}]   ;;  %s7375_s3 = inlined_call_operand.vmem [shape: f32[32,256], index: 3, kind: input, shape index: {}]   ;;  %s7376_s4 = inlined_call_operand.vmem [shape: f32[1,256], index: 4, kind: input, shape index: {}]   ;;  %s7377_s5 = inlined_call_operand.hbm [shape: f32[512,128], index: 5, kind: output, shape index: {0}]   ;;  %s7378_s6 = inlined_call_operand.hbm [shape: f32[512,128], index: 6, kind: output, shape index: {1}]  }
   0x1   :  { %14 = vsyncpa [#allocation3 + $0x1], 0 }
   0x2   :  { %15 = vsyncpa [#allocation5], 0 }
   0x3   :  { %17 = vsyncpa [#allocation5 + $0x1], 0  ;;  %s5042_s21 = smov 0   ;;  %s5044_s22 = smov 0  }
   0x4   :  { %s5046_s23 = smov 0   ;;  %s5048_s24 = smov 0  }
   0x5 LB: > { %s5063_s25 = sadd.s32 4294967295, %s4994_s24   ;;  %s4459_s26 = sadd.s32 4294967294, %s4994_s24   ;;  %s4994_s24 = sphi %s5048_s24, %s7473_s24   ;;  %s4990_s23 = sphi %s5046_s23, %s7472_s23   ;;  %s4986_s22 = sphi %s5044_s22, %s7471_s22   ;;  %s4982_s21 = sphi %s5042_s21, %s7470_s21  }
   0x6   : > { %s5067_s27 = sadd.s32 1, %s4994_s24   ;;  %s145_s28 = sadd.s32 1, %s4990_s23 }
   0x7   : > { %s142_s29 = ssub.s32 %s4994_s24, %s5067_s27  ;;  %p155_p0 = scmp.ne.s32.totalorder %s4990_s23, %s4986_s22 }
   0x8   : > { %p143_p1 = scmp.eq.s32.totalorder %s142_s29, 0  ;;  %p156_p2 = scmp.eq.s32.totalorder %s5063_s25, 3 }
   0x9   : > { %p161_p3 = scmp.ne.s32.totalorder %s4986_s22, %s4982_s21  ;;  %p162_p4 = scmp.eq.s32.totalorder %s4459_s26, 3 }
   0xa   : > { %s5078_s30 = scalar_select %p143_p1, %s4990_s23, %s145_s28  }
   0xb   : > { %p5080_p5 = por %p156_p2, %p155_p0  ;;  %p5084_p6 = por %p162_p4, %p161_p3 }
   0xc   : > { %p4462_p7 = scmp.ge.s32.totalorder %s4994_s24, 1  ;;  %p233_p8 = scmp.lt.s32.totalorder %s4994_s24, 5 }
   0xe   : > { %p234_p9 = pnand %p4462_p7, %p233_p8 }
  0x10   : > { %237 = sbr.rel (%p234_p9) target bundleno = 813 (0x32d), region = 40 }
  0x17   : > { %v328_v0 = vld [vmem:[%s7375_s3 + $0x8] sm:$0xff]  ;;  %v330_v1 = vld [vmem:[%s7375_s3 + $0x18] sm:$0xff]  ;;  %s4465_s15 = sshll.u32 %s5063_s25, 4  ;;  %v327_v5 = vld [vmem:[%s7375_s3] sm:$0xff]  ;;  %v4996_v7 = vmov 0.0   ;;  %vm335_vm0 = vcmask 261120   ;;  %v756_v57 = vlaneseq }
  0x18   : > { %v304_v2 = vld [vmem:[%s7374_s2 + $0x8] sm:$0xff]  ;;  %v4639_v3 = vpack.c.bf16 %v330_v1, %v328_v0  ;;  %v306_v4 = vld [vmem:[%s7374_s2 + $0x18] sm:$0xff]  ;;  %v329_v6 = vld [vmem:[%s7375_s3 + $0x10] sm:$0xff]  ;;  %448 = vmatprep.mubr.f32.mxu1 %v4996_v7  ;;  %657 = vmatprep.mubr.f32.mxu0 %v4996_v7  ;;  %p274_p10 = scmp.lt.s32.totalorder %s4465_s15, 63  ;;  %s5564_s28 = sand.u32 1, %s4986_s22  }
  0x19   : > { %v4647_v8 = vpack.c.bf16 %v306_v4, %v304_v2  ;;  %v4641_v9 = vpack.c.bf16 %v329_v6, %v327_v5  ;;  %v303_v10 = vld [vmem:[%s7374_s2] sm:$0xff]  ;;  %v305_v11 = vld [vmem:[%s7374_s2 + $0x10] sm:$0xff]  ;;  %v332_v12 = vld [vmem:[%s7375_s3 + $0x28] sm:$0xff]  ;;  %v757_v58 = vshrl.u32 %v756_v57, 7  ;;  %s4463_s29 = sshll.u32 %s5564_s28, 7  ;;  %s4637_s11 = sshll.u32 %s5063_s25, 11 }
  0x1a   : > { %4640 = vmatprep.subr.bf16.mxu1 %v4639_v3  ;;  %v4649_v13 = vpack.c.bf16 %v305_v11, %v303_v10  ;;  %v334_v14 = vld [vmem:[%s7375_s3 + $0x38] sm:$0xff]  ;;  %v308_v15 = vld [vmem:[%s7374_s2 + $0x28] sm:$0xff]  ;;  %s7475_s15 = smov (!%p274_p10, %s4465_s15), 63  ;;  %v331_v19 = vld [vmem:[%s7375_s3 + $0x20] sm:$0xff]  ;;  %s5613_s9 = scalar_lea.vmem [#allocation2], %s4463_s29 }
  0x1b   : > { %v310_v16 = vld [vmem:[%s7374_s2 + $0x38] sm:$0xff]  ;;  %4648 = vmatprep.subr.bf16.mxu0 %v4647_v8  ;;  %4642 = vmatpush1.bf16.msra.mxu1 %v4641_v9  ;;  %v4643_v17 = vpack.c.bf16 %v334_v14, %v332_v12  ;;  %v333_v20 = vld [vmem:[%s7375_s3 + $0x30] sm:$0xff]  ;;  %v307_v21 = vld [vmem:[%s7374_s2 + $0x20] sm:$0xff]  ;;  %s4466_s13 = sshll.u32 %s7475_s15, 3  ;;  %v758_v59 = vsub.s32 0, %v757_v58  ;;  %v762_v61 = vsub.s32 1, %v757_v58  ;;  %s7288_s25 = scalar_lea.hbm %s7377_s5, %s4637_s11 }
  0x1c   : > { %v4651_v18 = vpack.c.bf16 %v310_v16, %v308_v15  ;;  %4650 = vmatpush1.bf16.msra.mxu0 %v4649_v13  ;;  %v4645_v22 = vpack.c.bf16 %v333_v20, %v331_v19  ;;  %v309_v23 = vld [vmem:[%s7374_s2 + $0x30] sm:$0xff]  ;;  %s5144_s17 = scalar_lea.vmem %s7373_s1, %s4466_s13  ;;  %s5149_s20 = scalar_lea.vmem %s7372_s0, %s4466_s13  ;;  %v754_v60 = vld [vmem:[%s7376_s4] sm:$0x3] }
  0x1d   : > { %4644 = vmatprep.subr.bf16.mxu1 %v4643_v17  ;;  %v4653_v24 = vpack.c.bf16 %v309_v23, %v307_v21  ;;  %v311_v25 = vld [vmem:[%s5144_s17] sm:$0xff]  ;;  %v312_v27 = vld [vmem:[%s5144_s17 + $0x8] sm:$0xff]  ;;  %v313_v29 = vld [vmem:[%s5144_s17 + $0x10] sm:$0xff]  ;;  %v5248_v63 = vrot.slane %v754_v60, %v758_v59  ;;  %v5250_v2 = vrot.slane %v754_v60, %v762_v61  ;;  %s5618_s10 = scalar_lea.vmem [#allocation4], %s4463_s29  ;;  %s4337_s12 = sshll.u32 %s5613_s9, 4  ;;  %s7290_s12 = int_to_ptr.vmem [resolvable:$true] %s4337_s12 }
  0x1e   : > { %4652 = vmatprep.subr.bf16.mxu0 %v4651_v18  ;;  %v287_v26 = vld [vmem:[%s5149_s20] sm:$0xff]  ;;  %v288_v28 = vld [vmem:[%s5149_s20 + $0x8] sm:$0xff]  ;;  %v289_v30 = vld [vmem:[%s5149_s20 + $0x10] sm:$0xff]  ;;  %s4353_s13 = sshll.u32 %s5618_s10, 4  ;;  %s7295_s19 = scalar_lea.hbm %s7378_s6, %s4637_s11  ;;  %s7297_s13 = int_to_ptr.vmem [resolvable:$true] %s4353_s13 }
  0x1f   : > { %4646 = vmatpush1.bf16.msra.mxu1 %v4645_v22  ;;  %v314_v31 = vld [vmem:[%s5144_s17 + $0x18] sm:$0xff]  ;;  %v315_v33 = vld [vmem:[%s5144_s17 + $0x20] sm:$0xff]  ;;  %v316_v35 = vld [vmem:[%s5144_s17 + $0x28] sm:$0xff]  ;;  %s4900_s15 = scalar_lea.vmem %s7290_s12, 2048  ;;  %s5003_s26 = smov [#allocation2]  }
  0x20   : > { %4654 = vmatpush1.bf16.msra.mxu0 %v4653_v24  ;;  %v290_v32 = vld [vmem:[%s5149_s20 + $0x18] sm:$0xff]  ;;  %v291_v34 = vld [vmem:[%s5149_s20 + $0x20] sm:$0xff]  ;;  %v292_v36 = vld [vmem:[%s5149_s20 + $0x28] sm:$0xff]  ;;  %p4901_p11 = scmp.ne.s32.totalorder %s7290_s12, %s4900_s15  ;;  %s4904_s29 = sshll.u32 %s5003_s26, 4  ;;  %s4905_s29 = int_to_ptr.vmem [resolvable:$false] %s4904_s29 }
  0x21   : > { %v317_v37 = vld [vmem:[%s5144_s17 + $0x30] sm:$0xff]  ;;  %v318_v39 = vld [vmem:[%s5144_s17 + $0x38] sm:$0xff]  ;;  %v319_v41 = vld [vmem:[%s5144_s17 + $0x40] sm:$0xff]  ;;  %s4906_s14 = scalar_lea.vmem %s4905_s29, 4096  ;;  %p4907_p0 = scmp.lt.s32.totalorder %s7290_s12, %s4905_s29 }
  0x22   : > { %4469 = vmatmul.mubr.msk.f32.vlgmr.msra.gmra.mrb[0].mxu1 %vm335_vm0, %v311_v25  ;;  %v293_v38 = vld [vmem:[%s5149_s20 + $0x30] sm:$0xff]  ;;  %v294_v40 = vld [vmem:[%s5149_s20 + $0x38] sm:$0xff]  ;;  %v295_v42 = vld [vmem:[%s5149_s20 + $0x40] sm:$0xff]  ;;  %p4902_p12 = pnand %p4901_p11, %p5080_p5  ;;  %p4908_p1 = scmp.lt.s32.totalorder %s4906_s14, %s4900_s15 }
  0x23   : > { %4485 = vmatmul.mubr.msk.f32.vlgmr.msra.gmra.mrb[0].mxu0 %vm335_vm0, %v287_v26  ;;  %454 = vmatprep.mubr.f32.mxu1 %v4996_v7  ;;  %v320_v43 = vld [vmem:[%s5144_s17 + $0x48] sm:$0xff]  ;;  %v321_v45 = vld [vmem:[%s5144_s17 + $0x50] sm:$0xff]  ;;  %v322_v47 = vld [vmem:[%s5144_s17 + $0x58] sm:$0xff] }
  0x24   : > { %663 = vmatprep.mubr.f32.mxu0 %v4996_v7  ;;  %v296_v44 = vld [vmem:[%s5149_s20 + $0x48] sm:$0xff]  ;;  %v297_v46 = vld [vmem:[%s5149_s20 + $0x50] sm:$0xff]  ;;  %v298_v48 = vld [vmem:[%s5149_s20 + $0x58] sm:$0xff]  ;;  %p4903_p13 = pneg %p4902_p12  ;;  %p4909_p2 = por %p4908_p1, %p4907_p0 }
  0x25   : > { %v323_v49 = vld [vmem:[%s5144_s17 + $0x60] sm:$0xff]  ;;  %v324_v51 = vld [vmem:[%s5144_s17 + $0x68] sm:$0xff]  ;;  %v325_v53 = vld [vmem:[%s5144_s17 + $0x70] sm:$0xff] }
  0x26   : > { %4470 = vmatmul.mubr.msk.f32.gmra.mrb[2].mxu1 %vm335_vm0, %v312_v27  ;;  %v299_v50 = vld [vmem:[%s5149_s20 + $0x60] sm:$0xff]  ;;  %v300_v52 = vld [vmem:[%s5149_s20 + $0x68] sm:$0xff]  ;;  %v301_v54 = vld [vmem:[%s5149_s20 + $0x70] sm:$0xff]  ;;  %p4910_p3 = pnand %p4909_p2, %p4903_p13 }
  0x27   : > { %4486 = vmatmul.mubr.msk.f32.gmra.mrb[2].mxu0 %vm335_vm0, %v288_v28  ;;  %460 = vmatprep.mubr.f32.mxu1 %v4996_v7  ;;  %v326_v55 = vld [vmem:[%s5144_s17 + $0x78] sm:$0xff] }
  0x28   : > { %669 = vmatprep.mubr.f32.mxu0 %v4996_v7  ;;  %v302_v56 = vld [vmem:[%s5149_s20 + $0x78] sm:$0xff]  ;;  %s4319_s20 = scalar_lea.sflag [#allocation3], %s5564_s28 }
  0x2a   : > { %4471 = vmatmul.mubr.msk.f32.gmra.mrb[4].mxu1 %vm335_vm0, %v313_v29 }
  0x2b   : > { %4487 = vmatmul.mubr.msk.f32.gmra.mrb[4].mxu0 %vm335_vm0, %v289_v30  ;;  %466 = vmatprep.mubr.f32.mxu1 %v4996_v7 }
  0x2c   : > { %675 = vmatprep.mubr.f32.mxu0 %v4996_v7 }
  0x2e   : > { %4472 = vmatmul.mubr.msk.f32.gmra.mrb[6].mxu1 %vm335_vm0, %v314_v31 }
  0x2f   : > { %4488 = vmatmul.mubr.msk.f32.gmra.mrb[6].mxu0 %vm335_vm0, %v290_v32  ;;  %472 = vmatprep.mubr.f32.mxu1 %v4996_v7 }
  0x30   : > { %681 = vmatprep.mubr.f32.mxu0 %v4996_v7 }
  0x32   : > { %4473 = vmatmul.mubr.msk.f32.gmra.mrb[8].mxu1 %vm335_vm0, %v315_v33 }
  0x33   : > { %4489 = vmatmul.mubr.msk.f32.gmra.mrb[8].mxu0 %vm335_vm0, %v291_v34  ;;  %478 = vmatprep.mubr.f32.mxu1 %v4996_v7 }
  0x34   : > { %687 = vmatprep.mubr.f32.mxu0 %v4996_v7 }
  0x36   : > { %4474 = vmatmul.mubr.msk.f32.gmra.mrb[10].mxu1 %vm335_vm0, %v316_v35 }
  0x37   : > { %4490 = vmatmul.mubr.msk.f32.gmra.mrb[10].mxu0 %vm335_vm0, %v292_v36  ;;  %484 = vmatprep.mubr.f32.mxu1 %v4996_v7 }
  0x38   : > { %693 = vmatprep.mubr.f32.mxu0 %v4996_v7 }
  0x3a   : > { %4475 = vmatmul.mubr.msk.f32.gmra.mrb[12].mxu1 %vm335_vm0, %v317_v37 }
  0x3b   : > { %4491 = vmatmul.mubr.msk.f32.gmra.mrb[12].mxu0 %vm335_vm0, %v293_v38  ;;  %490 = vmatprep.mubr.f32.mxu1 %v4996_v7 }
  0x3c   : > { %699 = vmatprep.mubr.f32.mxu0 %v4996_v7 }
  0x3e   : > { %4476 = vmatmul.mubr.msk.f32.gmra.mrb[14].mxu1 %vm335_vm0, %v318_v39 }
  0x3f   : > { %4492 = vmatmul.mubr.msk.f32.gmra.mrb[14].mxu0 %vm335_vm0, %v294_v40  ;;  %496 = vmatprep.mubr.f32.mxu1 %v4996_v7 }
  0x40   : > { %705 = vmatprep.mubr.f32.mxu0 %v4996_v7 }
  0x42   : > { %4477 = vmatmul.mubr.msk.f32.gmra.mrb[16].mxu1 %vm335_vm0, %v319_v41 }
  0x43   : > { %4493 = vmatmul.mubr.msk.f32.gmra.mrb[16].mxu0 %vm335_vm0, %v295_v42  ;;  %502 = vmatprep.mubr.f32.mxu1 %v4996_v7 }
  0x44   : > { %711 = vmatprep.mubr.f32.mxu0 %v4996_v7 }
  0x46   : > { %4478 = vmatmul.mubr.msk.f32.gmra.mrb[18].mxu1 %vm335_vm0, %v320_v43 }
  0x47   : > { %4494 = vmatmul.mubr.msk.f32.gmra.mrb[18].mxu0 %vm335_vm0, %v296_v44  ;;  %508 = vmatprep.mubr.f32.mxu1 %v4996_v7 }
  0x48   : > { %717 = vmatprep.mubr.f32.mxu0 %v4996_v7 }
  0x4a   : > { %4479 = vmatmul.mubr.msk.f32.gmra.mrb[20].mxu1 %vm335_vm0, %v321_v45 }
  0x4b   : > { %4495 = vmatmul.mubr.msk.f32.gmra.mrb[20].mxu0 %vm335_vm0, %v297_v46  ;;  %514 = vmatprep.mubr.f32.mxu1 %v4996_v7 }
  0x4c   : > { %723 = vmatprep.mubr.f32.mxu0 %v4996_v7 }
  0x4e   : > { %4480 = vmatmul.mubr.msk.f32.gmra.mrb[22].mxu1 %vm335_vm0, %v322_v47 }
  0x4f   : > { %4496 = vmatmul.mubr.msk.f32.gmra.mrb[22].mxu0 %vm335_vm0, %v298_v48  ;;  %520 = vmatprep.mubr.f32.mxu1 %v4996_v7 }
  0x50   : > { %729 = vmatprep.mubr.f32.mxu0 %v4996_v7 }
  0x52   : > { %4481 = vmatmul.mubr.msk.f32.gmra.mrb[24].mxu1 %vm335_vm0, %v323_v49 }
  0x53   : > { %4497 = vmatmul.mubr.msk.f32.gmra.mrb[24].mxu0 %vm335_vm0, %v299_v50  ;;  %526 = vmatprep.mubr.f32.mxu1 %v4996_v7 }
  0x54   : > { %735 = vmatprep.mubr.f32.mxu0 %v4996_v7 }
  0x56   : > { %4482 = vmatmul.mubr.msk.f32.gmra.mrb[26].mxu1 %vm335_vm0, %v324_v51 }
  0x57   : > { %4498 = vmatmul.mubr.msk.f32.gmra.mrb[26].mxu0 %vm335_vm0, %v300_v52  ;;  %532 = vmatprep.mubr.f32.mxu1 %v4996_v7 }
  0x58   : > { %741 = vmatprep.mubr.f32.mxu0 %v4996_v7 }
  0x5a   : > { %4483 = vmatmul.mubr.msk.f32.gmra.mrb[28].mxu1 %vm335_vm0, %v325_v53 }
  0x5b   : > { %4499 = vmatmul.mubr.msk.f32.gmra.mrb[28].mxu0 %vm335_vm0, %v301_v54  ;;  %538 = vmatprep.mubr.f32.mxu1 %v4996_v7 }
  0x5c   : > { %747 = vmatprep.mubr.f32.mxu0 %v4996_v7 }
  0x5e   : > { %4484 = vmatmul.mubr.msk.f32.gmra.mrb[30].mxu1 %vm335_vm0, %v326_v55 }
  0x5f   : > { %4500 = vmatmul.mubr.msk.f32.gmra.mrb[30].mxu0 %vm335_vm0, %v302_v56 }
  0xf5   : > { %v450_v62 = vpop.f32.mrb[0].mxu1 }
  0xf6   : > { %v659_v0 = vpop.f32.mrb[0].mxu0  ;;  %v452_v1 = vpop.f32.mrb[1].mxu1 }
  0xf7   : > { %v660_v3 = vadd.f32 %v659_v0, %v450_v62  ;;  %v661_v4 = vpop.f32.mrb[1].mxu0  ;;  %v7389_v62 = vmov 683565275  }
  0xf8   : > { %v662_v5 = vadd.f32 %v661_v4, %v452_v1 }
  0xf9   : > { %v766_v6 = vadd.f32 %v5248_v63, %v660_v3  ;;  %v456_v7 = vpop.f32.mrb[2].mxu1 }
  0xfa   : > { %v767_v8 = vadd.f32 %v5250_v2, %v662_v5  ;;  %v665_v9 = vpop.f32.mrb[2].mxu0  ;;  %v458_v10 = vpop.f32.mrb[3].mxu1  ;;  %v7385_v5 = vmov 2475754826  }
  0xfb   : > { %v814_v11 = vmul.f32 %v766_v6, %v766_v6  ;;  %v5254_v12 = vmul.f32 20.0, %v766_v6  ;;  %v666_v13 = vadd.f32 %v665_v9, %v456_v7  ;;  %v667_v14 = vpop.f32.mrb[3].mxu0  ;;  %v7380_v7 = vmov 2131351028  }
  0xfc   : > { %v830_v15 = vmul.f32 %v767_v8, %v767_v8  ;;  %v668_v16 = vadd.f32 %v667_v14, %v458_v10  ;;  %v5260_v26 = vmul.f32 -20.0, %v767_v8  ;;  %v7382_v9 = vmov 2102212464  }
  0xfd   : > { %v942_v17 = vand.u32 2147483647, %v5254_v12  ;;  %v945_v18 = vand.u32 2139095040, %v5254_v12  ;;  %v462_v19 = vpop.f32.mrb[4].mxu1  ;;  %v768_v21 = vadd.f32 %v5248_v63, %v666_v13  ;;  %vm944_vm13 = vcmp.lt.s32.totalorder %v5254_v12, 0 }
  0xfe   : > { %v846_v20 = vadd.f32 %v830_v15, %v814_v11  ;;  %v769_v22 = vadd.f32 %v5250_v2, %v668_v16  ;;  %v671_v23 = vpop.f32.mrb[4].mxu0  ;;  %v464_v24 = vpop.f32.mrb[5].mxu1  ;;  %v7395_v11 = vmov 920167782  }
  0xff   : > { %v946_v25 = vshrl.u32 %v945_v18, 23  ;;  %v672_v27 = vadd.f32 %v671_v23, %v462_v19  ;;  %v673_v28 = vpop.f32.mrb[5].mxu0  ;;  %v949_v29 = vand.u32 8388607, %v942_v17  ;;  %v815_v31 = vmul.f32 %v768_v21, %v768_v21 }
 0x100   : > { %v5264_v30 = vmul.f32 100.0, %v846_v20  ;;  %v5266_v32 = vmul.f32 20.0, %v768_v21  ;;  %v831_v34 = vmul.f32 %v769_v22, %v769_v22  ;;  %v5280_v46 = vmul.f32 -20.0, %v769_v22 }
 0x101   : > { %v4501_v33 = vadd.s32 4294967169, %v946_v25  ;;  %v5268_v35 = vpop.f32.mrb[6].mxu1  ;;  %v950_v43 = vor.u32 8388608, %v949_v29  ;;  %v5285_v48 = vadd.f32 %v5248_v63, %v672_v27  ;;  %v5289_v52 = vadd.f32 %v673_v28, %v464_v24 }
 0x102   : > { %v878_v36 = vsub.f32 %v5260_v26, %v5264_v30  ;;  %v1048_v37 = vand.u32 2139095040, %v5266_v32  ;;  %v5273_v38 = vpop.f32.mrb[6].mxu0  ;;  %v5275_v39 = vpop.f32.mrb[7].mxu1  ;;  %v847_v41 = vadd.f32 %v831_v34, %v815_v31  ;;  %v7379_v44 = vand.u32 2147483647, %v5266_v32 }
 0x103   : > { %v952_v40 = vadd.s32 1, %v4501_v33  ;;  %v5277_v42 = vpop.f32.mrb[7].mxu0  ;;  %v5299_v59 = vshll.u32 %v950_v43, 8  ;;  %v5305_v3 = vmul.f32 20.0, %v5285_v48  ;;  %v7393_v23 = vmov 1326507024  }
 0x104   : > { %v1049_v45 = vshrl.u32 %v1048_v37, 23  ;;  %v5282_v47 = vmul.f32 100.0, %v847_v41  ;;  %v1052_v60 = vand.u32 8388607, %v7379_v44  ;;  %vm5396_vm15 = vcmp.le.f32.partialorder %v942_v17, 0.7853982 }
 0x105   : > { %vm953_vm1 = vcmp.gt.s32.totalorder %v952_v40, 0  ;;  %v5287_v49 = vpop.f32.mrb[8].mxu1  ;;  %v771_v26 = vadd.f32 %v5250_v2, %v5289_v52 }
 0x106   : > { %v954_v50 = vsel %vm953_vm1, %v952_v40, 0  ;;  %v4505_v51 = vadd.s32 4294967169, %v1049_v45  ;;  %v5291_v53 = vpop.f32.mrb[8].mxu0  ;;  %v5293_v54 = vpop.f32.mrb[9].mxu1  ;;  %v879_v57 = vsub.f32 %v5280_v46, %v5282_v47 }
 0x107   : > { %v955_v55 = vshrl.u32 %v954_v50, 5  ;;  %v956_v56 = vand.u32 31, %v954_v50  ;;  %v5297_v58 = vpop.f32.mrb[9].mxu0  ;;  %v5431_v46 = vmul.f32 -20.0, %v771_v26 }
 0x108   : > { %v1055_v1 = vadd.s32 1, %v4505_v51  ;;  %v1053_v51 = vor.u32 8388608, %v1052_v60 }
 0x109   : > { %v957_v61 = vsub.s32 32, %v956_v56  ;;  %v959_v0 = vshll.u32 %v7389_v62, %v956_v56  ;;  %v5307_v4 = vpop.f32.mrb[10].mxu1  ;;  %v962_v6 = vshll.u32 %v7385_v5, %v956_v56  ;;  %v965_v8 = vshll.u32 %v7380_v7, %v956_v56 }
 0x10a   : > { %v968_v10 = vshll.u32 %v7382_v9, %v956_v56  ;;  %v971_v13 = vshll.u32 %v7395_v11, %v956_v56  ;;  %v5313_v14 = vpop.f32.mrb[10].mxu0  ;;  %v5315_v15 = vpop.f32.mrb[11].mxu1  ;;  %vm974_vm2 = vcmp.lt.s32.totalorder %v955_v55, 1  ;;  %vm976_vm3 = vcmp.lt.s32.totalorder %v955_v55, 3 }
 0x10b   : > { %v960_v16 = vshrl.u32 %v7385_v5, %v957_v61  ;;  %v963_v18 = vshrl.u32 %v7380_v7, %v957_v61  ;;  %v966_v19 = vshrl.u32 %v7382_v9, %v957_v61  ;;  %v5320_v20 = vpop.f32.mrb[11].mxu0  ;;  %v958_v21 = vshrl.u32 %v7389_v62, %v957_v61 }
 0x10c   : > { %v969_v22 = vshrl.u32 %v7395_v11, %v957_v61  ;;  %v972_v24 = vshrl.u32 %v7393_v23, %v957_v61  ;;  %vm1056_vm4 = vcmp.gt.s32.totalorder %v1055_v1, 0  ;;  %vm977_vm5 = vcmp.lt.s32.totalorder %v955_v55, 4 }
 0x10d   : > { %v961_v25 = vor.u32 %v960_v16, %v959_v0  ;;  %v964_v27 = vor.u32 %v963_v18, %v962_v6  ;;  %v967_v28 = vor.u32 %v966_v19, %v965_v8  ;;  %v1057_v33 = vsel %vm1056_vm4, %v1055_v1, 0 }
 0x10e   : > { %v970_v29 = vor.u32 %v969_v22, %v968_v10  ;;  %v973_v31 = vor.u32 %v972_v24, %v971_v13  ;;  %vm975_vm6 = vcmp.lt.s32.totalorder %v955_v55, 2  ;;  %v1059_v0 = vand.u32 31, %v1057_v33 }
 0x10f   : > { %v978_v34 = vsel %vm974_vm2, %v958_v21, %v961_v25  ;;  %v979_v37 = vsel %vm977_vm5, %v967_v28, 2102212464  ;;  %v982_v40 = vsel %vm974_vm2, %v961_v25, %v964_v27  ;;  %v986_v41 = vsel %vm974_vm2, %v964_v27, %v967_v28 }
 0x110   : > { %v980_v43 = vsel %vm976_vm3, %v964_v27, %v979_v37  ;;  %v983_v45 = vsel %vm977_vm5, %v970_v29, 920167782  ;;  %v987_v50 = vsel %vm977_vm5, %v973_v31, 1326507024  ;;  %v1058_v19 = vshrl.u32 %v1057_v33, 5 }
 0x111   : > { %v984_v56 = vsel %vm976_vm3, %v967_v28, %v983_v45  ;;  %v988_v61 = vsel %vm976_vm3, %v970_v29, %v987_v50  ;;  %v981_v6 = vsel %vm975_vm6, %v978_v34, %v980_v43  ;;  %v1060_v60 = vsub.s32 32, %v1059_v0  ;;  %v5347_v28 = vpop.f32.mrb[12].mxu1  ;;  %v5349_v29 = vpop.f32.mrb[12].mxu0 }
 0x112   : > { %v985_v1 = vsel %vm975_vm6, %v982_v40, %v984_v56  ;;  %v989_v8 = vsel %vm975_vm6, %v986_v41, %v988_v61  ;;  %v5340_v21 = vshll.u32 %v1053_v51, 8  ;;  %v1151_v55 = vand.u32 2139095040, %v5305_v3 }
 0x113   : > { %v5332_v10 = vmul.u32.u64.low %v5299_v59, %v989_v8  ;;  %v5333_v13 = vmul.u32.u64.high %v5299_v59, %v989_v8, %v5332_v10  ;;  %v5336_v16 = vmul.u32.u64.low %v5299_v59, %v985_v1  ;;  %v5337_v18 = vmul.u32.u64.high %v5299_v59, %v985_v1, %v5336_v16 }
 0x114   : > { %v997_v22 = vmul.u32 %v5299_v59, %v981_v6  ;;  %v1062_v24 = vshll.u32 %v7389_v62, %v1059_v0  ;;  %v1065_v25 = vshll.u32 %v7385_v5, %v1059_v0  ;;  %v1068_v27 = vshll.u32 %v7380_v7, %v1059_v0 }
 0x115   : > { %v1063_v31 = vshrl.u32 %v7385_v5, %v1060_v60  ;;  %v1066_v33 = vshrl.u32 %v7380_v7, %v1060_v60  ;;  %v1069_v34 = vshrl.u32 %v7382_v9, %v1060_v60  ;;  %v1071_v37 = vshll.u32 %v7382_v9, %v1059_v0 }
 0x116   : > { %vm999_vm7 = vc.u32 %v5333_v13, %v5336_v16  ;;  %v1000_v59 = vadd.s32 1, %v5337_v18  ;;  %v1072_v40 = vshrl.u32 %v7395_v11, %v1060_v60  ;;  %v1074_v41 = vshll.u32 %v7395_v11, %v1059_v0 }
 0x117   : > { %v1064_v43 = vor.u32 %v1063_v31, %v1062_v24  ;;  %v1067_v45 = vor.u32 %v1066_v33, %v1065_v25  ;;  %v1070_v50 = vor.u32 %v1069_v34, %v1068_v27  ;;  %v1075_v51 = vshrl.u32 %v7393_v23, %v1060_v60 }
 0x118   : > { %v1001_v56 = vsel %vm999_vm7, %v1000_v59, %v5337_v18  ;;  %v1073_v61 = vor.u32 %v1072_v40, %v1071_v37  ;;  %vm1077_vm8 = vcmp.lt.s32.totalorder %v1058_v19, 1  ;;  %vm1080_vm9 = vcmp.lt.s32.totalorder %v1058_v19, 4 }
 0x119   : > { %v1002_v6 = vadd.s32 %v1001_v56, %v997_v22  ;;  %v1076_v1 = vor.u32 %v1075_v51, %v1074_v41  ;;  %vm1079_vm10 = vcmp.lt.s32.totalorder %v1058_v19, 3  ;;  %v1082_v8 = vsel %vm1080_vm9, %v1070_v50, 2102212464 }
 0x11a   : > { %v1061_v10 = vshrl.u32 %v7389_v62, %v1060_v60  ;;  %v1085_v44 = vsel %vm1077_vm8, %v1064_v43, %v1067_v45  ;;  %v1086_v7 = vsel %vm1080_vm9, %v1073_v61, 920167782  ;;  %v1089_v9 = vsel %vm1077_vm8, %v1067_v45, %v1070_v50 }
 0x11b   : > { %v1003_v0 = vadd.s32 536870912, %v1002_v6  ;;  %vm1078_vm11 = vcmp.lt.s32.totalorder %v1058_v19, 2  ;;  %v1087_v24 = vsel %vm1079_vm10, %v1070_v50, %v1086_v7  ;;  %v1090_v25 = vsel %vm1080_vm9, %v1076_v1, 1326507024  ;;  %v5381_v1 = vpop.f32.mrb[13].mxu0 }
 0x11c   : > { %v1081_v27 = vsel %vm1077_vm8, %v1061_v10, %v1064_v43  ;;  %v1083_v31 = vsel %vm1079_vm10, %v1067_v45, %v1082_v8  ;;  %v1088_v33 = vsel %vm1078_vm11, %v1085_v44, %v1087_v24  ;;  %v1091_v18 = vsel %vm1079_vm10, %v1073_v61, %v1090_v25  ;;  %v5379_v61 = vpop.f32.mrb[13].mxu1 }
 0x11d   : > { %v1004_v34 = vshrl.u32 %v1003_v0, 30  ;;  %v1092_v37 = vsel %vm1078_vm11, %v1089_v9, %v1091_v18  ;;  %v5364_v22 = vmul.u32.u64.low %v5340_v21, %v1088_v33  ;;  %v5365_v59 = vmul.u32.u64.high %v5340_v21, %v1088_v33, %v5364_v22 }
 0x11e   : > { %v5368_v40 = vmul.u32.u64.low %v5340_v21, %v1092_v37  ;;  %v5369_v60 = vmul.u32.u64.high %v5340_v21, %v1092_v37, %v5368_v40  ;;  %v1152_v41 = vshrl.u32 %v1151_v55, 23  ;;  %v1084_v56 = vsel %vm1078_vm11, %v1081_v27, %v1083_v31 }
 0x11f   : > { %v1005_v51 = vshll.u32 %v1004_v34, 30  ;;  %v7384_v7 = vand.u32 2147483647, %v5305_v3  ;;  %v678_v44 = vadd.f32 %v5273_v38, %v5268_v35  ;;  %v5376_v9 = vadd.f32 %v5277_v42, %v5275_v39 }
 0x120   : > { %v4509_v19 = vadd.s32 4294967169, %v1152_v41  ;;  %v1028_v45 = vsub.s32 4, %v1004_v34  ;;  %v1103_v50 = vadd.s32 1, %v5365_v59  ;;  %v1100_v55 = vmul.u32 %v5340_v21, %v1084_v56  ;;  %v5425_v56 = vpop.f32.mrb[14].mxu0 }
 0x121   : > { %v1006_v43 = vsub.s32 %v1002_v6, %v1005_v51  ;;  %vm1102_vm12 = vc.u32 %v5369_v60, %v5364_v22  ;;  %v1155_v39 = vand.u32 8388607, %v7384_v7  ;;  %v910_v21 = vmul.f32 1.442695, %v878_v36  ;;  %7405 = vst [vmem:[#allocation8_spill] sm:$0xff] %v5425_v56 }
 0x122   : > { %v1158_v8 = vadd.s32 1, %v4509_v19  ;;  %v1104_v35 = vsel %vm1102_vm12, %v1103_v50, %v5365_v59  ;;  %v1029_v6 = vsel %vm944_vm13, %v1028_v45, %v1004_v34  ;;  %v5408_v36 = vmul.f32 %v5285_v48, %v5285_v48  ;;  %v5423_v48 = vpop.f32.mrb[14].mxu1 }
 0x123   : > { %v1008_v10 = vsub.s32 0, %v1006_v43  ;;  %v1105_v38 = vadd.s32 %v1104_v35, %v1100_v55  ;;  %v1031_v33 = vsel %vm5396_vm15, 0, %v1029_v6  ;;  %v1156_v34 = vor.u32 8388608, %v1155_v39 }
 0x124   : > { %vm1159_vm14 = vcmp.gt.s32.totalorder %v1158_v8, 0  ;;  %4804 = vpow2.f32 %v910_v21  ;;  %v998_v17 = vadd.s32 %v5336_v16, %v5333_v13  ;;  %v5416_v59 = vmul.f32 1.442695, %v879_v57 }
 0x125   : > { %v4502_v42 = vmin.u32 %v1008_v10, %v1006_v43  ;;  %v1106_v0 = vadd.s32 536870912, %v1105_v38  ;;  %v1160_v24 = vsel %vm1159_vm14, %v1158_v8, 0  ;;  %v5418_v41 = vand.u32 3, %v1031_v33 }
 0x126   : > { %v1162_v31 = vand.u32 31, %v1160_v24  ;;  %v5420_v52 = vadd.s32 3, %v1031_v33  ;;  %v1101_v51 = vadd.s32 %v5364_v22, %v5369_v60  ;;  %v5429_v19 = vshll.u32 %v1156_v34, 8 }
 0x127   : > { %v1010_v27 = vclz %v4502_v42  ;;  %v5402_v18 = vshrl.u32 %v1106_v0, 30  ;;  %v5433_v45 = vshrl.u32 %v1160_v24, 5  ;;  %v5435_v50 = vmul.f32 %v771_v26, %v771_v26 }
 0x128   : > { %v1163_v40 = vsub.s32 32, %v1162_v31  ;;  %v7406_v60 = vmov 2102212464   ;;  %v5441_v10 = vadd.f32 %v5248_v63, %v678_v44  ;;  %v7407_v42 = vmov 2131351028  }
 0x129   : > { %v4503_v30 = vadd.s32 4294967294, %v1010_v27  ;;  %v1108_v37 = vshll.u32 %v5402_v18, 30  ;;  %v1165_v0 = vshll.u32 %v7389_v62, %v1162_v31  ;;  %v1168_v24 = vshll.u32 %v7385_v5, %v1162_v31 }
 0x12a   : > { %v1166_v22 = vshrl.u32 %v7385_v5, %v1163_v40  ;;  %v1172_v8 = vshrl.u32 %v7406_v60, %v1163_v40  ;;  %v1169_v6 = vshrl.u32 %v7407_v42, %v1163_v40  ;;  %v1171_v27 = vshll.u32 %v7407_v42, %v1162_v31 }
 0x12b   : > { %vm4504_vm0 = vcmp.lt.s32.totalorder %v4503_v30, 0  ;;  %v5427_v16 = vsub.s32 %v1105_v38, %v1108_v37  ;;  %v1174_v26 = vshll.u32 %v7406_v60, %v1162_v31  ;;  %v1175_v44 = vshrl.u32 %v7395_v11, %v1163_v40 }
 0x12c   : > { %v1013_v13 = vsel %vm4504_vm0, 0, %v4503_v30  ;;  %v1178_v37 = vshrl.u32 %v7393_v23, %v1163_v40  ;;  %v1177_v7 = vshll.u32 %v7395_v11, %v1162_v31  ;;  %vm1180_vm1 = vcmp.lt.s32.totalorder %v5433_v45, 1 }
 0x12d   : > { %v1014_v47 = vsub.s32 32, %v1013_v13  ;;  %v1018_v57 = vsub.s32 4294967266, %v1013_v13  ;;  %v1111_v55 = vsub.s32 0, %v5427_v16  ;;  %v1015_v35 = vshll.u32 %v1006_v43, %v1013_v13 }
 0x12e   : > { %v1167_v43 = vor.u32 %v1166_v22, %v1165_v0  ;;  %v5451_v13 = vpop.eup %4804  ;;  %v1179_v56 = vor.u32 %v1178_v37, %v1177_v7  ;;  %vm1181_vm2 = vcmp.lt.s32.totalorder %v5433_v45, 2  ;;  %vm1183_vm3 = vcmp.lt.s32.totalorder %v5433_v45, 4 }
 0x12f   : > { %v1016_v38 = vshrl.u32 %v998_v17, %v1014_v47  ;;  %v1019_v39 = vadd.s32 127, %v1018_v57  ;;  %v4506_v21 = vmin.u32 %v1111_v55, %v5427_v16  ;;  %v1173_v17 = vor.u32 %v1172_v8, %v1171_v27 }
 0x130   : > { %v1164_v57 = vshrl.u32 %v7389_v62, %v1163_v40  ;;  %v1170_v55 = vor.u32 %v1169_v6, %v1168_v24  ;;  %vm1182_vm5 = vcmp.lt.s32.totalorder %v5433_v45, 3  ;;  %vm1047_vm6 = vcmp.lt.s32.totalorder %v5266_v32, 0 }
 0x131   : > { %v1017_v33 = vor.u32 %v1016_v38, %v1015_v35  ;;  %v1020_v34 = vshll.u32 %v1019_v39, 23  ;;  %v1113_v30 = vclz %v4506_v21  ;;  %v1176_v38 = vor.u32 %v1175_v44, %v1174_v26 }
 0x132   : > { %v1184_v40 = vsel %vm1180_vm1, %v1164_v57, %v1167_v43  ;;  %v1185_v31 = vsel %vm1183_vm3, %v1173_v17, 2102212464  ;;  %v1188_v6 = vsel %vm1180_vm1, %v1167_v43, %v1170_v55  ;;  %v1193_v26 = vsel %vm1183_vm3, %v1179_v56, 1326507024 }
 0x133   : > { %v1021_v47 = vor.u32 4788187, %v1020_v34  ;;  %v1024_v5 = vcvt.s32.f32 %v1017_v33  ;;  %v4507_v35 = vadd.s32 4294967294, %v1113_v30  ;;  %v1189_v7 = vsel %vm1183_vm3, %v1176_v38, 920167782 }
 0x134   : > { %v1186_v27 = vsel %vm1182_vm5, %v1170_v55, %v1185_v31  ;;  %v1192_v34 = vsel %vm1180_vm1, %v1170_v55, %v1173_v17  ;;  %v1194_v43 = vsel %vm1182_vm5, %v1176_v38, %v1193_v26  ;;  %v5494_v56 = vand.u32 3, %v5420_v52 }
 0x135   : > { %v1022_v39 = vand.u32 2147483647, %v1021_v47  ;;  %vm4508_vm4 = vcmp.lt.s32.totalorder %v4507_v35, 0  ;;  %v1195_v47 = vsel %vm1181_vm2, %v1192_v34, %v1194_v43  ;;  %v848_v31 = vadd.f32 %v5435_v50, %v5408_v36  ;;  %v5551_v34 = vpop.f32.mrb[15].mxu0 }
 0x136   : > { %v1116_v8 = vsel %vm4508_vm4, 0, %v4507_v35  ;;  %v1187_v25 = vsel %vm1181_vm2, %v1184_v40, %v1186_v27  ;;  %v5517_v36 = vadd.f32 %v5297_v58, %v5293_v54  ;;  %v5521_v45 = vadd.f32 %v5313_v14, %v5307_v4 }
 0x137   : > { %v1025_v22 = vmul.f32 %v1024_v5, %v1022_v39  ;;  %v1117_v21 = vsub.s32 32, %v1116_v8  ;;  %v1118_v0 = vshll.u32 %v5427_v16, %v1116_v8  ;;  %v1121_v24 = vsub.s32 4294967266, %v1116_v8 }
 0x138   : > { %v1190_v5 = vsel %vm1182_vm5, %v1173_v17, %v1189_v7  ;;  %v5497_v38 = vmul.u32.u64.low %v5429_v19, %v1195_v47  ;;  %v5498_v39 = vmul.u32.u64.high %v5429_v19, %v1195_v47, %v5497_v38  ;;  %v1131_v8 = vsub.s32 4, %v5402_v18 }
 0x139   : > { %v1026_v33 = vxor.u32 2147483648, %v1025_v22  ;;  %v1119_v44 = vshrl.u32 %v1101_v51, %v1117_v21  ;;  %v1122_v30 = vadd.s32 127, %v1121_v24  ;;  %v1191_v16 = vsel %vm1181_vm2, %v1188_v6, %v1190_v5  ;;  %v5549_v5 = vpop.f32.mrb[15].mxu1 }
 0x13a   : > { %v5486_v57 = vmul.u32.u64.low %v5429_v19, %v1191_v16  ;;  %v5487_v17 = vmul.u32.u64.high %v5429_v19, %v1191_v16, %v5486_v57  ;;  %v5506_v7 = vmul.f32 100.0, %v848_v31  ;;  %v5509_v21 = vmul.f32 20.0, %v5441_v10 }
 0x13b   : > { %v1027_v37 = vsel %vm944_vm13, %v1026_v33, %v1025_v22  ;;  %v1120_v55 = vor.u32 %v1119_v44, %v1118_v0  ;;  %v1123_v35 = vshll.u32 %v1122_v30, 23  ;;  %v5513_v24 = vadd.f32 %v5291_v53, %v5287_v49 }
 0x13c   : > { %v1030_v51 = vsel %vm5396_vm15, %v5254_v12, %v1027_v37  ;;  %v1206_v52 = vadd.s32 1, %v5487_v17  ;;  %v1203_v50 = vmul.u32 %v5429_v19, %v1187_v25  ;;  %vm1205_vm7 = vc.u32 %v5498_v39, %v5486_v57 }
 0x13d   : > { %4806 = vcosq.f32 %v1030_v51  ;;  %v1124_v22 = vor.u32 4788187, %v1123_v35  ;;  %v1127_v6 = vcvt.s32.f32 %v1120_v55  ;;  %v880_v40 = vsub.f32 %v5431_v46, %v5506_v7 }
 0x13e   : > { %4808 = vsinq.f32 %v1030_v51  ;;  %v5530_v49 = vadd.f32 %v5250_v2, %v5376_v9  ;;  %v1132_v54 = vsel %vm1047_vm6, %v1131_v8, %v5402_v18  ;;  %v1207_v58 = vsel %vm1205_vm7, %v1206_v52, %v5487_v17 }
 0x13f   : > { %v1125_v0 = vand.u32 2147483647, %v1124_v22  ;;  %v1254_v4 = vand.u32 2139095040, %v5509_v21  ;;  %v7408_v14 = vand.u32 2147483647, %v5266_v32  ;;  %4810 = vpow2.f32 %v5416_v59 }
 0x140   : > { %v1208_v27 = vadd.s32 %v1207_v58, %v1203_v50  ;;  %v817_v9 = vmul.f32 %v5441_v10, %v5441_v10  ;;  %vm1034_vm9 = vweird.f32 %v5254_v12  ;;  %vm1036_vm10 = vcmp.lt.s32.totalorder %v5418_v41, 2 }
 0x141   : > { %v1128_v53 = vmul.f32 %v1127_v6, %v1125_v0  ;;  %vm5539_vm8 = vcmp.le.f32.partialorder %v7408_v14, 0.7853982  ;;  %vm1037_vm11 = vcmp.eq.s32.totalorder %v5418_v41, 0  ;;  %v1255_v33 = vshrl.u32 %v1254_v4, 23 }
 0x142   : > { %vm1040_vm12 = vcmp.eq.s32.totalorder %v5418_v41, 2  ;;  %v1134_v59 = vsel %vm5539_vm8, 0, %v1132_v54  ;;  %v1209_v26 = vadd.s32 536870912, %v1208_v27  ;;  %v833_v10 = vmul.f32 %v5530_v49, %v5530_v49 }
 0x143   : > { %v1129_v18 = vxor.u32 2147483648, %v1128_v53  ;;  %vm2718_vm13 = vcmp.eq.s32.totalorder %v5494_v56, 0  ;;  %v7388_v30 = vand.u32 2147483647, %v5509_v21  ;;  %v4513_v16 = vadd.s32 4294967169, %v1255_v33 }
 0x144   : > { %vm2721_vm14 = vcmp.eq.s32.totalorder %v5494_v56, 2  ;;  %v5569_v47 = vshrl.u32 %v1209_v26, 30  ;;  %v849_v17 = vadd.f32 %v833_v10, %v817_v9  ;;  %v2819_v35 = vadd.s32 3, %v1134_v59 }
 0x145   : > { %v1130_v44 = vsel %vm1047_vm6, %v1129_v18, %v1128_v53  ;;  %v1261_v38 = vadd.s32 1, %v4513_v16  ;;  %v5571_v22 = vand.u32 3, %v1134_v59  ;;  %vm1150_vm15 = vcmp.lt.s32.totalorder %v5305_v3, 0  ;;  %v5609_v16 = vpop.f32.mrb[16].mxu0 }
 0x146   : > { %v1133_v37 = vsel %vm5539_vm8, %v5266_v32, %v1130_v44  ;;  %v1211_v8 = vshll.u32 %v5569_v47, 30  ;;  %v1258_v52 = vand.u32 8388607, %v7388_v30  ;;  %vm2717_vm1 = vcmp.lt.s32.totalorder %v5494_v56, 2  ;;  %v5607_v44 = vpop.f32.mrb[16].mxu1 }
 0x147   : > { %v4807_v43 = vpop.eup %4806  ;;  %4812 = vcosq.f32 %v1133_v37  ;;  %vm1262_vm0 = vcmp.gt.s32.totalorder %v1261_v38, 0  ;;  %v2820_v4 = vand.u32 3, %v2819_v35  ;;  %v5589_v14 = vmul.f32 100.0, %v849_v17 }
 0x148   : > { %v4809_v51 = vpop.eup %4808  ;;  %v1041_v55 = vxor.u32 2147483648, %v4807_v43  ;;  %4814 = vsinq.f32 %v1133_v37  ;;  %v5585_v53 = vsub.s32 %v1208_v27, %v1211_v8  ;;  %v1263_v27 = vsel %vm1262_vm0, %v1261_v38, 0 }
 0x149   : > { %v1038_v31 = vxor.u32 2147483648, %v4809_v51  ;;  %v4811_v19 = vpop.eup %4810  ;;  %vm1139_vm2 = vcmp.lt.s32.totalorder %v5571_v22, 2  ;;  %vm1140_vm3 = vcmp.eq.s32.totalorder %v5571_v22, 0  ;;  %v1259_v59 = vor.u32 8388608, %v1258_v52 }
 0x14a   : > { %v1042_v25 = vsel %vm1040_vm12, %v1041_v55, %v4809_v51  ;;  %v2723_v6 = vsel %vm2721_vm14, %v1041_v55, %v4809_v51  ;;  %v1214_v56 = vsub.s32 0, %v5585_v53  ;;  %vm1137_vm4 = vweird.f32 %v5266_v32 }
 0x14b   : > { %v1039_v0 = vsel %vm1037_vm11, %v4807_v43, %v1038_v31  ;;  %v2720_v50 = vsel %vm2718_vm13, %v4807_v43, %v1038_v31  ;;  %vm1143_vm5 = vcmp.eq.s32.totalorder %v5571_v22, 2  ;;  %v1234_v26 = vsub.s32 4, %v5569_v47 }
 0x14c   : > { %v1043_v54 = vsel %vm1036_vm10, %v1039_v0, %v1042_v25  ;;  %v2724_v58 = vsel %vm2717_vm1, %v2720_v50, %v2723_v6  ;;  %v4510_v12 = vmin.u32 %v1214_v56, %v5585_v53  ;;  %v5605_v10 = vmul.f32 -20.0, %v5530_v49 }
 0x14d   : > { %v1044_v9 = vsel %vm1034_vm9, nan, %v1043_v54  ;;  %v2725_v18 = vsel %vm1034_vm9, nan, %v2724_v58  ;;  %vm2821_vm6 = vcmp.lt.s32.totalorder %v2820_v4, 2  ;;  %vm2822_vm7 = vcmp.eq.s32.totalorder %v2820_v4, 0 }
 0x14e   : > { %v2590_v33 = vmul.f32 %v5451_v13, %v1044_v9  ;;  %v4286_v41 = vmul.f32 %v5451_v13, %v2725_v18  ;;  %v5621_v13 = vshrl.u32 %v1263_v27, 5  ;;  %v1265_v49 = vand.u32 31, %v1263_v27 }
 0x14f   : > { %vm2825_vm8 = vcmp.eq.s32.totalorder %v2820_v4, 2  ;;  %v1204_v43 = vadd.s32 %v5486_v57, %v5498_v39  ;;  %v1216_v37 = vclz %v4510_v12  ;;  %v5627_v35 = vshll.u32 %v1259_v59, 8 }
 0x150   : > { %2606 = vst [vmem:[%s5613_s9] sm:$0xff] %v2590_v33  ;;  %4302 = vst [vmem:[%s5618_s10] sm:$0xff] %v4286_v41  ;;  %v1266_v55 = vsub.s32 32, %v1265_v49  ;;  %v5631_v38 = vadd.f32 %v5248_v63, %v5513_v24  ;;  %v5635_v31 = vadd.f32 %v5250_v2, %v5517_v36  ;;  %v5640_v57 = vsel %vm1150_vm15, %v1234_v26, %v5569_v47 }
 0x151   : > { %v4813_v51 = vpop.eup %4812  ;;  %v4511_v6 = vadd.s32 4294967294, %v1216_v37  ;;  %v1268_v39 = vshll.u32 %v7389_v62, %v1265_v49  ;;  %v7411_v0 = vmov 2475754826   ;;  %vm1283_vm9 = vcmp.lt.s32.totalorder %v5621_v13, 1 }
 0x152   : > { %v4815_v8 = vpop.eup %4814  ;;  %v1144_v25 = vxor.u32 2147483648, %v4813_v51  ;;  %v1269_v50 = vshrl.u32 %v7411_v0, %v1266_v55  ;;  %v1271_v24 = vshll.u32 %v7411_v0, %v1265_v49  ;;  %v1272_v54 = vshrl.u32 %v7407_v42, %v1266_v55 }
 0x153   : > { %v1141_v52 = vxor.u32 2147483648, %v4815_v8  ;;  %vm4512_vm10 = vcmp.lt.s32.totalorder %v4511_v6, 0  ;;  %v1274_v47 = vshll.u32 %v7407_v42, %v1265_v49  ;;  %v7412_v22 = vand.u32 2147483647, %v5305_v3 }
 0x154   : > { %v1145_v36 = vsel %vm1143_vm5, %v1144_v25, %v4815_v8  ;;  %v2827_v58 = vsel %vm2825_vm8, %v1144_v25, %v4815_v8  ;;  %v1219_v56 = vsel %vm4512_vm10, 0, %v4511_v6  ;;  %v1270_v27 = vor.u32 %v1269_v50, %v1268_v39 }
 0x155   : > { %v1142_v9 = vsel %vm1140_vm3, %v4813_v51, %v1141_v52  ;;  %v2824_v18 = vsel %vm2822_vm7, %v4813_v51, %v1141_v52  ;;  %v1220_v59 = vsub.s32 32, %v1219_v56  ;;  %v1221_v12 = vshll.u32 %v5585_v53, %v1219_v56 }
 0x156   : > { %v1146_v33 = vsel %vm1139_vm2, %v1142_v9, %v1145_v36  ;;  %v2828_v41 = vsel %vm2821_vm6, %v2824_v18, %v2827_v58  ;;  %v1224_v8 = vsub.s32 4294967266, %v1219_v56  ;;  %v1273_v51 = vor.u32 %v1272_v54, %v1271_v24 }
 0x157   : > { %v1147_v26 = vsel %vm1137_vm4, nan, %v1146_v33  ;;  %v2829_v37 = vsel %vm1137_vm4, nan, %v2828_v41  ;;  %vm5664_vm11 = vcmp.le.f32.partialorder %v7412_v22, 0.7853982  ;;  %v1222_v39 = vshrl.u32 %v1204_v43, %v1220_v59  ;;  %v5681_v41 = vpop.f32.mrb[17].mxu1 }
 0x158   : > { %v2591_v25 = vmul.f32 %v4811_v19, %v1147_v26  ;;  %v4287_v6 = vmul.f32 %v4811_v19, %v2829_v37  ;;  %v1275_v52 = vshrl.u32 %v7406_v60, %v1266_v55  ;;  %v1225_v53 = vadd.s32 127, %v1224_v8 }
 0x159   : > { %v1277_v50 = vshll.u32 %v7406_v60, %v1265_v49  ;;  %v1278_v36 = vshrl.u32 %v7395_v11, %v1266_v55  ;;  %vm1284_vm12 = vcmp.lt.s32.totalorder %v5621_v13, 2  ;;  %v1223_v32 = vor.u32 %v1222_v39, %v1221_v12 }
 0x15a   : > { %2607 = vst [vmem:[%s5613_s9 + $0x8] sm:$0xff] %v2591_v25  ;;  %4303 = vst [vmem:[%s5618_s10 + $0x8] sm:$0xff] %v4287_v6  ;;  %v1276_v19 = vor.u32 %v1275_v52, %v1274_v47  ;;  %v1280_v24 = vshll.u32 %v7395_v11, %v1265_v49  ;;  %v1281_v54 = vshrl.u32 %v7393_v23, %v1266_v55  ;;  %v1226_v58 = vshll.u32 %v1225_v53, 23  ;;  %v5683_v47 = vpop.f32.mrb[17].mxu0 }
 0x15b   : > { %v1267_v43 = vshrl.u32 %v7389_v62, %v1266_v55  ;;  %v1279_v9 = vor.u32 %v1278_v36, %v1277_v50  ;;  %vm1286_vm13 = vcmp.lt.s32.totalorder %v5621_v13, 4  ;;  %vm1285_vm14 = vcmp.lt.s32.totalorder %v5621_v13, 3 }
 0x15c   : > { %v1282_v18 = vor.u32 %v1281_v54, %v1280_v24  ;;  %v1288_v56 = vsel %vm1286_vm13, %v1276_v19, 2102212464  ;;  %v1291_v33 = vsel %vm1283_vm9, %v1270_v27, %v1273_v51  ;;  %v1227_v49 = vor.u32 4788187, %v1226_v58 }
 0x15d   : > { %v1287_v59 = vsel %vm1283_vm9, %v1267_v43, %v1270_v27  ;;  %v1292_v12 = vsel %vm1286_vm13, %v1279_v9, 920167782  ;;  %v1295_v55 = vsel %vm1283_vm9, %v1273_v51, %v1276_v19  ;;  %v1230_v26 = vcvt.s32.f32 %v1223_v32 }
 0x15e   : > { %v1293_v37 = vsel %vm1285_vm14, %v1276_v19, %v1292_v12  ;;  %v1296_v8 = vsel %vm1286_vm13, %v1282_v18, 1326507024  ;;  %v5692_v25 = vmul.f32 20.0, %v5631_v38  ;;  %v1228_v6 = vand.u32 2147483647, %v1227_v49 }
 0x15f   : > { %v1289_v22 = vsel %vm1285_vm14, %v1273_v51, %v1288_v56  ;;  %v1294_v39 = vsel %vm1284_vm12, %v1291_v33, %v1293_v37  ;;  %v1297_v27 = vsel %vm1285_vm14, %v1279_v9, %v1296_v8  ;;  %v818_v36 = vmul.f32 %v5631_v38, %v5631_v38 }
 0x160   : > { %v1298_v52 = vsel %vm1284_vm12, %v1295_v55, %v1297_v27  ;;  %v5703_v53 = vmul.u32.u64.low %v5627_v35, %v1294_v39  ;;  %v5704_v50 = vmul.u32.u64.high %v5627_v35, %v1294_v39, %v5703_v53  ;;  %v1231_v32 = vmul.f32 %v1230_v26, %v1228_v6 }
 0x161   : > { %v1237_v51 = vsel %vm5664_vm11, 0, %v5640_v57  ;;  %v5712_v19 = vmul.u32.u64.low %v5627_v35, %v1298_v52  ;;  %v5713_v24 = vmul.u32.u64.high %v5627_v35, %v1298_v52, %v5712_v19  ;;  %v1290_v54 = vsel %vm1284_vm12, %v1287_v59, %v1289_v22 }
 0x162   : > { %v7387_v58 = vand.u32 2147483647, %v5692_v25  ;;  %v1357_v43 = vand.u32 2139095040, %v5692_v25  ;;  %v1232_v9 = vxor.u32 2147483648, %v1231_v32  ;;  %v914_v38 = vmul.f32 1.442695, %v880_v40 }
 0x163   : > { %v834_v18 = vmul.f32 %v5635_v31, %v5635_v31  ;;  %v2923_v57 = vadd.s32 3, %v1237_v51  ;;  %v1309_v56 = vadd.s32 1, %v5704_v50  ;;  %v692_v13 = vadd.f32 %v5320_v20, %v5315_v15 }
 0x164   : > { %v1358_v33 = vshrl.u32 %v1357_v43, 23  ;;  %v1233_v49 = vsel %vm1150_vm15, %v1232_v9, %v1231_v32  ;;  %v1306_v59 = vmul.u32 %v5627_v35, %v1290_v54  ;;  %vm1308_vm0 = vc.u32 %v5713_v24, %v5703_v53 }
 0x165   : > { %v850_v12 = vadd.f32 %v834_v18, %v818_v36  ;;  %v1236_v46 = vsel %vm5664_vm11, %v5305_v3, %v1233_v49  ;;  %v1310_v7 = vsel %vm1308_vm0, %v1309_v56, %v5704_v50  ;;  %v1361_v55 = vand.u32 8388607, %v7387_v58 }
 0x166   : > { %v4517_v40 = vadd.s32 4294967169, %v1358_v33  ;;  %4816 = vcosq.f32 %v1236_v46  ;;  %v1311_v15 = vadd.s32 %v1310_v7, %v1306_v59  ;;  %v5738_v20 = vmul.f32 -20.0, %v5635_v31 }
 0x167   : > { %v5740_v26 = vmul.f32 100.0, %v850_v12  ;;  %4818 = vsinq.f32 %v1236_v46  ;;  %v1241_v35 = vand.u32 3, %v1237_v51  ;;  %v776_v4 = vadd.f32 %v5248_v63, %v5521_v45  ;;  %v5756_v45 = vpop.f32.mrb[18].mxu1 }
 0x168   : > { %v1364_v37 = vadd.s32 1, %v4517_v40  ;;  %v1312_v8 = vadd.s32 536870912, %v1311_v15  ;;  %v5748_v22 = vadd.f32 %v5349_v29, %v5347_v28  ;;  %v5752_v31 = vadd.f32 %v5381_v1, %v5379_v61  ;;  %v5758_v28 = vpop.f32.mrb[18].mxu0 }
 0x169   : > { %v2924_v39 = vand.u32 3, %v2923_v57  ;;  %v1362_v52 = vor.u32 8388608, %v1361_v55  ;;  %v5754_v32 = vmul.f32 20.0, %v776_v4  ;;  %vm1242_vm1 = vcmp.lt.s32.totalorder %v1241_v35, 2 }
 0x16a   : > { %vm1365_vm15 = vcmp.gt.s32.totalorder %v1364_v37, 0  ;;  %v1313_v27 = vshrl.u32 %v1312_v8, 30  ;;  %vm1243_vm2 = vcmp.eq.s32.totalorder %v1241_v35, 0  ;;  %4820 = vpow2.f32 %v914_v38 }
 0x16b   : > { %v1366_v50 = vsel %vm1365_vm15, %v1364_v37, 0  ;;  %vm1240_vm3 = vweird.f32 %v5305_v3  ;;  %vm1246_vm4 = vcmp.eq.s32.totalorder %v1241_v35, 2  ;;  %vm2925_vm5 = vcmp.lt.s32.totalorder %v2924_v39, 2 }
 0x16c   : > { %v1368_v36 = vand.u32 31, %v1366_v50  ;;  %v1314_v51 = vshll.u32 %v1313_v27, 30  ;;  %vm2926_vm6 = vcmp.eq.s32.totalorder %v2924_v39, 0  ;;  %vm2929_vm7 = vcmp.eq.s32.totalorder %v2924_v39, 2 }
 0x16d   : > { %v5762_v61 = vadd.s32 %v5703_v53, %v5713_v24  ;;  %v5766_v19 = vshll.u32 %v1362_v52, 8  ;;  %vm1253_vm8 = vcmp.lt.s32.totalorder %v5509_v21, 0  ;;  %v5769_v54 = vmul.f32 %v776_v4, %v776_v4 }
 0x16e   : > { %v1369_v29 = vsub.s32 32, %v1368_v36  ;;  %v5764_v1 = vsub.s32 %v1311_v15, %v1314_v51  ;;  %v1460_v9 = vand.u32 2139095040, %v5754_v32  ;;  %v5774_v38 = vadd.f32 %v5250_v2, %v692_v13 }
 0x16f   : > { %v1337_v53 = vsub.s32 4, %v1313_v27  ;;  %v5777_v24 = vshrl.u32 %v1366_v50, 5  ;;  %v1371_v56 = vshll.u32 %v7389_v62, %v1368_v36  ;;  %v1374_v12 = vshll.u32 %v7411_v0, %v1368_v36 }
 0x170   : > { %v4817_v18 = vpop.eup %4816  ;;  %v1317_v57 = vsub.s32 0, %v5764_v1  ;;  %v1372_v59 = vshrl.u32 %v7411_v0, %v1369_v29  ;;  %v1375_v46 = vshrl.u32 %v7407_v42, %v1369_v29  ;;  %v1377_v40 = vshll.u32 %v7407_v42, %v1368_v36 }
 0x171   : > { %v4819_v33 = vpop.eup %4818  ;;  %v1247_v49 = vxor.u32 2147483648, %v4817_v18  ;;  %v1378_v55 = vshrl.u32 %v7406_v60, %v1369_v29  ;;  %v1380_v4 = vshll.u32 %v7406_v60, %v1368_v36  ;;  %v1381_v8 = vshrl.u32 %v7395_v11, %v1369_v29 }
 0x172   : > { %v1244_v7 = vxor.u32 2147483648, %v4819_v33  ;;  %v4514_v13 = vmin.u32 %v1317_v57, %v5764_v1  ;;  %v1383_v6 = vshll.u32 %v7395_v11, %v1368_v36  ;;  %v1373_v43 = vor.u32 %v1372_v59, %v1371_v56 }
 0x173   : > { %v1248_v15 = vsel %vm1246_vm4, %v1247_v49, %v4819_v33  ;;  %v2931_v37 = vsel %vm2929_vm7, %v1247_v49, %v4819_v33  ;;  %v1376_v17 = vor.u32 %v1375_v46, %v1374_v12  ;;  %v1382_v36 = vor.u32 %v1381_v8, %v1380_v4  ;;  %v5803_v46 = vpop.f32.mrb[19].mxu1 }
 0x174   : > { %v1245_v52 = vsel %vm1243_vm2, %v4817_v18, %v1244_v7  ;;  %v2928_v50 = vsel %vm2926_vm6, %v4817_v18, %v1244_v7  ;;  %v1319_v51 = vclz %v4514_v13  ;;  %v4821_v30 = vpop.eup %4820  ;;  %v1379_v18 = vor.u32 %v1378_v55, %v1377_v40 }
 0x175   : > { %v1249_v57 = vsel %vm1242_vm1, %v1245_v52, %v1248_v15  ;;  %v2932_v58 = vsel %vm2925_vm5, %v2928_v50, %v2931_v37  ;;  %v1384_v35 = vshrl.u32 %v7393_v23, %v1369_v29  ;;  %v1338_v39 = vsel %vm1253_vm8, %v1337_v53, %v1313_v27  ;;  %v5805_v15 = vpop.f32.mrb[19].mxu0 }
 0x176   : > { %v1250_v33 = vsel %vm1240_vm3, nan, %v1249_v57  ;;  %v2933_v49 = vsel %vm1240_vm3, nan, %v2932_v58  ;;  %v4515_v62 = vadd.s32 4294967294, %v1319_v51  ;;  %v7415_v56 = vmov 683565275  }
 0x177   : > { %v2592_v7 = vmul.f32 %v4821_v30, %v1250_v33  ;;  %v4288_v13 = vmul.f32 %v4821_v30, %v2933_v49  ;;  %v1370_v59 = vshrl.u32 %v7415_v56, %v1369_v29  ;;  %v1461_v12 = vshrl.u32 %v1460_v9, 23 }
 0x178   : > { %vm4516_vm9 = vcmp.lt.s32.totalorder %v4515_v62, 0  ;;  %v1385_v58 = vor.u32 %v1384_v35, %v1383_v6  ;;  %vm1386_vm10 = vcmp.lt.s32.totalorder %v5777_v24, 1  ;;  %vm1387_vm11 = vcmp.lt.s32.totalorder %v5777_v24, 2 }
 0x179   : > { %2608 = vst [vmem:[%s5613_s9 + $0x10] sm:$0xff] %v2592_v7  ;;  %4304 = vst [vmem:[%s5618_s10 + $0x10] sm:$0xff] %v4288_v13  ;;  %v1322_v3 = vsel %vm4516_vm9, 0, %v4515_v62  ;;  %vm1388_vm12 = vcmp.lt.s32.totalorder %v5777_v24, 3  ;;  %vm1389_vm13 = vcmp.lt.s32.totalorder %v5777_v24, 4  ;;  %v1394_v9 = vsel %vm1386_vm10, %v1373_v43, %v1376_v17 }
 0x17a   : > { %v1323_v30 = vsub.s32 32, %v1322_v3  ;;  %v1327_v40 = vsub.s32 4294967266, %v1322_v3  ;;  %v1324_v27 = vshll.u32 %v5764_v1, %v1322_v3  ;;  %v1391_v29 = vsel %vm1389_vm13, %v1379_v18, 2102212464 }
 0x17b   : > { %v1395_v53 = vsel %vm1389_vm13, %v1382_v36, 920167782  ;;  %v1398_v6 = vsel %vm1386_vm10, %v1376_v17, %v1379_v18  ;;  %v1390_v4 = vsel %vm1386_vm10, %v1370_v59, %v1373_v43  ;;  %v1399_v52 = vsel %vm1389_vm13, %v1385_v58, 1326507024 }
 0x17c   : > { %v1325_v55 = vshrl.u32 %v5762_v61, %v1323_v30  ;;  %v1328_v37 = vadd.s32 127, %v1327_v40  ;;  %v1396_v62 = vsel %vm1388_vm12, %v1379_v18, %v1395_v53  ;;  %v4521_v50 = vadd.s32 4294967169, %v1461_v12 }
 0x17d   : > { %v1397_v8 = vsel %vm1387_vm11, %v1394_v9, %v1396_v62  ;;  %v1392_v1 = vsel %vm1388_vm12, %v1376_v17, %v1391_v29  ;;  %v1400_v33 = vsel %vm1388_vm12, %v1382_v36, %v1399_v52  ;;  %v7416_v7 = vand.u32 2147483647, %v5509_v21 }
 0x17e   : > { %v1326_v51 = vor.u32 %v1325_v55, %v1324_v27  ;;  %v1329_v57 = vshll.u32 %v1328_v37, 23  ;;  %v1401_v61 = vsel %vm1387_vm11, %v1398_v6, %v1400_v33  ;;  %v1467_v43 = vadd.s32 1, %v4521_v50 }
 0x17f   : > { %v5826_v49 = vmul.u32.u64.low %v5766_v19, %v1397_v8  ;;  %v5827_v18 = vmul.u32.u64.high %v5766_v19, %v1397_v8, %v5826_v49  ;;  %vm5832_vm14 = vcmp.le.f32.partialorder %v7416_v7, 0.7853982  ;;  %v1393_v12 = vsel %vm1387_vm11, %v1390_v4, %v1392_v1 }
 0x180   : > { %v1330_v35 = vor.u32 4788187, %v1329_v57  ;;  %v5837_v17 = vmul.u32.u64.low %v5766_v19, %v1401_v61  ;;  %v5838_v59 = vmul.u32.u64.high %v5766_v19, %v1401_v61, %v5837_v17  ;;  %v1340_v36 = vsel %vm5832_vm14, 0, %v1338_v39  ;;  %v5868_v61 = vpop.f32.mrb[20].mxu1 }
 0x181   : > { %vm1468_vm0 = vcmp.gt.s32.totalorder %v1467_v43, 0  ;;  %v835_v3 = vmul.f32 %v5774_v38, %v5774_v38  ;;  %v1333_v30 = vcvt.s32.f32 %v1326_v51  ;;  %v7419_v40 = vsub.f32 %v5605_v10, %v5589_v14 }
 0x182   : > { %v1331_v58 = vand.u32 2147483647, %v1330_v35  ;;  %v1469_v29 = vsel %vm1468_vm0, %v1467_v43, 0  ;;  %v1412_v9 = vadd.s32 1, %v5827_v18  ;;  %v7420_v53 = vand.u32 2147483647, %v5754_v32 }
 0x183   : > { %v916_v27 = vmul.f32 1.442695, %v7419_v40  ;;  %v1471_v39 = vand.u32 31, %v1469_v29  ;;  %v5853_v24 = vadd.f32 %v835_v3, %v5769_v54  ;;  %v3027_v62 = vadd.s32 3, %v1340_v36 }
 0x184   : > { %v1464_v55 = vand.u32 8388607, %v7420_v53  ;;  %v1334_v37 = vmul.f32 %v1333_v30, %v1331_v58  ;;  %v1409_v6 = vmul.u32 %v5766_v19, %v1393_v12  ;;  %vm1411_vm15 = vc.u32 %v5838_v59, %v5826_v49 }
 0x185   : > { %v1413_v14 = vsel %vm1411_vm15, %v1412_v9, %v5827_v18  ;;  %v5859_v10 = vshrl.u32 %v1469_v29, 5  ;;  %v1472_v4 = vsub.s32 32, %v1471_v39  ;;  %v1474_v8 = vshll.u32 %v7415_v56, %v1471_v39  ;;  %v5870_v18 = vpop.f32.mrb[20].mxu0 }
 0x186   : > { %v1335_v52 = vxor.u32 2147483648, %v1334_v37  ;;  %v1414_v50 = vadd.s32 %v1413_v14, %v1409_v6  ;;  %v1477_v51 = vshll.u32 %v7411_v0, %v1471_v39  ;;  %v1480_v54 = vshll.u32 %v7407_v42, %v1471_v39 }
 0x187   : > { %v1475_v57 = vshrl.u32 %v7411_v0, %v1472_v4  ;;  %v1478_v19 = vshrl.u32 %v7407_v42, %v1472_v4  ;;  %v1481_v1 = vshrl.u32 %v7406_v60, %v1472_v4  ;;  %v1483_v33 = vshll.u32 %v7406_v60, %v1471_v39 }
 0x188   : > { %v1336_v43 = vsel %vm1253_vm8, %v1335_v52, %v1334_v37  ;;  %v1415_v7 = vadd.s32 536870912, %v1414_v50  ;;  %v1484_v35 = vshrl.u32 %v7395_v11, %v1472_v4  ;;  %v1486_v17 = vshll.u32 %v7395_v11, %v1471_v39 }
 0x189   : > { %v1339_v12 = vsel %vm5832_vm14, %v5509_v21, %v1336_v43  ;;  %v1476_v3 = vor.u32 %v1475_v57, %v1474_v8  ;;  %v1479_v58 = vor.u32 %v1478_v19, %v1477_v51  ;;  %v1482_v30 = vor.u32 %v1481_v1, %v1480_v54 }
 0x18a   : > { %4822 = vcosq.f32 %v1339_v12  ;;  %v5879_v40 = vshrl.u32 %v1415_v7, 30  ;;  %v1485_v29 = vor.u32 %v1484_v35, %v1483_v33  ;;  %v1487_v9 = vshrl.u32 %v7393_v23, %v1472_v4 }
 0x18b   : > { %4824 = vsinq.f32 %v1339_v12  ;;  %v1344_v53 = vand.u32 3, %v1340_v36  ;;  %v1465_v37 = vor.u32 8388608, %v1464_v55  ;;  %vm1489_vm1 = vcmp.lt.s32.totalorder %v5859_v10, 1 }
 0x18c   : > { %v1417_v6 = vshll.u32 %v5879_v40, 30  ;;  %v1488_v14 = vor.u32 %v1487_v9, %v1486_v17  ;;  %vm1492_vm2 = vcmp.lt.s32.totalorder %v5859_v10, 4  ;;  %4826 = vpow2.f32 %v916_v27 }
 0x18d   : > { %vm1491_vm3 = vcmp.lt.s32.totalorder %v5859_v10, 3  ;;  %v1497_v13 = vsel %vm1489_vm1, %v1476_v3, %v1479_v58  ;;  %v1498_v39 = vsel %vm1492_vm2, %v1485_v29, 920167782  ;;  %v3028_v8 = vand.u32 3, %v3027_v62 }
 0x18e   : > { %v5890_v52 = vsub.s32 %v1414_v50, %v1417_v6  ;;  %vm1490_vm4 = vcmp.lt.s32.totalorder %v5859_v10, 2  ;;  %v1499_v36 = vsel %vm1491_vm3, %v1482_v30, %v1498_v39  ;;  %vm1346_vm5 = vcmp.eq.s32.totalorder %v1344_v53, 0 }
 0x18f   : > { %vm1349_vm6 = vcmp.eq.s32.totalorder %v1344_v53, 2  ;;  %v1500_v27 = vsel %vm1490_vm4, %v1497_v13, %v1499_v36  ;;  %v1505_v55 = vshll.u32 %v1465_v37, 8  ;;  %vm1345_vm7 = vcmp.lt.s32.totalorder %v1344_v53, 2  ;;  %v5955_v53 = vpop.f32.mrb[21].mxu0 }
 0x190   : > { %v1420_v51 = vsub.s32 0, %v5890_v52  ;;  %v1473_v54 = vshrl.u32 %v7415_v56, %v1472_v4  ;;  %v1501_v62 = vsel %vm1489_vm1, %v1479_v58, %v1482_v30  ;;  %v1502_v50 = vsel %vm1492_vm2, %v1488_v14, 1326507024 }
 0x191   : > { %vm1343_vm8 = vweird.f32 %v5509_v21  ;;  %v1494_v57 = vsel %vm1492_vm2, %v1482_v30, 2102212464  ;;  %v1503_v19 = vsel %vm1491_vm3, %v1485_v29, %v1502_v50  ;;  %vm3029_vm9 = vcmp.lt.s32.totalorder %v3028_v8, 2 }
 0x192   : > { %v5908_v1 = vmul.u32.u64.low %v1505_v55, %v1500_v27  ;;  %v5909_v33 = vmul.u32.u64.high %v1505_v55, %v1500_v27, %v5908_v1  ;;  %vm3030_vm10 = vcmp.eq.s32.totalorder %v3028_v8, 0  ;;  %v4518_v4 = vmin.u32 %v1420_v51, %v5890_v52 }
 0x193   : > { %v5914_v43 = vmul.f32 -20.0, %v5774_v38  ;;  %v1493_v7 = vsel %vm1489_vm1, %v1473_v54, %v1476_v3  ;;  %v1504_v35 = vsel %vm1490_vm4, %v1501_v62, %v1503_v19  ;;  %v5921_v17 = vmul.f32 100.0, %v5853_v24 }
 0x194   : > { %v778_v12 = vadd.f32 %v5248_v63, %v5748_v22  ;;  %v4823_v30 = vpop.eup %4822  ;;  %v1422_v29 = vclz %v4518_v4  ;;  %v1495_v9 = vsel %vm1491_vm3, %v1479_v58, %v1494_v57  ;;  %vm3033_vm11 = vcmp.eq.s32.totalorder %v3028_v8, 2 }
 0x195   : > { %v5927_v37 = vmul.u32.u64.low %v1505_v55, %v1504_v35  ;;  %v5928_v38 = vmul.u32.u64.high %v1505_v55, %v1504_v35, %v5927_v37  ;;  %v4825_v6 = vpop.eup %4824  ;;  %v1350_v14 = vxor.u32 2147483648, %v4823_v30  ;;  %v1410_v3 = vadd.s32 %v5826_v49, %v5838_v59 }
 0x196   : > { %v779_v24 = vadd.f32 %v5250_v2, %v5752_v31  ;;  %v1347_v13 = vxor.u32 2147483648, %v4825_v6  ;;  %v4519_v39 = vadd.s32 4294967294, %v1422_v29  ;;  %v1440_v22 = vsub.s32 4, %v5879_v40  ;;  %v4827_v58 = vpop.eup %4826 }
 0x197   : > { %v883_v36 = vsub.f32 %v5914_v43, %v5921_v17  ;;  %v1351_v27 = vsel %vm1349_vm6, %v1350_v14, %v4825_v6  ;;  %v3035_v51 = vsel %vm3033_vm11, %v1350_v14, %v4825_v6  ;;  %v1496_v54 = vsel %vm1490_vm4, %v1493_v7, %v1495_v9  ;;  %v6022_v17 = vpop.f32.mrb[22].mxu0 }
 0x198   : > { %v1515_v62 = vadd.s32 1, %v5909_v33  ;;  %v1348_v49 = vsel %vm1346_vm5, %v4823_v30, %v1347_v13  ;;  %v3032_v31 = vsel %vm3030_vm10, %v4823_v30, %v1347_v13  ;;  %vm4520_vm12 = vcmp.lt.s32.totalorder %v4519_v39, 0  ;;  %v5953_v30 = vpop.f32.mrb[21].mxu1 }
 0x199   : > { %v5943_v59 = vmul.f32 20.0, %v778_v12  ;;  %v1352_v50 = vsel %vm1345_vm7, %v1348_v49, %v1351_v27  ;;  %v3036_v57 = vsel %vm3029_vm9, %v3032_v31, %v3035_v51  ;;  %v1425_v19 = vsel %vm4520_vm12, 0, %v4519_v39  ;;  %v6020_v43 = vpop.f32.mrb[22].mxu1 }
 0x19a   : > { %vm1514_vm13 = vc.u32 %v5928_v38, %v5908_v1  ;;  %v1353_v10 = vsel %vm1343_vm8, nan, %v1352_v50  ;;  %v3037_v4 = vsel %vm1343_vm8, nan, %v3036_v57  ;;  %v1426_v7 = vsub.s32 32, %v1425_v19 }
 0x19b   : > { %v1512_v35 = vmul.u32 %v1505_v55, %v1496_v54  ;;  %v2593_v8 = vmul.f32 %v4827_v58, %v1353_v10  ;;  %v4289_v29 = vmul.f32 %v4827_v58, %v3037_v4  ;;  %v1430_v9 = vsub.s32 4294967266, %v1425_v19 }
 0x19c   : > { %v1516_v37 = vsel %vm1514_vm13, %v1515_v62, %v5909_v33  ;;  %vm1356_vm14 = vcmp.lt.s32.totalorder %v5692_v25, 0  ;;  %v1428_v6 = vshrl.u32 %v1410_v3, %v1426_v7  ;;  %v820_v13 = vmul.f32 %v778_v12, %v778_v12  ;;  %v7421_v12 = vld [vmem:[#allocation8_spill] sm:$0xff] }
 0x19d   : > { %v1517_v14 = vadd.s32 %v1516_v37, %v1512_v35  ;;  %2609 = vst [vmem:[%s5613_s9 + $0x18] sm:$0xff] %v2593_v8  ;;  %4305 = vst [vmem:[%s5618_s10 + $0x18] sm:$0xff] %v4289_v29  ;;  %v1427_v21 = vshll.u32 %v5890_v52, %v1425_v19  ;;  %v1431_v39 = vadd.s32 127, %v1430_v9  ;;  %v7392_v55 = vand.u32 2147483647, %v5943_v59 }
 0x19e   : > { %v1563_v27 = vand.u32 2139095040, %v5943_v59  ;;  %v1441_v58 = vsel %vm1356_vm14, %v1440_v22, %v5879_v40  ;;  %v836_v33 = vmul.f32 %v779_v24, %v779_v24  ;;  %v702_v49 = vadd.f32 %v7421_v12, %v5423_v48 }
 0x19f   : > { %v1518_v51 = vadd.s32 536870912, %v1517_v14  ;;  %v1429_v54 = vor.u32 %v1428_v6, %v1427_v21  ;;  %v1432_v62 = vshll.u32 %v1431_v39, 23  ;;  %v7422_v31 = vand.u32 2147483647, %v5692_v25 }
 0x1a0   : > { %v1564_v3 = vshrl.u32 %v1563_v27, 23  ;;  %v852_v57 = vadd.f32 %v836_v33, %v820_v13  ;;  %v704_v40 = vadd.f32 %v5551_v34, %v5549_v5  ;;  %v1567_v48 = vand.u32 8388607, %v7392_v55 }
 0x1a1   : > { %vm5971_vm0 = vcmp.le.f32.partialorder %v7422_v31, 0.7853982  ;;  %v5975_v50 = vshrl.u32 %v1518_v51, 30  ;;  %v1433_v22 = vor.u32 4788187, %v1432_v62  ;;  %v5984_v7 = vmul.f32 -20.0, %v779_v24 }
 0x1a2   : > { %v1443_v19 = vsel %vm5971_vm0, 0, %v1441_v58  ;;  %v4525_v10 = vadd.s32 4294967169, %v1564_v3  ;;  %v5986_v35 = vmul.f32 100.0, %v852_v57  ;;  %v1436_v29 = vcvt.s32.f32 %v1429_v54 }
 0x1a3   : > { %v1520_v4 = vshll.u32 %v5975_v50, 30  ;;  %v1434_v8 = vand.u32 2147483647, %v1433_v22  ;;  %v7425_v9 = vsub.f32 %v5738_v20, %v5740_v26  ;;  %v3131_v37 = vadd.s32 3, %v1443_v19 }
 0x1a4   : > { %v1570_v34 = vadd.s32 1, %v4525_v10  ;;  %v1568_v39 = vor.u32 8388608, %v1567_v48  ;;  %v5996_v51 = vand.u32 3, %v1443_v19  ;;  %v1513_v26 = vadd.s32 %v5908_v1, %v5928_v38 }
 0x1a5   : > { %v918_v5 = vmul.f32 1.442695, %v7425_v9  ;;  %v5991_v6 = vsub.s32 %v1517_v14, %v1520_v4  ;;  %v1437_v21 = vmul.f32 %v1436_v29, %v1434_v8  ;;  %v5998_v20 = vand.u32 3, %v3131_v37 }
 0x1a6   : > { %vm1571_vm15 = vcmp.gt.s32.totalorder %v1570_v34, 0  ;;  %v6006_v54 = vmul.f32 1.442695, %v883_v36  ;;  %v6010_v12 = vshll.u32 %v1568_v39, 8  ;;  %v780_v31 = vadd.f32 %v5248_v63, %v702_v49 }
 0x1a7   : > { %v1523_v24 = vsub.s32 0, %v5991_v6  ;;  %v1572_v27 = vsel %vm1571_vm15, %v1570_v34, 0  ;;  %v1438_v58 = vxor.u32 2147483648, %v1437_v21  ;;  %4828 = vpow2.f32 %v918_v5 }
 0x1a8   : > { %v1574_v33 = vand.u32 31, %v1572_v27  ;;  %v1543_v38 = vsub.s32 4, %v5975_v50  ;;  %v6018_v22 = vadd.f32 %v5250_v2, %v704_v40  ;;  %v6024_v36 = vshrl.u32 %v1572_v27, 5 }
 0x1a9   : > { %v4522_v14 = vmin.u32 %v1523_v24, %v5991_v6  ;;  %v1439_v62 = vsel %vm1356_vm14, %v1438_v58, %v1437_v21  ;;  %vm1459_vm1 = vcmp.lt.s32.totalorder %v5754_v32, 0  ;;  %vm1452_vm3 = vcmp.eq.s32.totalorder %v5996_v51, 2 }
 0x1aa   : > { %v1575_v3 = vsub.s32 32, %v1574_v33  ;;  %v1442_v57 = vsel %vm5971_vm0, %v5692_v25, %v1439_v62  ;;  %v1577_v19 = vshll.u32 %v7415_v56, %v1574_v33  ;;  %v1580_v49 = vshll.u32 %v7411_v0, %v1574_v33 }
 0x1ab   : > { %v1525_v1 = vclz %v4522_v14  ;;  %4830 = vcosq.f32 %v1442_v57  ;;  %v1583_v40 = vshll.u32 %v7407_v42, %v1574_v33  ;;  %v1586_v8 = vshll.u32 %v7406_v60, %v1574_v33 }
 0x1ac   : > { %4832 = vsinq.f32 %v1442_v57  ;;  %v1578_v10 = vshrl.u32 %v7411_v0, %v1575_v3  ;;  %v1581_v48 = vshrl.u32 %v7407_v42, %v1575_v3  ;;  %v1584_v4 = vshrl.u32 %v7406_v60, %v1575_v3 }
 0x1ad   : > { %v4523_v52 = vadd.s32 4294967294, %v1525_v1  ;;  %v1587_v29 = vshrl.u32 %v7395_v11, %v1575_v3  ;;  %v1589_v5 = vshll.u32 %v7395_v11, %v1574_v33  ;;  %v1590_v34 = vshrl.u32 %v7393_v23, %v1575_v3 }
 0x1ae   : > { %v1579_v9 = vor.u32 %v1578_v10, %v1577_v19  ;;  %vm3137_vm4 = vcmp.eq.s32.totalorder %v5998_v20, 2  ;;  %v1582_v21 = vor.u32 %v1581_v48, %v1580_v49  ;;  %v1585_v39 = vor.u32 %v1584_v4, %v1583_v40 }
 0x1af   : > { %vm4524_vm2 = vcmp.lt.s32.totalorder %v4523_v52, 0  ;;  %v1588_v24 = vor.u32 %v1587_v29, %v1586_v8  ;;  %vm1449_vm5 = vcmp.eq.s32.totalorder %v5996_v51, 0  ;;  %vm3134_vm6 = vcmp.eq.s32.totalorder %v5998_v20, 0 }
 0x1b0   : > { %v1528_v37 = vsel %vm4524_vm2, 0, %v4523_v52  ;;  %v6041_v14 = vmul.f32 %v780_v31, %v780_v31  ;;  %v6043_v62 = vmul.f32 20.0, %v780_v31  ;;  %vm1448_vm7 = vcmp.lt.s32.totalorder %v5996_v51, 2 }
 0x1b1   : > { %v1529_v27 = vsub.s32 32, %v1528_v37  ;;  %v1533_v58 = vsub.s32 4294967266, %v1528_v37  ;;  %v4829_v33 = vpop.eup %4828  ;;  %vm3133_vm8 = vcmp.lt.s32.totalorder %v5998_v20, 2  ;;  %v1530_v57 = vshll.u32 %v5991_v6, %v1528_v37 }
 0x1b2   : > { %v1576_v1 = vshrl.u32 %v7415_v56, %v1575_v3  ;;  %v1591_v19 = vor.u32 %v1590_v34, %v1589_v5  ;;  %vm1592_vm9 = vcmp.lt.s32.totalorder %v6024_v36, 1  ;;  %vm1446_vm10 = vweird.f32 %v5692_v25 }
 0x1b3   : > { %v1531_v49 = vshrl.u32 %v1513_v26, %v1529_v27  ;;  %v1534_v52 = vadd.s32 127, %v1533_v58  ;;  %vm1593_vm11 = vcmp.lt.s32.totalorder %v6024_v36, 2  ;;  %vm1595_vm12 = vcmp.lt.s32.totalorder %v6024_v36, 4 }
 0x1b4   : > { %v7426_v31 = vand.u32 2147483647, %v5754_v32  ;;  %vm1594_vm14 = vcmp.lt.s32.totalorder %v6024_v36, 3  ;;  %v1597_v6 = vsel %vm1595_vm12, %v1585_v39, 2102212464  ;;  %v1600_v3 = vsel %vm1592_vm9, %v1579_v9, %v1582_v21 }
 0x1b5   : > { %v1601_v40 = vsel %vm1595_vm12, %v1588_v24, 920167782  ;;  %v1532_v48 = vor.u32 %v1531_v49, %v1530_v57  ;;  %v1535_v26 = vshll.u32 %v1534_v52, 23  ;;  %v1604_v8 = vsel %vm1592_vm9, %v1582_v21, %v1585_v39  ;;  %v4831_v29 = vpop.eup %4830 }
 0x1b6   : > { %vm6055_vm13 = vcmp.le.f32.partialorder %v7426_v31, 0.7853982  ;;  %v1602_v4 = vsel %vm1594_vm14, %v1585_v39, %v1601_v40  ;;  %v1544_v5 = vsel %vm1459_vm1, %v1543_v38, %v5975_v50  ;;  %v1596_v34 = vsel %vm1592_vm9, %v1576_v1, %v1579_v9  ;;  %v4833_v58 = vpop.eup %4832 }
 0x1b7   : > { %v1603_v37 = vsel %vm1593_vm11, %v1600_v3, %v1602_v4  ;;  %v1605_v27 = vsel %vm1595_vm12, %v1591_v19, 1326507024  ;;  %v1453_v57 = vxor.u32 2147483648, %v4831_v29  ;;  %v1536_v49 = vor.u32 4788187, %v1535_v26 }
 0x1b8   : > { %v1598_v52 = vsel %vm1594_vm14, %v1582_v21, %v1597_v6  ;;  %v1606_v39 = vsel %vm1594_vm14, %v1588_v24, %v1605_v27  ;;  %v1450_v31 = vxor.u32 2147483648, %v4833_v58  ;;  %v1539_v21 = vcvt.s32.f32 %v1532_v48  ;;  %v6102_v27 = vpop.f32.mrb[23].mxu1 }
 0x1b9   : > { %v1607_v50 = vsel %vm1593_vm11, %v1604_v8, %v1606_v39  ;;  %v6080_v38 = vmul.u32.u64.low %v6010_v12, %v1603_v37  ;;  %v6081_v9 = vmul.u32.u64.high %v6010_v12, %v1603_v37, %v6080_v38  ;;  %v1454_v1 = vsel %vm1452_vm3, %v1453_v57, %v4833_v58  ;;  %v6118_v25 = vpop.f32.mrb[24].mxu1 }
 0x1ba   : > { %v3139_v19 = vsel %vm3137_vm4, %v1453_v57, %v4833_v58  ;;  %v1537_v3 = vand.u32 2147483647, %v1536_v49  ;;  %v1451_v24 = vsel %vm1449_vm5, %v4831_v29, %v1450_v31  ;;  %v3136_v6 = vsel %vm3134_vm6, %v4831_v29, %v1450_v31  ;;  %v6104_v58 = vpop.f32.mrb[23].mxu0 }
 0x1bb   : > { %v6093_v40 = vmul.u32.u64.low %v6010_v12, %v1607_v50  ;;  %v6094_v26 = vmul.u32.u64.high %v6010_v12, %v1607_v50, %v6093_v40  ;;  %v1455_v4 = vsel %vm1448_vm7, %v1451_v24, %v1454_v1  ;;  %v3140_v8 = vsel %vm3133_vm8, %v3136_v6, %v3139_v19  ;;  %v6120_v1 = vpop.f32.mrb[24].mxu0 }
 0x1bc   : > { %v1540_v37 = vmul.f32 %v1539_v21, %v1537_v3  ;;  %v1599_v48 = vsel %vm1593_vm11, %v1596_v34, %v1598_v52  ;;  %v1456_v29 = vsel %vm1446_vm10, nan, %v1455_v4  ;;  %v3141_v51 = vsel %vm1446_vm10, nan, %v3140_v8 }
 0x1bd   : > { %v1618_v57 = vadd.s32 1, %v6081_v9  ;;  %v1666_v20 = vand.u32 2139095040, %v6043_v62  ;;  %v2594_v49 = vmul.f32 %v4829_v33, %v1456_v29  ;;  %v4290_v39 = vmul.f32 %v4829_v33, %v3141_v51 }
 0x1be   : > { %v1541_v36 = vxor.u32 2147483648, %v1540_v37  ;;  %v1546_v34 = vsel %vm6055_vm13, 0, %v1544_v5  ;;  %v1615_v52 = vmul.u32 %v6010_v12, %v1599_v48  ;;  %vm1617_vm0 = vc.u32 %v6094_v26, %v6080_v38 }
 0x1bf   : > { %v7391_v31 = vand.u32 2147483647, %v6043_v62  ;;  %v1667_v50 = vshrl.u32 %v1666_v20, 23  ;;  %2610 = vst [vmem:[%s5613_s9 + $0x20] sm:$0xff] %v2594_v49  ;;  %4306 = vst [vmem:[%s5618_s10 + $0x20] sm:$0xff] %v4290_v39  ;;  %v1619_v19 = vsel %vm1617_vm0, %v1618_v57, %v6081_v9  ;;  %v6128_v5 = vmul.f32 -20.0, %v6018_v22 }
 0x1c0   : > { %v1542_v33 = vsel %vm1459_vm1, %v1541_v36, %v1540_v37  ;;  %v837_v12 = vmul.f32 %v6018_v22, %v6018_v22  ;;  %v1620_v21 = vadd.s32 %v1619_v19, %v1615_v52  ;;  %v708_v6 = vadd.f32 %v5609_v16, %v5607_v44 }
 0x1c1   : > { %v1545_v3 = vsel %vm6055_vm13, %v5754_v32, %v1542_v33  ;;  %v4529_v24 = vadd.s32 4294967169, %v1667_v50  ;;  %v3235_v40 = vadd.s32 3, %v1546_v34  ;;  %v710_v9 = vadd.f32 %v5683_v47, %v5681_v41 }
 0x1c2   : > { %4834 = vcosq.f32 %v1545_v3  ;;  %v853_v4 = vadd.f32 %v837_v12, %v6041_v14  ;;  %v1621_v8 = vadd.s32 536870912, %v1620_v21  ;;  %v1670_v22 = vand.u32 8388607, %v7391_v31 }
 0x1c3   : > { %4836 = vsinq.f32 %v1545_v3  ;;  %v1673_v37 = vadd.s32 1, %v4529_v24  ;;  %v782_v48 = vadd.f32 %v5248_v63, %v708_v6  ;;  %v6147_v44 = vadd.f32 %v5758_v28, %v5756_v45 }
 0x1c4   : > { %v6142_v10 = vmul.f32 100.0, %v853_v4  ;;  %v6151_v16 = vadd.f32 %v5805_v15, %v5803_v46  ;;  %v1550_v14 = vand.u32 3, %v1546_v34  ;;  %v6153_v41 = vshrl.u32 %v1621_v8, 30 }
 0x1c5   : > { %vm1674_vm15 = vcmp.gt.s32.totalorder %v1673_v37, 0  ;;  %v3236_v47 = vand.u32 3, %v3235_v40  ;;  %v1671_v20 = vor.u32 8388608, %v1670_v22  ;;  %4838 = vpow2.f32 %v6006_v54 }
 0x1c6   : > { %v1675_v29 = vsel %vm1674_vm15, %v1673_v37, 0  ;;  %v1623_v57 = vshll.u32 %v6153_v41, 30  ;;  %v6159_v45 = vmul.f32 20.0, %v782_v48  ;;  %v6162_v28 = vadd.f32 %v5250_v2, %v710_v9 }
 0x1c7   : > { %v1677_v49 = vand.u32 31, %v1675_v29  ;;  %vm1549_vm1 = vweird.f32 %v5754_v32  ;;  %vm1551_vm2 = vcmp.lt.s32.totalorder %v1550_v14, 2  ;;  %vm1552_vm3 = vcmp.eq.s32.totalorder %v1550_v14, 0 }
 0x1c8   : > { %v6165_v46 = vsub.s32 %v1620_v21, %v1623_v57  ;;  %vm1555_vm4 = vcmp.eq.s32.totalorder %v1550_v14, 2  ;;  %vm3237_vm5 = vcmp.lt.s32.totalorder %v3236_v47, 2  ;;  %vm3238_vm6 = vcmp.eq.s32.totalorder %v3236_v47, 0  ;;  %v6193_v57 = vpop.f32.mrb[25].mxu0 }
 0x1c9   : > { %v1678_v15 = vsub.s32 32, %v1677_v49  ;;  %vm3241_vm7 = vcmp.eq.s32.totalorder %v3236_v47, 2  ;;  %v1616_v39 = vadd.s32 %v6080_v38, %v6094_v26  ;;  %v6170_v36 = vshll.u32 %v1671_v20, 8 }
 0x1ca   : > { %v1626_v54 = vsub.s32 0, %v6165_v46  ;;  %v6172_v34 = vmul.f32 %v782_v48, %v782_v48  ;;  %v6175_v33 = vshrl.u32 %v1675_v29, 5  ;;  %v6180_v12 = vmul.f32 %v6162_v28, %v6162_v28  ;;  %v6191_v29 = vpop.f32.mrb[25].mxu1 }
 0x1cb   : > { %v1680_v26 = vshll.u32 %v7415_v56, %v1677_v49  ;;  %v1681_v24 = vshrl.u32 %v7411_v0, %v1678_v15  ;;  %v1683_v40 = vshll.u32 %v7411_v0, %v1677_v49  ;;  %v1684_v4 = vshrl.u32 %v7407_v42, %v1678_v15 }
 0x1cc   : > { %v4835_v52 = vpop.eup %4834  ;;  %v4526_v38 = vmin.u32 %v1626_v54, %v6165_v46  ;;  %v1687_v9 = vshrl.u32 %v7406_v60, %v1678_v15  ;;  %v1690_v48 = vshrl.u32 %v7395_v11, %v1678_v15  ;;  %v1686_v51 = vshll.u32 %v7407_v42, %v1677_v49 }
 0x1cd   : > { %v4837_v3 = vpop.eup %4836  ;;  %v1556_v21 = vxor.u32 2147483648, %v4835_v52  ;;  %v1689_v31 = vshll.u32 %v7406_v60, %v1677_v49  ;;  %v1679_v47 = vshrl.u32 %v7415_v56, %v1678_v15  ;;  %vm1695_vm9 = vcmp.lt.s32.totalorder %v6175_v33, 1 }
 0x1ce   : > { %v1553_v6 = vxor.u32 2147483648, %v4837_v3  ;;  %v1628_v37 = vclz %v4526_v38  ;;  %vm1697_vm10 = vcmp.lt.s32.totalorder %v6175_v33, 3  ;;  %vm1698_vm11 = vcmp.lt.s32.totalorder %v6175_v33, 4 }
 0x1cf   : > { %v1557_v8 = vsel %vm1555_vm4, %v1556_v21, %v4837_v3  ;;  %v3243_v22 = vsel %vm3241_vm7, %v1556_v21, %v4837_v3  ;;  %v1682_v21 = vor.u32 %v1681_v24, %v1680_v26  ;;  %v4839_v38 = vpop.eup %4838  ;;  %v1691_v14 = vor.u32 %v1690_v48, %v1689_v31 }
 0x1d0   : > { %v1554_v20 = vsel %vm1552_vm3, %v4835_v52, %v1553_v6  ;;  %v3240_v54 = vsel %vm3238_vm6, %v4835_v52, %v1553_v6  ;;  %v4527_v3 = vadd.s32 4294967294, %v1628_v37  ;;  %v1685_v52 = vor.u32 %v1684_v4, %v1683_v40 }
 0x1d1   : > { %v1558_v13 = vsel %vm1551_vm2, %v1554_v20, %v1557_v8  ;;  %v3244_v19 = vsel %vm3237_vm5, %v3240_v54, %v3243_v22  ;;  %v1688_v6 = vor.u32 %v1687_v9, %v1686_v51  ;;  %v7429_v22 = vmov 920167782  }
 0x1d2   : > { %v1559_v50 = vsel %vm1549_vm1, nan, %v1558_v13  ;;  %v3245_v55 = vsel %vm1549_vm1, nan, %v3244_v19  ;;  %vm4528_vm8 = vcmp.lt.s32.totalorder %v4527_v3, 0  ;;  %v1692_v37 = vshll.u32 %v7429_v22, %v1677_v49 }
 0x1d3   : > { %v2595_v23 = vmul.f32 %v4839_v38, %v1559_v50  ;;  %v4291_v11 = vmul.f32 %v4839_v38, %v3245_v55  ;;  %v1631_v8 = vsel %vm4528_vm8, 0, %v4527_v3  ;;  %v7430_v20 = vmov 1326507024  }
 0x1d4   : > { %v1693_v26 = vshrl.u32 %v7430_v20, %v1678_v15  ;;  %v1632_v24 = vsub.s32 32, %v1631_v8  ;;  %v1633_v13 = vshll.u32 %v6165_v46, %v1631_v8  ;;  %v1636_v32 = vsub.s32 4294967266, %v1631_v8 }
 0x1d5   : > { %2611 = vst [vmem:[%s5613_s9 + $0x28] sm:$0xff] %v2595_v23  ;;  %4307 = vst [vmem:[%s5618_s10 + $0x28] sm:$0xff] %v4291_v11  ;;  %v1703_v55 = vsel %vm1695_vm9, %v1682_v21, %v1685_v52  ;;  %v1700_v19 = vsel %vm1698_vm11, %v1688_v6, 2102212464  ;;  %v1704_v49 = vsel %vm1698_vm11, %v1691_v14, 920167782  ;;  %v1707_v23 = vsel %vm1695_vm9, %v1685_v52, %v1688_v6 }
 0x1d6   : > { %v1694_v51 = vor.u32 %v1693_v26, %v1692_v37  ;;  %v1634_v31 = vshrl.u32 %v1616_v39, %v1632_v24  ;;  %v1637_v50 = vadd.s32 127, %v1636_v32  ;;  %vm1696_vm12 = vcmp.lt.s32.totalorder %v6175_v33, 2 }
 0x1d7   : > { %v1705_v11 = vsel %vm1697_vm10, %v1688_v6, %v1704_v49  ;;  %v1699_v4 = vsel %vm1695_vm9, %v1679_v47, %v1682_v21  ;;  %v1701_v48 = vsel %vm1697_vm10, %v1685_v52, %v1700_v19  ;;  %v7431_v38 = vand.u32 2147483647, %v5943_v59 }
 0x1d8   : > { %v1708_v46 = vsel %vm1698_vm11, %v1694_v51, 1326507024  ;;  %v1635_v15 = vor.u32 %v1634_v31, %v1633_v13  ;;  %v1638_v40 = vshll.u32 %v1637_v50, 23  ;;  %v1706_v9 = vsel %vm1696_vm12, %v1703_v55, %v1705_v11 }
 0x1d9   : > { %v1709_v39 = vsel %vm1697_vm10, %v1691_v14, %v1708_v46  ;;  %v6224_v54 = vmul.u32.u64.low %v6170_v36, %v1706_v9  ;;  %v6225_v3 = vmul.u32.u64.high %v6170_v36, %v1706_v9, %v6224_v54  ;;  %vm6230_vm13 = vcmp.le.f32.partialorder %v7431_v38, 0.7853982 }
 0x1da   : > { %vm1562_vm14 = vcmp.lt.s32.totalorder %v5943_v59, 0  ;;  %v1639_v21 = vor.u32 4788187, %v1638_v40  ;;  %v1710_v52 = vsel %vm1696_vm12, %v1707_v23, %v1709_v39  ;;  %v7434_v14 = vsub.s32 4, %v6153_v41 }
 0x1db   : > { %v6243_v47 = vmul.u32.u64.low %v6170_v36, %v1710_v52  ;;  %v6244_v37 = vmul.u32.u64.high %v6170_v36, %v1710_v52, %v6243_v47  ;;  %v7435_v26 = vand.u32 2139095040, %v6159_v45  ;;  %v1642_v32 = vcvt.s32.f32 %v1635_v15 }
 0x1dc   : > { %v1647_v8 = vsel %vm1562_vm14, %v7434_v14, %v6153_v41  ;;  %v1640_v13 = vand.u32 2147483647, %v1639_v21  ;;  %v1702_v51 = vsel %vm1696_vm12, %v1699_v4, %v1701_v48  ;;  %v854_v55 = vadd.f32 %v6180_v12, %v6172_v34 }
 0x1dd   : > { %v1770_v24 = vshrl.u32 %v7435_v26, 23  ;;  %v1721_v31 = vadd.s32 1, %v6225_v3  ;;  %v1766_v50 = vand.u32 2147483647, %v6159_v45  ;;  %v6255_v19 = vmul.f32 -20.0, %v6162_v28 }
 0x1de   : > { %v1643_v49 = vmul.f32 %v1642_v32, %v1640_v13  ;;  %v1649_v11 = vsel %vm6230_vm13, 0, %v1647_v8  ;;  %v6259_v23 = vmul.f32 100.0, %v854_v55  ;;  %v6263_v33 = vadd.f32 %v5870_v18, %v5868_v61  ;;  %v6299_v13 = vpop.f32.mrb[26].mxu1  ;;  %v6301_v32 = vpop.f32.mrb[26].mxu0 }
 0x1df   : > { %v4533_v41 = vadd.s32 4294967169, %v1770_v24  ;;  %v1718_v34 = vmul.u32 %v6170_v36, %v1702_v51  ;;  %vm1720_vm0 = vc.u32 %v6244_v37, %v6224_v54  ;;  %v3339_v40 = vadd.s32 3, %v1649_v11 }
 0x1e0   : > { %v1644_v46 = vxor.u32 2147483648, %v1643_v49  ;;  %v1722_v28 = vsel %vm1720_vm0, %v1721_v31, %v6225_v3  ;;  %v7436_v61 = vsub.f32 %v5984_v7, %v5986_v35  ;;  %v1773_v36 = vand.u32 8388607, %v1766_v50 }
 0x1e1   : > { %v1776_v12 = vadd.s32 1, %v4533_v41  ;;  %v1723_v4 = vadd.s32 %v1722_v28, %v1718_v34  ;;  %v784_v21 = vadd.f32 %v5248_v63, %v6147_v44  ;;  %v6283_v52 = vand.u32 3, %v1649_v11 }
 0x1e2   : > { %v1645_v9 = vsel %vm1562_vm14, %v1644_v46, %v1643_v49  ;;  %v922_v18 = vmul.f32 1.442695, %v7436_v61  ;;  %v6285_v14 = vand.u32 3, %v3339_v40  ;;  %v1774_v8 = vor.u32 8388608, %v1773_v36 }
 0x1e3   : > { %vm1777_vm15 = vcmp.gt.s32.totalorder %v1776_v12, 0  ;;  %v1648_v39 = vsel %vm6230_vm13, %v5943_v59, %v1645_v9  ;;  %v1724_v3 = vadd.s32 536870912, %v1723_v4  ;;  %v6291_v6 = vadd.f32 %v5250_v2, %v6151_v16 }
 0x1e4   : > { %v1778_v48 = vsel %vm1777_vm15, %v1776_v12, 0  ;;  %4840 = vcosq.f32 %v1648_v39  ;;  %v6297_v24 = vmul.f32 20.0, %v784_v21  ;;  %vm1658_vm1 = vcmp.eq.s32.totalorder %v6283_v52, 2 }
 0x1e5   : > { %v1780_v38 = vand.u32 31, %v1778_v48  ;;  %4842 = vsinq.f32 %v1648_v39  ;;  %v6287_v7 = vshrl.u32 %v1724_v3, 30  ;;  %v6294_v26 = vshrl.u32 %v1778_v48, 5 }
 0x1e6   : > { %4844 = vpow2.f32 %v922_v18  ;;  %vm1655_vm2 = vcmp.eq.s32.totalorder %v6283_v52, 0  ;;  %vm3342_vm3 = vcmp.eq.s32.totalorder %v6285_v14, 0  ;;  %vm1654_vm4 = vcmp.lt.s32.totalorder %v6283_v52, 2 }
 0x1e7   : > { %v1781_v35 = vsub.s32 32, %v1780_v38  ;;  %v1726_v47 = vshll.u32 %v6287_v7, 30  ;;  %v1792_v16 = vshll.u32 %v7406_v60, %v1780_v38  ;;  %v1783_v49 = vshll.u32 %v7415_v56, %v1780_v38 }
 0x1e8   : > { %v1786_v11 = vshll.u32 %v7411_v0, %v1780_v38  ;;  %v1789_v34 = vshll.u32 %v7407_v42, %v1780_v38  ;;  %vm3341_vm5 = vcmp.lt.s32.totalorder %v6285_v14, 2  ;;  %vm3345_vm6 = vcmp.eq.s32.totalorder %v6285_v14, 2  ;;  %v6373_v14 = vpop.f32.mrb[27].mxu0 }
 0x1e9   : > { %v1784_v44 = vshrl.u32 %v7411_v0, %v1781_v35  ;;  %v1787_v51 = vshrl.u32 %v7407_v42, %v1781_v35  ;;  %v1790_v55 = vshrl.u32 %v7406_v60, %v1781_v35  ;;  %v1793_v31 = vshrl.u32 %v7429_v22, %v1781_v35 }
 0x1ea   : > { %v6310_v41 = vsub.s32 %v1723_v4, %v1726_v47  ;;  %v1719_v12 = vadd.s32 %v6224_v54, %v6244_v37  ;;  %v1796_v28 = vshrl.u32 %v7430_v20, %v1781_v35  ;;  %vm1652_vm7 = vweird.f32 %v5943_v59 }
 0x1eb   : > { %v1794_v46 = vor.u32 %v1793_v31, %v1792_v16  ;;  %v1785_v4 = vor.u32 %v1784_v44, %v1783_v49  ;;  %v1788_v9 = vor.u32 %v1787_v51, %v1786_v11  ;;  %v1791_v61 = vor.u32 %v1790_v55, %v1789_v34 }
 0x1ec   : > { %v1729_v40 = vsub.s32 0, %v6310_v41  ;;  %v1795_v18 = vshll.u32 %v7429_v22, %v1780_v38  ;;  %v6324_v36 = vshll.u32 %v1774_v8, 8  ;;  %v823_v48 = vmul.f32 %v784_v21, %v784_v21 }
 0x1ed   : > { %v839_v39 = vmul.f32 %v6291_v6, %v6291_v6  ;;  %v1782_v37 = vshrl.u32 %v7415_v56, %v1781_v35  ;;  %vm1801_vm8 = vcmp.lt.s32.totalorder %v6294_v26, 4  ;;  %v1872_v3 = vand.u32 2139095040, %v6297_v24 }
 0x1ee   : > { %v4530_v54 = vmin.u32 %v1729_v40, %v6310_v41  ;;  %v4841_v47 = vpop.eup %4840  ;;  %v1797_v44 = vor.u32 %v1796_v28, %v1795_v18  ;;  %vm1798_vm9 = vcmp.lt.s32.totalorder %v6294_v26, 1  ;;  %vm1800_vm10 = vcmp.lt.s32.totalorder %v6294_v26, 3 }
 0x1ef   : > { %v1807_v38 = vsel %vm1801_vm8, %v1794_v46, 920167782  ;;  %v4843_v21 = vpop.eup %4842  ;;  %v1659_v8 = vxor.u32 2147483648, %v4841_v47  ;;  %vm1665_vm11 = vcmp.lt.s32.totalorder %v6043_v62, 0  ;;  %v1806_v35 = vsel %vm1798_vm9, %v1785_v4, %v1788_v9 }
 0x1f0   : > { %v1731_v51 = vclz %v4530_v54  ;;  %v1808_v55 = vsel %vm1800_vm10, %v1791_v61, %v1807_v38  ;;  %v4845_v16 = vpop.eup %4844  ;;  %v1656_v31 = vxor.u32 2147483648, %v4843_v21  ;;  %v1749_v49 = vsub.s32 4, %v6287_v7 }
 0x1f1   : > { %vm1799_vm12 = vcmp.lt.s32.totalorder %v6294_v26, 2  ;;  %v1802_v11 = vsel %vm1798_vm9, %v1782_v37, %v1785_v4  ;;  %v1660_v34 = vsel %vm1658_vm1, %v1659_v8, %v4843_v21  ;;  %v3347_v28 = vsel %vm3345_vm6, %v1659_v8, %v4843_v21 }
 0x1f2   : > { %v4531_v40 = vadd.s32 4294967294, %v1731_v51  ;;  %v1803_v18 = vsel %vm1801_vm8, %v1791_v61, 2102212464  ;;  %v1657_v54 = vsel %vm1655_vm2, %v4841_v47, %v1656_v31  ;;  %v3344_v38 = vsel %vm3342_vm3, %v4841_v47, %v1656_v31 }
 0x1f3   : > { %v1809_v15 = vsel %vm1799_vm12, %v1806_v35, %v1808_v55  ;;  %v1810_v4 = vsel %vm1798_vm9, %v1788_v9, %v1791_v61  ;;  %v1661_v37 = vsel %vm1654_vm4, %v1657_v54, %v1660_v34  ;;  %v3348_v21 = vsel %vm3341_vm5, %v3344_v38, %v3347_v28  ;;  %v6371_v61 = vpop.f32.mrb[27].mxu1 }
 0x1f4   : > { %vm4532_vm13 = vcmp.lt.s32.totalorder %v4531_v40, 0  ;;  %v1811_v8 = vsel %vm1801_vm8, %v1797_v44, 1326507024  ;;  %v1662_v47 = vsel %vm1652_vm7, nan, %v1661_v37  ;;  %v3349_v51 = vsel %vm1652_vm7, nan, %v3348_v21 }
 0x1f5   : > { %v1734_v35 = vsel %vm4532_vm13, 0, %v4531_v40  ;;  %v1812_v52 = vsel %vm1800_vm10, %v1794_v46, %v1811_v8  ;;  %v2596_v55 = vmul.f32 %v4845_v16, %v1662_v47  ;;  %v4292_v31 = vmul.f32 %v4845_v16, %v3349_v51 }
 0x1f6   : > { %v1735_v34 = vsub.s32 32, %v1734_v35  ;;  %v1804_v44 = vsel %vm1800_vm10, %v1788_v9, %v1803_v18  ;;  %v1739_v28 = vsub.s32 4294967266, %v1734_v35  ;;  %v1813_v54 = vsel %vm1799_vm12, %v1810_v4, %v1812_v52 }
 0x1f7   : > { %v6380_v59 = vmul.u32.u64.low %v6324_v36, %v1809_v15  ;;  %v6381_v40 = vmul.u32.u64.high %v6324_v36, %v1809_v15, %v6380_v59  ;;  %2612 = vst [vmem:[%s5613_s9 + $0x30] sm:$0xff] %v2596_v55  ;;  %4308 = vst [vmem:[%s5618_s10 + $0x30] sm:$0xff] %v4292_v31  ;;  %v1736_v46 = vshll.u32 %v6310_v41, %v1734_v35  ;;  %v1750_v9 = vsel %vm1665_vm11, %v1749_v49, %v6287_v7 }
 0x1f8   : > { %v1737_v38 = vshrl.u32 %v1719_v12, %v1735_v34  ;;  %v6388_v16 = vmul.u32.u64.low %v6324_v36, %v1813_v54  ;;  %v6389_v37 = vmul.u32.u64.high %v6324_v36, %v1813_v54, %v6388_v16  ;;  %v1740_v21 = vadd.s32 127, %v1739_v28 }
 0x1f9   : > { %v1805_v18 = vsel %vm1799_vm12, %v1802_v11, %v1804_v44  ;;  %v1873_v15 = vshrl.u32 %v1872_v3, 23  ;;  %v7437_v4 = vand.u32 2147483647, %v6043_v62  ;;  %v855_v12 = vadd.f32 %v839_v39, %v823_v48 }
 0x1fa   : > { %v1738_v41 = vor.u32 %v1737_v38, %v1736_v46  ;;  %v1741_v47 = vshll.u32 %v1740_v21, 23  ;;  %v1824_v51 = vadd.s32 1, %v6381_v40  ;;  %v6404_v52 = vmul.f32 -20.0, %v6291_v6 }
 0x1fb   : > { %vm6398_vm14 = vcmp.le.f32.partialorder %v7437_v4, 0.7853982  ;;  %v4537_v35 = vadd.s32 4294967169, %v1873_v15  ;;  %v1821_v26 = vmul.u32 %v6324_v36, %v1805_v18  ;;  %vm1823_vm0 = vc.u32 %v6389_v37, %v6380_v59 }
 0x1fc   : > { %v1752_v7 = vsel %vm6398_vm14, 0, %v1750_v9  ;;  %v7397_v3 = vand.u32 2147483647, %v6297_v24  ;;  %v1742_v49 = vor.u32 4788187, %v1741_v47  ;;  %v1825_v48 = vsel %vm1823_vm0, %v1824_v51, %v6381_v40 }
 0x1fd   : > { %v1879_v39 = vadd.s32 1, %v4537_v35  ;;  %v6413_v11 = vmul.f32 100.0, %v855_v12  ;;  %v1745_v55 = vcvt.s32.f32 %v1738_v41  ;;  %v1826_v31 = vadd.s32 %v1825_v48, %v1821_v26 }
 0x1fe   : > { %v1743_v6 = vand.u32 2147483647, %v1742_v49  ;;  %v6419_v36 = vadd.f32 %v5955_v53, %v5953_v30  ;;  %v3443_v44 = vadd.s32 3, %v1752_v7  ;;  %v7440_v28 = vsub.f32 %v6128_v5, %v6142_v10  ;;  %v6428_v30 = vpop.f32.mrb[28].mxu1  ;;  %v6430_v53 = vpop.f32.mrb[28].mxu0 }
 0x1ff   : > { %vm1880_vm15 = vcmp.gt.s32.totalorder %v1879_v39, 0  ;;  %v1827_v40 = vadd.s32 536870912, %v1826_v31  ;;  %v1876_v16 = vand.u32 8388607, %v7397_v3  ;;  %v786_v9 = vadd.f32 %v5248_v63, %v6263_v33 }
 0x200   : > { %v924_v54 = vmul.f32 1.442695, %v7440_v28  ;;  %v1881_v46 = vsel %vm1880_vm15, %v1879_v39, 0  ;;  %v1746_v38 = vmul.f32 %v1745_v55, %v1743_v6  ;;  %v6432_v41 = vand.u32 3, %v1752_v7 }
 0x201   : > { %v1883_v21 = vand.u32 31, %v1881_v46  ;;  %v1828_v18 = vshrl.u32 %v1827_v40, 30  ;;  %v6434_v5 = vand.u32 3, %v3443_v44  ;;  %vm1768_vm1 = vcmp.lt.s32.totalorder %v6159_v45, 0 }
 0x202   : > { %v1747_v15 = vxor.u32 2147483648, %v1746_v38  ;;  %4846 = vpow2.f32 %v924_v54  ;;  %v1877_v47 = vor.u32 8388608, %v1876_v16  ;;  %v6439_v33 = vshrl.u32 %v1881_v46, 5 }
 0x203   : > { %v1884_v4 = vsub.s32 32, %v1883_v21  ;;  %v1829_v10 = vshll.u32 %v1828_v18, 30  ;;  %v6441_v51 = vmul.f32 20.0, %v786_v9  ;;  %v1886_v48 = vshll.u32 %v7415_v56, %v1883_v21 }
 0x204   : > { %v1748_v12 = vsel %vm1665_vm11, %v1747_v15, %v1746_v38  ;;  %v1889_v39 = vshll.u32 %v7411_v0, %v1883_v21  ;;  %v1852_v44 = vsub.s32 4, %v1828_v18  ;;  %v1892_v8 = vshll.u32 %v7407_v42, %v1883_v21 }
 0x205   : > { %v1751_v35 = vsel %vm6398_vm14, %v6043_v62, %v1748_v12  ;;  %v6446_v7 = vsub.s32 %v1826_v31, %v1829_v10  ;;  %v1887_v26 = vshrl.u32 %v7411_v0, %v1884_v4  ;;  %v1890_v49 = vshrl.u32 %v7407_v42, %v1884_v4 }
 0x206   : > { %4848 = vcosq.f32 %v1751_v35  ;;  %v1893_v55 = vshrl.u32 %v7406_v60, %v1884_v4  ;;  %v1895_v31 = vshll.u32 %v7406_v60, %v1883_v21  ;;  %v1896_v28 = vshrl.u32 %v7429_v22, %v1884_v4 }
 0x207   : > { %4850 = vsinq.f32 %v1751_v35  ;;  %v1832_v6 = vsub.s32 0, %v6446_v7  ;;  %v1898_v54 = vshll.u32 %v7429_v22, %v1883_v21  ;;  %v1899_v40 = vshrl.u32 %v7430_v20, %v1884_v4 }
 0x208   : > { %v1822_v46 = vadd.s32 %v6380_v59, %v6389_v37  ;;  %v1888_v16 = vor.u32 %v1887_v26, %v1886_v48  ;;  %v1891_v15 = vor.u32 %v1890_v49, %v1889_v39  ;;  %vm1761_vm2 = vcmp.eq.s32.totalorder %v6432_v41, 2 }
 0x209   : > { %v4534_v38 = vmin.u32 %v1832_v6, %v6446_v7  ;;  %vm3449_vm3 = vcmp.eq.s32.totalorder %v6434_v5, 2  ;;  %v1894_v10 = vor.u32 %v1893_v55, %v1892_v8  ;;  %v1897_v12 = vor.u32 %v1896_v28, %v1895_v31 }
 0x20a   : > { %v1900_v35 = vor.u32 %v1899_v40, %v1898_v54  ;;  %v6464_v34 = vshll.u32 %v1877_v47, 8  ;;  %vm1758_vm4 = vcmp.eq.s32.totalorder %v6432_v41, 0  ;;  %vm3446_vm5 = vcmp.eq.s32.totalorder %v6434_v5, 0 }
 0x20b   : > { %v1834_v21 = vclz %v4534_v38  ;;  %v1885_v59 = vshrl.u32 %v7415_v56, %v1884_v4  ;;  %v6469_v37 = vmul.f32 %v786_v9, %v786_v9  ;;  %v1975_v26 = vand.u32 2139095040, %v6441_v51 }
 0x20c   : > { %vm1757_vm6 = vcmp.lt.s32.totalorder %v6432_v41, 2  ;;  %vm3445_vm7 = vcmp.lt.s32.totalorder %v6434_v5, 2  ;;  %v1853_v49 = vsel %vm1768_vm1, %v1852_v44, %v1828_v18  ;;  %vm1901_vm8 = vcmp.lt.s32.totalorder %v6439_v33, 1  ;;  %v4847_v47 = vpop.eup %4846  ;;  %v6529_v41 = vpop.f32.mrb[29].mxu1 }
 0x20d   : > { %vm1902_vm9 = vcmp.lt.s32.totalorder %v6439_v33, 2  ;;  %vm1904_vm10 = vcmp.lt.s32.totalorder %v6439_v33, 4  ;;  %vm1755_vm11 = vweird.f32 %v6043_v62  ;;  %v4535_v9 = vadd.s32 4294967294, %v1834_v21 }
 0x20e   : > { %vm1903_vm12 = vcmp.lt.s32.totalorder %v6439_v33, 3  ;;  %v1909_v4 = vsel %vm1901_vm8, %v1888_v16, %v1891_v15  ;;  %v1910_v48 = vsel %vm1904_vm10, %v1897_v12, 920167782  ;;  %v1906_v39 = vsel %vm1904_vm10, %v1894_v10, 2102212464 }
 0x20f   : > { %v1911_v55 = vsel %vm1903_vm12, %v1894_v10, %v1910_v48  ;;  %v1913_v6 = vsel %vm1901_vm8, %v1891_v15, %v1894_v10  ;;  %v1914_v18 = vsel %vm1904_vm10, %v1900_v35, 1326507024  ;;  %vm6485_vm13 = vcmp.le.f32.partialorder %v1766_v50, 0.7853982 }
 0x210   : > { %vm4536_vm14 = vcmp.lt.s32.totalorder %v4535_v9, 0  ;;  %v1905_v8 = vsel %vm1901_vm8, %v1885_v59, %v1888_v16  ;;  %v1912_v31 = vsel %vm1902_vm9, %v1909_v4, %v1911_v55  ;;  %v1915_v28 = vsel %vm1903_vm12, %v1897_v12, %v1914_v18  ;;  %v4849_v54 = vpop.eup %4848 }
 0x211   : > { %v1837_v40 = vsel %vm4536_vm14, 0, %v4535_v9  ;;  %v1916_v38 = vsel %vm1902_vm9, %v1913_v6, %v1915_v28  ;;  %v6496_v10 = vmul.u32.u64.low %v6464_v34, %v1912_v31  ;;  %v6497_v35 = vmul.u32.u64.high %v6464_v34, %v1912_v31, %v6496_v10  ;;  %v4851_v50 = vpop.eup %4850 }
 0x212   : > { %v1762_v21 = vxor.u32 2147483648, %v4849_v54  ;;  %v1838_v48 = vsub.s32 32, %v1837_v40  ;;  %v1842_v16 = vsub.s32 4294967266, %v1837_v40  ;;  %v1907_v59 = vsel %vm1903_vm12, %v1891_v15, %v1906_v39 }
 0x213   : > { %v1759_v4 = vxor.u32 2147483648, %v4851_v50  ;;  %v1839_v12 = vshll.u32 %v6446_v7, %v1837_v40  ;;  %v6504_v9 = vmul.u32.u64.low %v6464_v34, %v1916_v38  ;;  %v6505_v55 = vmul.u32.u64.high %v6464_v34, %v1916_v38, %v6504_v9 }
 0x214   : > { %v1763_v6 = vsel %vm1761_vm2, %v1762_v21, %v4851_v50  ;;  %v3451_v18 = vsel %vm3449_vm3, %v1762_v21, %v4851_v50  ;;  %v1840_v31 = vshrl.u32 %v1822_v46, %v1838_v48  ;;  %v1843_v28 = vadd.s32 127, %v1842_v16 }
 0x215   : > { %v1760_v3 = vsel %vm1758_vm4, %v4849_v54, %v1759_v4  ;;  %v3448_v15 = vsel %vm3446_vm5, %v4849_v54, %v1759_v4  ;;  %v1908_v7 = vsel %vm1902_vm9, %v1905_v8, %v1907_v59  ;;  %v1927_v39 = vadd.s32 1, %v6497_v35 }
 0x216   : > { %v1764_v40 = vsel %vm1757_vm6, %v1760_v3, %v1763_v6  ;;  %v3452_v38 = vsel %vm3445_vm7, %v3448_v15, %v3451_v18  ;;  %v1841_v50 = vor.u32 %v1840_v31, %v1839_v12  ;;  %v1844_v46 = vshll.u32 %v1843_v28, 23  ;;  %v6531_v3 = vpop.f32.mrb[29].mxu0 }
 0x217   : > { %v1765_v21 = vsel %vm1755_vm11, nan, %v1764_v40  ;;  %v3453_v54 = vsel %vm1755_vm11, nan, %v3452_v38  ;;  %vm1926_vm0 = vc.u32 %v6505_v55, %v6496_v10  ;;  %v7398_v33 = vand.u32 2147483647, %v6441_v51 }
 0x218   : > { %v2597_v5 = vmul.f32 %v4847_v47, %v1765_v21  ;;  %v4293_v8 = vmul.f32 %v4847_v47, %v3453_v54  ;;  %v1845_v48 = vor.u32 4788187, %v1844_v46  ;;  %v1924_v16 = vmul.u32 %v6464_v34, %v1908_v7  ;;  %v6572_v54 = vpop.f32.mrb[30].mxu1 }
 0x219   : > { %v1848_v59 = vcvt.s32.f32 %v1841_v50  ;;  %v1855_v4 = vsel %vm6485_vm13, 0, %v1853_v49  ;;  %v1928_v62 = vsel %vm1926_vm0, %v1927_v39, %v6497_v35  ;;  %v1976_v12 = vshrl.u32 %v1975_v26, 23  ;;  %7444 = vst [vmem:[#allocation8_spill] sm:$0xff] %v6572_v54 }
 0x21a   : > { %2613 = vst [vmem:[%s5613_s9 + $0x38] sm:$0xff] %v2597_v5  ;;  %4309 = vst [vmem:[%s5618_s10 + $0x38] sm:$0xff] %v4293_v8  ;;  %v1846_v9 = vand.u32 2147483647, %v1845_v48  ;;  %v1929_v6 = vadd.s32 %v1928_v62, %v1924_v16  ;;  %v787_v18 = vadd.f32 %v5250_v2, %v6419_v36  ;;  %v726_v47 = vadd.f32 %v6022_v17, %v6020_v43  ;;  %v6574_v5 = vpop.f32.mrb[30].mxu0 }
 0x21b   : > { %v4541_v31 = vadd.s32 4294967169, %v1976_v12  ;;  %v728_v34 = vadd.f32 %v6104_v58, %v6102_v27  ;;  %v732_v49 = vadd.f32 %v6120_v1, %v6118_v25  ;;  %v1979_v26 = vand.u32 8388607, %v7398_v33  ;;  %7445 = vst [vmem:[#allocation9_spill] sm:$0xff] %v6574_v5 }
 0x21c   : > { %v1849_v28 = vmul.f32 %v1848_v59, %v1846_v9  ;;  %v1930_v35 = vadd.s32 536870912, %v1929_v6  ;;  %v840_v15 = vmul.f32 %v787_v18, %v787_v18  ;;  %v3547_v7 = vadd.s32 3, %v1855_v4 }
 0x21d   : > { %v1982_v39 = vadd.s32 1, %v4541_v31  ;;  %v6554_v17 = vadd.f32 %v6193_v57, %v6191_v29  ;;  %v7443_v27 = vsub.f32 %v6255_v19, %v6259_v23  ;;  %v1980_v38 = vor.u32 8388608, %v1979_v26 }
 0x21e   : > { %v1850_v40 = vxor.u32 2147483648, %v1849_v28  ;;  %v6549_v36 = vshrl.u32 %v1930_v35, 30  ;;  %v856_v43 = vadd.f32 %v840_v15, %v6469_v37  ;;  %v6565_v46 = vand.u32 3, %v1855_v4 }
 0x21f   : > { %v926_v58 = vmul.f32 1.442695, %v7443_v27  ;;  %vm1983_vm15 = vcmp.gt.s32.totalorder %v1982_v39, 0  ;;  %v6567_v57 = vand.u32 3, %v3547_v7  ;;  %v788_v23 = vadd.f32 %v5248_v63, %v726_v47 }
 0x220   : > { %v1851_v25 = vsel %vm1768_vm1, %v1850_v40, %v1849_v28  ;;  %v1932_v1 = vshll.u32 %v6549_v36, 30  ;;  %v1984_v50 = vsel %vm1983_vm15, %v1982_v39, 0  ;;  %v1925_v44 = vadd.s32 %v6496_v10, %v6505_v55 }
 0x221   : > { %v1854_v37 = vsel %vm6485_vm13, %v6159_v45, %v1851_v25  ;;  %v1986_v29 = vand.u32 31, %v1984_v50  ;;  %v6579_v48 = vshll.u32 %v1980_v38, 8  ;;  %v6583_v4 = vmul.f32 -20.0, %v787_v18 }
 0x222   : > { %4852 = vcosq.f32 %v1854_v37  ;;  %v6569_v19 = vsub.s32 %v1929_v6, %v1932_v1  ;;  %v6586_v62 = vadd.f32 %v5250_v2, %v728_v34  ;;  %vm1864_vm1 = vcmp.eq.s32.totalorder %v6565_v46, 2 }
 0x223   : > { %4854 = vsinq.f32 %v1854_v37  ;;  %v1987_v21 = vsub.s32 32, %v1986_v29  ;;  %vm3553_vm2 = vcmp.eq.s32.totalorder %v6567_v57, 2  ;;  %v6591_v10 = vshrl.u32 %v1984_v50, 5 }
 0x224   : > { %4856 = vpow2.f32 %v926_v58  ;;  %v1935_v8 = vsub.s32 0, %v6569_v19  ;;  %v6593_v55 = vmul.f32 %v788_v23, %v788_v23  ;;  %v6596_v9 = vadd.f32 %v5248_v63, %v732_v49 }
 0x225   : > { %v1990_v16 = vshrl.u32 %v7411_v0, %v1987_v21  ;;  %v1993_v59 = vshrl.u32 %v7407_v42, %v1987_v21  ;;  %vm1861_vm3 = vcmp.eq.s32.totalorder %v6565_v46, 0  ;;  %vm3550_vm4 = vcmp.eq.s32.totalorder %v6567_v57, 0 }
 0x226   : > { %v4538_v12 = vmin.u32 %v1935_v8, %v6569_v19  ;;  %v1989_v6 = vshll.u32 %v7415_v56, %v1986_v29  ;;  %v1992_v18 = vshll.u32 %v7411_v0, %v1986_v29  ;;  %v1995_v47 = vshll.u32 %v7407_v42, %v1986_v29 }
 0x227   : > { %v1996_v31 = vshrl.u32 %v7406_v60, %v1987_v21  ;;  %vm1860_vm5 = vcmp.lt.s32.totalorder %v6565_v46, 2  ;;  %vm3549_vm6 = vcmp.lt.s32.totalorder %v6567_v57, 2  ;;  %v1998_v49 = vshll.u32 %v7406_v60, %v1986_v29 }
 0x228   : > { %v1937_v34 = vclz %v4538_v12  ;;  %v1999_v28 = vshrl.u32 %v7429_v22, %v1987_v21  ;;  %v6608_v35 = vmul.f32 20.0, %v788_v23  ;;  %vm1858_vm7 = vweird.f32 %v6159_v45 }
 0x229   : > { %v1955_v26 = vsub.s32 4, %v6549_v36  ;;  %v1991_v15 = vor.u32 %v1990_v16, %v1989_v6  ;;  %v1994_v7 = vor.u32 %v1993_v59, %v1992_v18  ;;  %v1997_v39 = vor.u32 %v1996_v31, %v1995_v47 }
 0x22a   : > { %v4539_v40 = vadd.s32 4294967294, %v1937_v34  ;;  %v2000_v27 = vor.u32 %v1999_v28, %v1998_v49  ;;  %v2001_v58 = vshll.u32 %v7429_v22, %v1986_v29  ;;  %v2002_v25 = vshrl.u32 %v7430_v20, %v1987_v21 }
 0x22b   : > { %v1988_v1 = vshrl.u32 %v7415_v56, %v1987_v21  ;;  %vm2004_vm8 = vcmp.lt.s32.totalorder %v6591_v10, 1  ;;  %vm2005_vm9 = vcmp.lt.s32.totalorder %v6591_v10, 2  ;;  %v6617_v38 = vmul.f32 100.0, %v856_v43 }
 0x22c   : > { %v4853_v50 = vpop.eup %4852  ;;  %vm1871_vm10 = vcmp.lt.s32.totalorder %v6297_v24, 0  ;;  %vm4540_vm11 = vcmp.lt.s32.totalorder %v4539_v40, 0  ;;  %v2003_v37 = vor.u32 %v2002_v25, %v2001_v58  ;;  %vm2006_vm12 = vcmp.lt.s32.totalorder %v6591_v10, 3 }
 0x22d   : > { %vm2007_vm13 = vcmp.lt.s32.totalorder %v6591_v10, 4  ;;  %v4855_v29 = vpop.eup %4854  ;;  %v1865_v23 = vxor.u32 2147483648, %v4853_v50  ;;  %v1940_v8 = vsel %vm4540_vm11, 0, %v4539_v40  ;;  %v2012_v18 = vsel %vm2004_vm8, %v1991_v15, %v1994_v7 }
 0x22e   : > { %v2009_v21 = vsel %vm2007_vm13, %v1997_v39, 2102212464  ;;  %v2013_v16 = vsel %vm2007_vm13, %v2000_v27, 920167782  ;;  %v4857_v43 = vpop.eup %4856  ;;  %v1862_v59 = vxor.u32 2147483648, %v4855_v29  ;;  %v1941_v12 = vsub.s32 32, %v1940_v8 }
 0x22f   : > { %v1945_v6 = vsub.s32 4294967266, %v1940_v8  ;;  %v1866_v47 = vsel %vm1864_vm1, %v1865_v23, %v4855_v29  ;;  %v3555_v31 = vsel %vm3553_vm2, %v1865_v23, %v4855_v29  ;;  %v1942_v34 = vshll.u32 %v6569_v19, %v1940_v8  ;;  %v6647_v23 = vpop.f32.mrb[31].mxu1  ;;  %v6649_v8 = vpop.f32.mrb[31].mxu0 }
 0x230   : > { %v2014_v49 = vsel %vm2006_vm12, %v1997_v39, %v2013_v16  ;;  %v1863_v28 = vsel %vm1861_vm3, %v4853_v50, %v1862_v59  ;;  %v3552_v40 = vsel %vm3550_vm4, %v4853_v50, %v1862_v59  ;;  %v1943_v58 = vshrl.u32 %v1925_v44, %v1941_v12  ;;  %7446 = vst [vmem:[#allocation10_spill] sm:$0xff] %v6647_v23 }
 0x231   : > { %v1946_v25 = vadd.s32 127, %v1945_v6  ;;  %v1867_v33 = vsel %vm1860_vm5, %v1863_v28, %v1866_v47  ;;  %v3556_v5 = vsel %vm3549_vm6, %v3552_v40, %v3555_v31  ;;  %v2015_v19 = vsel %vm2005_vm9, %v2012_v18, %v2014_v49  ;;  %7447 = vst [vmem:[#allocation11_spill] sm:$0xff] %v6649_v8 }
 0x232   : > { %v2016_v29 = vsel %vm2004_vm8, %v1994_v7, %v1997_v39  ;;  %v1868_v44 = vsel %vm1858_vm7, nan, %v1867_v33  ;;  %v3557_v46 = vsel %vm1858_vm7, nan, %v3556_v5  ;;  %v1944_v57 = vor.u32 %v1943_v58, %v1942_v34 }
 0x233   : > { %v1947_v50 = vshll.u32 %v1946_v25, 23  ;;  %v2598_v16 = vmul.f32 %v4857_v43, %v1868_v44  ;;  %v4294_v59 = vmul.f32 %v4857_v43, %v3557_v46  ;;  %v2008_v12 = vsel %vm2004_vm8, %v1988_v1, %v1991_v15 }
 0x234   : > { %v2017_v39 = vsel %vm2007_vm13, %v2003_v37, 1326507024  ;;  %v2010_v18 = vsel %vm2006_vm12, %v1994_v7, %v2009_v21  ;;  %v1956_v5 = vsel %vm1871_vm10, %v1955_v26, %v6549_v36  ;;  %v1951_v21 = vcvt.s32.f32 %v1944_v57 }
 0x235   : > { %v1948_v6 = vor.u32 4788187, %v1947_v50  ;;  %v2018_v33 = vsel %vm2006_vm12, %v2000_v27, %v2017_v39  ;;  %2614 = vst [vmem:[%s5613_s9 + $0x40] sm:$0xff] %v2598_v16  ;;  %4310 = vst [vmem:[%s5618_s10 + $0x40] sm:$0xff] %v4294_v59  ;;  %v6673_v1 = vmul.u32.u64.low %v6579_v48, %v2015_v19  ;;  %v6674_v37 = vmul.u32.u64.high %v6579_v48, %v2015_v19, %v6673_v1 }
 0x236   : > { %v2019_v15 = vsel %vm2005_vm9, %v2016_v29, %v2018_v33  ;;  %v2011_v47 = vsel %vm2005_vm9, %v2008_v12, %v2010_v18  ;;  %v2078_v31 = vand.u32 2139095040, %v6608_v35  ;;  %v7448_v36 = vand.u32 2147483647, %v6297_v24 }
 0x237   : > { %v1949_v7 = vand.u32 2147483647, %v1948_v6  ;;  %v6677_v27 = vmul.u32.u64.low %v6579_v48, %v2019_v15  ;;  %v6678_v43 = vmul.u32.u64.high %v6579_v48, %v2019_v15, %v6677_v27  ;;  %v7400_v49 = vand.u32 2147483647, %v6608_v35 }
 0x238   : > { %vm6685_vm14 = vcmp.le.f32.partialorder %v7448_v36, 0.7853982  ;;  %v841_v28 = vmul.f32 %v6586_v62, %v6586_v62  ;;  %v2030_v10 = vadd.s32 1, %v6674_v37  ;;  %v2079_v58 = vshrl.u32 %v2078_v31, 23 }
 0x239   : > { %v1952_v34 = vmul.f32 %v1951_v21, %v1949_v7  ;;  %v1958_v40 = vsel %vm6685_vm14, 0, %v1956_v5  ;;  %v6696_v25 = vmul.f32 20.0, %v6596_v9  ;;  %v2027_v29 = vmul.u32 %v6579_v48, %v2011_v47 }
 0x23a   : > { %vm2029_vm0 = vc.u32 %v6678_v43, %v6673_v1  ;;  %v857_v44 = vadd.f32 %v841_v28, %v6593_v55  ;;  %v4545_v57 = vadd.s32 4294967169, %v2079_v58  ;;  %v6703_v50 = vmul.f32 -20.0, %v6586_v62 }
 0x23b   : > { %v1953_v19 = vxor.u32 2147483648, %v1952_v34  ;;  %v2031_v46 = vsel %vm2029_vm0, %v2030_v10, %v6674_v37  ;;  %v3651_v59 = vadd.s32 3, %v1958_v40  ;;  %v2082_v55 = vand.u32 8388607, %v7400_v49 }
 0x23c   : > { %v2032_v12 = vadd.s32 %v2031_v46, %v2027_v29  ;;  %v6707_v39 = vmul.f32 100.0, %v857_v44  ;;  %v2085_v6 = vadd.s32 1, %v4545_v57  ;;  %v7399_v18 = vand.u32 2147483647, %v6696_v25 }
 0x23d   : > { %v1954_v16 = vsel %vm1871_vm10, %v1953_v19, %v1952_v34  ;;  %v2181_v5 = vand.u32 2139095040, %v6696_v25  ;;  %v1962_v15 = vand.u32 3, %v1958_v40  ;;  %v7451_v37 = vsub.f32 %v6404_v52, %v6413_v11 }
 0x23e   : > { %v1957_v48 = vsel %vm6685_vm14, %v6297_v24, %v1954_v16  ;;  %v2033_v62 = vadd.s32 536870912, %v2032_v12  ;;  %vm2086_vm15 = vcmp.gt.s32.totalorder %v2085_v6, 0  ;;  %v3652_v21 = vand.u32 3, %v3651_v59 }
 0x23f   : > { %4858 = vcosq.f32 %v1957_v48  ;;  %v928_v7 = vmul.f32 1.442695, %v7451_v37  ;;  %v2087_v47 = vsel %vm2086_vm15, %v2085_v6, 0  ;;  %v2083_v31 = vor.u32 8388608, %v2082_v55 }
 0x240   : > { %4860 = vsinq.f32 %v1957_v48  ;;  %v6721_v27 = vshrl.u32 %v2033_v62, 30  ;;  %v2089_v36 = vand.u32 31, %v2087_v47  ;;  %v6725_v26 = vand.u32 8388607, %v7399_v18 }
 0x241   : > { %v2182_v28 = vshrl.u32 %v2181_v5, 23  ;;  %vm1964_vm1 = vcmp.eq.s32.totalorder %v1962_v15, 0  ;;  %vm1967_vm2 = vcmp.eq.s32.totalorder %v1962_v15, 2  ;;  %4862 = vpow2.f32 %v928_v7 }
 0x242   : > { %v2035_v34 = vshll.u32 %v6721_v27, 30  ;;  %v2090_v40 = vsub.s32 32, %v2089_v36  ;;  %vm1963_vm3 = vcmp.lt.s32.totalorder %v1962_v15, 2  ;;  %vm3653_vm4 = vcmp.lt.s32.totalorder %v3652_v21, 2 }
 0x243   : > { %vm3654_vm5 = vcmp.eq.s32.totalorder %v3652_v21, 0  ;;  %vm3657_vm6 = vcmp.eq.s32.totalorder %v3652_v21, 2  ;;  %v6732_v11 = vmul.f32 %v6596_v9, %v6596_v9  ;;  %vm1961_vm7 = vweird.f32 %v6297_v24 }
 0x244   : > { %v6728_v52 = vsub.s32 %v2032_v12, %v2035_v34  ;;  %v2028_v10 = vadd.s32 %v6673_v1, %v6678_v43  ;;  %v6736_v58 = vshrl.u32 %v2087_v47, 5  ;;  %v6738_v19 = vshll.u32 %v2083_v31, 8 }
 0x245   : > { %v2093_v46 = vshrl.u32 %v7411_v0, %v2090_v40  ;;  %v4549_v57 = vadd.s32 4294967169, %v2182_v28  ;;  %v6745_v16 = vadd.f32 %v5250_v2, %v6554_v17  ;;  %v2058_v9 = vsub.s32 4, %v6721_v27 }
 0x246   : > { %v2038_v44 = vsub.s32 0, %v6728_v52  ;;  %v2092_v59 = vshll.u32 %v7415_v56, %v2089_v36  ;;  %v2096_v1 = vshrl.u32 %v7407_v42, %v2090_v40  ;;  %v2099_v43 = vshrl.u32 %v7406_v60, %v2090_v40 }
 0x247   : > { %v2095_v55 = vshll.u32 %v7411_v0, %v2089_v36  ;;  %v2098_v6 = vshll.u32 %v7407_v42, %v2089_v36  ;;  %v2102_v62 = vshrl.u32 %v7429_v22, %v2090_v40  ;;  %v2101_v37 = vshll.u32 %v7406_v60, %v2089_v36 }
 0x248   : > { %v4542_v48 = vmin.u32 %v2038_v44, %v6728_v52  ;;  %v2104_v7 = vshll.u32 %v7429_v22, %v2089_v36  ;;  %v2105_v47 = vshrl.u32 %v7430_v20, %v2090_v40  ;;  %v2091_v28 = vshrl.u32 %v7415_v56, %v2090_v40 }
 0x249   : > { %v4859_v12 = vpop.eup %4858  ;;  %v2094_v18 = vor.u32 %v2093_v46, %v2092_v59  ;;  %vm1974_vm8 = vcmp.lt.s32.totalorder %v6441_v51, 0  ;;  %v2097_v49 = vor.u32 %v2096_v1, %v2095_v55  ;;  %v2100_v29 = vor.u32 %v2099_v43, %v2098_v6 }
 0x24a   : > { %v4861_v5 = vpop.eup %4860  ;;  %v1968_v17 = vxor.u32 2147483648, %v4859_v12  ;;  %v2040_v34 = vclz %v4542_v48  ;;  %v2103_v23 = vor.u32 %v2102_v62, %v2101_v37  ;;  %v2106_v46 = vor.u32 %v2105_v47, %v2104_v7 }
 0x24b   : > { %v1965_v31 = vxor.u32 2147483648, %v4861_v5  ;;  %v4863_v54 = vpop.eup %4862  ;;  %vm2107_vm9 = vcmp.lt.s32.totalorder %v6736_v58, 1  ;;  %vm2108_vm11 = vcmp.lt.s32.totalorder %v6736_v58, 2  ;;  %vm2110_vm12 = vcmp.lt.s32.totalorder %v6736_v58, 4 }
 0x24c   : > { %v1969_v44 = vsel %vm1967_vm2, %v1968_v17, %v4861_v5  ;;  %v3659_v33 = vsel %vm3657_vm6, %v1968_v17, %v4861_v5  ;;  %v4543_v36 = vadd.s32 4294967294, %v2040_v34  ;;  %vm2109_vm13 = vcmp.lt.s32.totalorder %v6736_v58, 3 }
 0x24d   : > { %v1966_v45 = vsel %vm1964_vm1, %v4859_v12, %v1965_v31  ;;  %v3656_v8 = vsel %vm3654_vm5, %v4859_v12, %v1965_v31  ;;  %v2111_v21 = vsel %vm2107_vm9, %v2091_v28, %v2094_v18  ;;  %v2116_v55 = vsel %vm2110_vm12, %v2103_v23, 920167782 }
 0x24e   : > { %v1970_v48 = vsel %vm1963_vm3, %v1966_v45, %v1969_v44  ;;  %v3660_v40 = vsel %vm3653_vm4, %v3656_v8, %v3659_v33  ;;  %vm4544_vm10 = vcmp.lt.s32.totalorder %v4543_v36, 0  ;;  %v2112_v33 = vsel %vm2110_vm12, %v2100_v29, 2102212464 }
 0x24f   : > { %v1971_v59 = vsel %vm1961_vm7, nan, %v1970_v48  ;;  %v3661_v1 = vsel %vm1961_vm7, nan, %v3660_v40  ;;  %v2043_v15 = vsel %vm4544_vm10, 0, %v4543_v36  ;;  %v7452_v6 = vand.u32 2147483647, %v6441_v51 }
 0x250   : > { %v2599_v43 = vmul.f32 %v4863_v54, %v1971_v59  ;;  %v4295_v12 = vmul.f32 %v4863_v54, %v3661_v1  ;;  %v2044_v45 = vsub.s32 32, %v2043_v15  ;;  %v2048_v8 = vsub.s32 4294967266, %v2043_v15 }
 0x251   : > { %v2045_v24 = vshll.u32 %v6728_v52, %v2043_v15  ;;  %v2115_v54 = vsel %vm2107_vm9, %v2094_v18, %v2097_v49  ;;  %vm6787_vm14 = vcmp.le.f32.partialorder %v7452_v6, 0.7853982  ;;  %v2117_v52 = vsel %vm2109_vm13, %v2100_v29, %v2116_v55 }
 0x252   : > { %2615 = vst [vmem:[%s5613_s9 + $0x48] sm:$0xff] %v2599_v43  ;;  %4311 = vst [vmem:[%s5618_s10 + $0x48] sm:$0xff] %v4295_v12  ;;  %v2046_v5 = vshrl.u32 %v2028_v10, %v2044_v45  ;;  %v2049_v17 = vadd.s32 127, %v2048_v8  ;;  %v2119_v37 = vsel %vm2107_vm9, %v2097_v49, %v2100_v29  ;;  %v2113_v18 = vsel %vm2109_vm13, %v2097_v49, %v2112_v33 }
 0x253   : > { %v2118_v7 = vsel %vm2108_vm11, %v2115_v54, %v2117_v52  ;;  %v2120_v47 = vsel %vm2110_vm12, %v2106_v46, 1326507024  ;;  %v2188_v31 = vadd.s32 1, %v4549_v57  ;;  %v2059_v10 = vsel %vm1974_vm8, %v2058_v9, %v6721_v27 }
 0x254   : > { %v2047_v34 = vor.u32 %v2046_v5, %v2045_v24  ;;  %v2050_v28 = vshll.u32 %v2049_v17, 23  ;;  %v2121_v44 = vsel %vm2109_vm13, %v2103_v23, %v2120_v47  ;;  %v2114_v57 = vsel %vm2108_vm11, %v2111_v21, %v2113_v18 }
 0x255   : > { %v2122_v29 = vsel %vm2108_vm11, %v2119_v37, %v2121_v44  ;;  %v6809_v49 = vmul.u32.u64.low %v6738_v19, %v2118_v7  ;;  %v6810_v36 = vmul.u32.u64.high %v6738_v19, %v2118_v7, %v6809_v49  ;;  %vm2189_vm0 = vcmp.gt.s32.totalorder %v2188_v31, 0 }
 0x256   : > { %v2051_v48 = vor.u32 4788187, %v2050_v28  ;;  %v6816_v40 = vmul.u32.u64.low %v6738_v19, %v2122_v29  ;;  %v6817_v46 = vmul.u32.u64.high %v6738_v19, %v2122_v29, %v6816_v40  ;;  %v2190_v27 = vsel %vm2189_vm0, %v2188_v31, 0 }
 0x257   : > { %v842_v23 = vmul.f32 %v6745_v16, %v6745_v16  ;;  %v6823_v9 = vadd.f32 %v6301_v32, %v6299_v13  ;;  %v6827_v59 = vadd.f32 %v6373_v14, %v6371_v61  ;;  %v2054_v43 = vcvt.s32.f32 %v2047_v34 }
 0x258   : > { %v2052_v1 = vand.u32 2147483647, %v2051_v48  ;;  %v2192_v58 = vand.u32 31, %v2190_v27  ;;  %v6831_v12 = vadd.f32 %v6430_v53, %v6428_v30  ;;  %v7455_v15 = vsub.f32 %v6583_v4, %v6617_v38 }
 0x259   : > { %v2133_v8 = vadd.s32 1, %v6810_v36  ;;  %v7456_v13 = vor.u32 8388608, %v6725_v26  ;;  %v6842_v61 = vadd.f32 %v842_v23, %v6732_v11  ;;  %v2130_v33 = vmul.u32 %v6738_v19, %v2114_v57 }
 0x25a   : > { %v930_v45 = vmul.f32 1.442695, %v7455_v15  ;;  %v2055_v14 = vmul.f32 %v2054_v43, %v2052_v1  ;;  %vm2132_vm15 = vc.u32 %v6817_v46, %v6809_v49  ;;  %v2193_v30 = vsub.s32 32, %v2192_v58 }
 0x25b   : > { %v6839_v32 = vshll.u32 %v7456_v13, 8  ;;  %v2061_v53 = vsel %vm6787_vm14, 0, %v2059_v10  ;;  %v2134_v4 = vsel %vm2132_vm15, %v2133_v8, %v6810_v36  ;;  %v2195_v38 = vshll.u32 %v7415_v56, %v2192_v58 }
 0x25c   : > { %v2198_v26 = vshll.u32 %v7411_v0, %v2192_v58  ;;  %v2056_v24 = vxor.u32 2147483648, %v2055_v14  ;;  %v2135_v21 = vadd.s32 %v2134_v4, %v2130_v33  ;;  %v2196_v11 = vshrl.u32 %v7411_v0, %v2193_v30 }
 0x25d   : > { %v2201_v54 = vshll.u32 %v7407_v42, %v2192_v58  ;;  %v2199_v19 = vshrl.u32 %v7407_v42, %v2193_v30  ;;  %v2202_v55 = vshrl.u32 %v7406_v60, %v2193_v30  ;;  %v2204_v6 = vshll.u32 %v7406_v60, %v2192_v58 }
 0x25e   : > { %v2205_v5 = vshrl.u32 %v7429_v22, %v2193_v30  ;;  %v2057_v17 = vsel %vm1974_vm8, %v2056_v24, %v2055_v14  ;;  %v2136_v52 = vadd.s32 536870912, %v2135_v21  ;;  %v2191_v37 = vshrl.u32 %v2190_v27, 5 }
 0x25f   : > { %v2197_v18 = vor.u32 %v2196_v11, %v2195_v38  ;;  %v2060_v7 = vsel %vm6787_vm14, %v6441_v51, %v2057_v17  ;;  %v2200_v47 = vor.u32 %v2199_v19, %v2198_v26  ;;  %v2203_v31 = vor.u32 %v2202_v55, %v2201_v54 }
 0x260   : > { %v2206_v34 = vor.u32 %v2205_v5, %v2204_v6  ;;  %4864 = vcosq.f32 %v2060_v7  ;;  %v6863_v28 = vshrl.u32 %v2136_v52, 30  ;;  %v2207_v10 = vshll.u32 %v7429_v22, %v2192_v58 }
 0x261   : > { %v2208_v44 = vshrl.u32 %v7430_v20, %v2193_v30  ;;  %4866 = vsinq.f32 %v2060_v7  ;;  %v2065_v29 = vand.u32 3, %v2061_v53  ;;  %v3755_v36 = vadd.s32 3, %v2061_v53 }
 0x262   : > { %v2194_v48 = vshrl.u32 %v7415_v56, %v2193_v30  ;;  %v2138_v57 = vshll.u32 %v6863_v28, 30  ;;  %vm2210_vm1 = vcmp.lt.s32.totalorder %v2191_v37, 1  ;;  %vm2213_vm2 = vcmp.lt.s32.totalorder %v2191_v37, 4 }
 0x263   : > { %v2209_v40 = vor.u32 %v2208_v44, %v2207_v10  ;;  %vm2212_vm3 = vcmp.lt.s32.totalorder %v2191_v37, 3  ;;  %v2215_v62 = vsel %vm2213_vm2, %v2203_v31, 2102212464  ;;  %v2218_v27 = vsel %vm2210_vm1, %v2197_v18, %v2200_v47 }
 0x264   : > { %v2219_v23 = vsel %vm2213_vm2, %v2206_v34, 920167782  ;;  %v6869_v1 = vsub.s32 %v2135_v21, %v2138_v57  ;;  %vm2211_vm4 = vcmp.lt.s32.totalorder %v2191_v37, 2  ;;  %v2222_v58 = vsel %vm2210_vm1, %v2200_v47, %v2203_v31 }
 0x265   : > { %v2220_v43 = vsel %vm2212_vm3, %v2203_v31, %v2219_v23  ;;  %v2214_v15 = vsel %vm2210_vm1, %v2194_v48, %v2197_v18  ;;  %v2216_v8 = vsel %vm2212_vm3, %v2200_v47, %v2215_v62  ;;  %v2223_v14 = vsel %vm2213_vm2, %v2209_v40, 1326507024 }
 0x266   : > { %v2221_v13 = vsel %vm2211_vm4, %v2218_v27, %v2220_v43  ;;  %v3756_v33 = vand.u32 3, %v3755_v36  ;;  %4868 = vpow2.f32 %v930_v45  ;;  %v2141_v30 = vsub.s32 0, %v6869_v1 }
 0x267   : > { %v2224_v53 = vsel %vm2212_vm3, %v2206_v34, %v2223_v14  ;;  %vm2064_vm5 = vweird.f32 %v6441_v51  ;;  %vm2066_vm6 = vcmp.lt.s32.totalorder %v2065_v29, 2  ;;  %vm2067_vm7 = vcmp.eq.s32.totalorder %v2065_v29, 0 }
 0x268   : > { %v2225_v4 = vsel %vm2211_vm4, %v2222_v58, %v2224_v53  ;;  %v6876_v38 = vmul.u32.u64.low %v6839_v32, %v2221_v13  ;;  %v6877_v26 = vmul.u32.u64.high %v6839_v32, %v2221_v13, %v6876_v38  ;;  %vm2070_vm8 = vcmp.eq.s32.totalorder %v2065_v29, 2 }
 0x269   : > { %v4546_v24 = vmin.u32 %v2141_v30, %v6869_v1  ;;  %v2217_v21 = vsel %vm2211_vm4, %v2214_v15, %v2216_v8  ;;  %vm2077_vm9 = vcmp.lt.s32.totalorder %v6608_v35, 0  ;;  %v6888_v54 = vmul.f32 100.0, %v6842_v61 }
 0x26a   : > { %v6884_v45 = vmul.u32.u64.low %v6839_v32, %v2225_v4  ;;  %v6885_v11 = vmul.u32.u64.high %v6839_v32, %v2225_v4, %v6884_v45  ;;  %v792_v19 = vadd.f32 %v5248_v63, %v6823_v9  ;;  %v4865_v55 = vpop.eup %4864  ;;  %vm3757_vm10 = vcmp.lt.s32.totalorder %v3756_v33, 2 }
 0x26b   : > { %vm3758_vm11 = vcmp.eq.s32.totalorder %v3756_v33, 0  ;;  %v2143_v6 = vclz %v4546_v24  ;;  %v6893_v5 = vmul.f32 -20.0, %v6745_v16  ;;  %v4867_v17 = vpop.eup %4866  ;;  %v2071_v52 = vxor.u32 2147483648, %v4865_v55 }
 0x26c   : > { %vm3761_vm12 = vcmp.eq.s32.totalorder %v3756_v33, 2  ;;  %v2161_v37 = vsub.s32 4, %v6863_v28  ;;  %v2233_v18 = vmul.u32 %v6839_v32, %v2217_v21  ;;  %v2068_v7 = vxor.u32 2147483648, %v4867_v17 }
 0x26d   : > { %v4547_v61 = vadd.s32 4294967294, %v2143_v6  ;;  %v2236_v47 = vadd.s32 1, %v6877_v26  ;;  %v890_v9 = vsub.f32 %v6893_v5, %v6888_v54  ;;  %v2072_v31 = vsel %vm2070_vm8, %v2071_v52, %v4867_v17 }
 0x26e   : > { %v3763_v34 = vsel %vm3761_vm12, %v2071_v52, %v4867_v17  ;;  %vm2235_vm13 = vc.u32 %v6885_v11, %v6876_v38  ;;  %v6903_v16 = vmul.f32 20.0, %v792_v19  ;;  %v2069_v10 = vsel %vm2067_vm7, %v4865_v55, %v2068_v7 }
 0x26f   : > { %v3760_v44 = vsel %vm3758_vm11, %v4865_v55, %v2068_v7  ;;  %vm4548_vm14 = vcmp.lt.s32.totalorder %v4547_v61, 0  ;;  %v2237_v32 = vsel %vm2235_vm13, %v2236_v47, %v6877_v26  ;;  %v2073_v36 = vsel %vm2066_vm6, %v2069_v10, %v2072_v31 }
 0x270   : > { %v3764_v48 = vsel %vm3757_vm10, %v3760_v44, %v3763_v34  ;;  %v2146_v57 = vsel %vm4548_vm14, 0, %v4547_v61  ;;  %v2238_v40 = vadd.s32 %v2237_v32, %v2233_v18  ;;  %v4869_v62 = vpop.eup %4868  ;;  %v2074_v27 = vsel %vm2064_vm5, nan, %v2073_v36 }
 0x271   : > { %v3765_v23 = vsel %vm2064_vm5, nan, %v3764_v48  ;;  %v2131_v43 = vadd.s32 %v6809_v49, %v6817_v46  ;;  %v2147_v58 = vsub.s32 32, %v2146_v57  ;;  %v2600_v15 = vmul.f32 %v4869_v62, %v2074_v27 }
 0x272   : > { %v4296_v29 = vmul.f32 %v4869_v62, %v3765_v23  ;;  %v2151_v8 = vsub.s32 4294967266, %v2146_v57  ;;  %v2239_v13 = vadd.s32 536870912, %v2238_v40  ;;  %v2162_v33 = vsel %vm2077_vm9, %v2161_v37, %v6863_v28 }
 0x273   : > { %v2149_v14 = vshrl.u32 %v2131_v43, %v2147_v58  ;;  %v793_v30 = vadd.f32 %v5250_v2, %v6827_v59  ;;  %2616 = vst [vmem:[%s5613_s9 + $0x50] sm:$0xff] %v2600_v15  ;;  %v2148_v51 = vshll.u32 %v6869_v1, %v2146_v57  ;;  %v2284_v49 = vand.u32 2139095040, %v6903_v16 }
 0x274   : > { %4312 = vst [vmem:[%s5618_s10 + $0x50] sm:$0xff] %v4296_v29  ;;  %v2152_v53 = vadd.s32 127, %v2151_v8  ;;  %v2240_v4 = vshrl.u32 %v2239_v13, 30  ;;  %v7457_v46 = vand.u32 2147483647, %v6608_v35  ;;  %v827_v24 = vmul.f32 %v792_v19, %v792_v19 }
 0x275   : > { %v2281_v28 = vand.u32 2147483647, %v6903_v16  ;;  %v2150_v21 = vor.u32 %v2149_v14, %v2148_v51  ;;  %v2285_v55 = vshrl.u32 %v2284_v49, 23  ;;  %v843_v6 = vmul.f32 %v793_v30, %v793_v30 }
 0x276   : > { %vm6927_vm0 = vcmp.le.f32.partialorder %v7457_v46, 0.7853982  ;;  %v2153_v45 = vshll.u32 %v2152_v53, 23  ;;  %v2241_v59 = vshll.u32 %v2240_v4, 30  ;;  %v7460_v18 = vsub.f32 %v6703_v50, %v6707_v39 }
 0x277   : > { %v2164_v1 = vsel %vm6927_vm0, 0, %v2162_v33  ;;  %v4553_v37 = vadd.s32 4294967169, %v2285_v55  ;;  %v2288_v19 = vand.u32 8388607, %v2281_v28  ;;  %v859_v61 = vadd.f32 %v843_v6, %v827_v24 }
 0x278   : > { %v2154_v17 = vor.u32 4788187, %v2153_v45  ;;  %v6934_v52 = vsub.s32 %v2238_v40, %v2241_v59  ;;  %v932_v7 = vmul.f32 1.442695, %v7460_v18  ;;  %v2157_v31 = vcvt.s32.f32 %v2150_v21 }
 0x279   : > { %v3859_v34 = vadd.s32 3, %v2164_v1  ;;  %v2291_v44 = vadd.s32 1, %v4553_v37  ;;  %v6942_v32 = vmul.f32 -20.0, %v793_v30  ;;  %v6944_v36 = vmul.f32 100.0, %v859_v61 }
 0x27a   : > { %v2155_v47 = vand.u32 2147483647, %v2154_v17  ;;  %v2244_v10 = vsub.s32 0, %v6934_v52  ;;  %v6948_v48 = vadd.f32 %v6531_v3, %v6529_v41  ;;  %vm2180_vm15 = vcmp.lt.s32.totalorder %v6696_v25, 0 }
 0x27b   : > { %v2264_v57 = vsub.s32 4, %v2240_v4  ;;  %v2289_v40 = vor.u32 8388608, %v2288_v19  ;;  %vm2292_vm1 = vcmp.gt.s32.totalorder %v2291_v44, 0  ;;  %v891_v62 = vsub.f32 %v6942_v32, %v6944_v36 }
 0x27c   : > { %v2158_v50 = vmul.f32 %v2157_v31, %v2155_v47  ;;  %v4550_v39 = vmin.u32 %v2244_v10, %v6934_v52  ;;  %v6956_v27 = vadd.f32 %v5248_v63, %v6831_v12  ;;  %4870 = vpow2.f32 %v932_v7 }
 0x27d   : > { %v2293_v41 = vsel %vm2292_vm1, %v2291_v44, 0  ;;  %v6958_v3 = vand.u32 3, %v2164_v1  ;;  %v6960_v58 = vand.u32 3, %v3859_v34  ;;  %v2234_v15 = vadd.s32 %v6876_v38, %v6885_v11 }
 0x27e   : > { %v2159_v23 = vxor.u32 2147483648, %v2158_v50  ;;  %v2246_v43 = vclz %v4550_v39  ;;  %v6964_v29 = vshrl.u32 %v2293_v41, 5  ;;  %v6970_v12 = vsel %vm2180_vm15, %v2264_v57, %v2240_v4 }
 0x27f   : > { %v2295_v14 = vand.u32 31, %v2293_v41  ;;  %v6976_v30 = vshll.u32 %v2289_v40, 8  ;;  %v6979_v38 = vmul.f32 20.0, %v6956_v27  ;;  %vm2173_vm4 = vcmp.eq.s32.totalorder %v6958_v3, 2 }
 0x280   : > { %v2160_v8 = vsel %vm2077_vm9, %v2159_v23, %v2158_v50  ;;  %v4551_v13 = vadd.s32 4294967294, %v2246_v43  ;;  %vm2313_vm2 = vcmp.lt.s32.totalorder %v6964_v29, 1  ;;  %vm3865_vm5 = vcmp.eq.s32.totalorder %v6960_v58, 2 }
 0x281   : > { %v2163_v33 = vsel %vm6927_vm0, %v6608_v35, %v2160_v8  ;;  %v2296_v11 = vsub.s32 32, %v2295_v14  ;;  %v2298_v51 = vshll.u32 %v7415_v56, %v2295_v14  ;;  %v2301_v4 = vshll.u32 %v7411_v0, %v2295_v14 }
 0x282   : > { %4872 = vcosq.f32 %v2163_v33  ;;  %vm4552_vm3 = vcmp.lt.s32.totalorder %v4551_v13, 0  ;;  %v2304_v49 = vshll.u32 %v7407_v42, %v2295_v14  ;;  %v2307_v1 = vshll.u32 %v7406_v60, %v2295_v14 }
 0x283   : > { %4874 = vsinq.f32 %v2163_v33  ;;  %v2249_v53 = vsel %vm4552_vm3, 0, %v4551_v13  ;;  %v2297_v21 = vshrl.u32 %v7415_v56, %v2296_v11  ;;  %v2299_v45 = vshrl.u32 %v7411_v0, %v2296_v11 }
 0x284   : > { %v2250_v46 = vsub.s32 32, %v2249_v53  ;;  %v2251_v26 = vshll.u32 %v6934_v52, %v2249_v53  ;;  %v2254_v24 = vsub.s32 4294967266, %v2249_v53  ;;  %v2302_v59 = vshrl.u32 %v7407_v42, %v2296_v11 }
 0x285   : > { %v2305_v55 = vshrl.u32 %v7406_v60, %v2296_v11  ;;  %v2308_v37 = vshrl.u32 %v7429_v22, %v2296_v11  ;;  %v2310_v52 = vshll.u32 %v7429_v22, %v2295_v14  ;;  %vm2170_vm6 = vcmp.eq.s32.totalorder %v6958_v3, 0 }
 0x286   : > { %v2252_v6 = vshrl.u32 %v2234_v15, %v2250_v46  ;;  %v2255_v17 = vadd.s32 127, %v2254_v24  ;;  %vm3862_vm7 = vcmp.eq.s32.totalorder %v6960_v58, 0  ;;  %v7461_v18 = vand.u32 2147483647, %v6696_v25  ;;  %v4871_v34 = vpop.eup %4870 }
 0x287   : > { %v2300_v19 = vor.u32 %v2299_v45, %v2298_v51  ;;  %v2303_v61 = vor.u32 %v2302_v59, %v2301_v4  ;;  %v2306_v47 = vor.u32 %v2305_v55, %v2304_v49  ;;  %v2311_v31 = vshrl.u32 %v7430_v20, %v2296_v11 }
 0x288   : > { %vm6998_vm8 = vcmp.le.f32.partialorder %v7461_v18, 0.7853982  ;;  %vm2169_vm9 = vcmp.lt.s32.totalorder %v6958_v3, 2  ;;  %vm3861_vm10 = vcmp.lt.s32.totalorder %v6960_v58, 2  ;;  %v2253_v10 = vor.u32 %v2252_v6, %v2251_v26 }
 0x289   : > { %v2256_v44 = vshll.u32 %v2255_v17, 23  ;;  %v2309_v50 = vor.u32 %v2308_v37, %v2307_v1  ;;  %vm2316_vm11 = vcmp.lt.s32.totalorder %v6964_v29, 4  ;;  %vm2167_vm12 = vweird.f32 %v6608_v35 }
 0x28a   : > { %v2312_v39 = vor.u32 %v2311_v31, %v2310_v52  ;;  %vm2314_vm13 = vcmp.lt.s32.totalorder %v6964_v29, 2  ;;  %v2318_v57 = vsel %vm2316_vm11, %v2306_v47, 2102212464  ;;  %v2321_v40 = vsel %vm2313_vm2, %v2300_v19, %v2303_v61 }
 0x28b   : > { %v2257_v23 = vor.u32 4788187, %v2256_v44  ;;  %vm2315_vm14 = vcmp.lt.s32.totalorder %v6964_v29, 3  ;;  %v2317_v43 = vsel %vm2313_vm2, %v2297_v21, %v2300_v19  ;;  %v2322_v41 = vsel %vm2316_vm11, %v2309_v50, 920167782 }
 0x28c   : > { %v2260_v15 = vcvt.s32.f32 %v2253_v10  ;;  %v2323_v8 = vsel %vm2315_vm14, %v2306_v47, %v2322_v41  ;;  %v2325_v13 = vsel %vm2313_vm2, %v2303_v61, %v2306_v47  ;;  %v2326_v14 = vsel %vm2316_vm11, %v2312_v39, 1326507024  ;;  %v4873_v33 = vpop.eup %4872  ;;  %v7465_v41 = vld [vmem:[#allocation9_spill] sm:$0xff] }
 0x28d   : > { %v2258_v11 = vand.u32 2147483647, %v2257_v23  ;;  %v2319_v51 = vsel %vm2315_vm14, %v2303_v61, %v2318_v57  ;;  %v2324_v53 = vsel %vm2314_vm13, %v2321_v40, %v2323_v8  ;;  %v2327_v4 = vsel %vm2315_vm14, %v2309_v50, %v2326_v14  ;;  %v4875_v49 = vpop.eup %4874  ;;  %v7466_v8 = vld [vmem:[#allocation10_spill] sm:$0xff] }
 0x28e   : > { %v2174_v46 = vxor.u32 2147483648, %v4873_v33  ;;  %v2328_v26 = vsel %vm2314_vm13, %v2325_v13, %v2327_v4  ;;  %v7020_v24 = vmul.u32.u64.low %v6976_v30, %v2324_v53  ;;  %v7021_v21 = vmul.u32.u64.high %v6976_v30, %v2324_v53, %v7020_v24  ;;  %v7467_v13 = vld [vmem:[#allocation11_spill] sm:$0xff] }
 0x28f   : > { %v2171_v45 = vxor.u32 2147483648, %v4875_v49  ;;  %v2261_v59 = vmul.f32 %v2260_v15, %v2258_v11  ;;  %v7025_v55 = vmul.u32.u64.low %v6976_v30, %v2328_v26  ;;  %v7026_v1 = vmul.u32.u64.high %v6976_v30, %v2328_v26, %v7025_v55 }
 0x290   : > { %v2175_v6 = vsel %vm2173_vm4, %v2174_v46, %v4875_v49  ;;  %v3867_v17 = vsel %vm3865_vm5, %v2174_v46, %v4875_v49  ;;  %v934_v37 = vmul.f32 1.442695, %v890_v9  ;;  %v2320_v52 = vsel %vm2314_vm13, %v2317_v43, %v2319_v51  ;;  %v7464_v43 = vld [vmem:[#allocation8_spill] sm:$0xff] }
 0x291   : > { %v2172_v18 = vsel %vm2170_vm6, %v4873_v33, %v2171_v45  ;;  %v3864_v19 = vsel %vm3862_vm7, %v4873_v33, %v2171_v45  ;;  %v2262_v61 = vxor.u32 2147483648, %v2261_v59  ;;  %v2267_v47 = vsel %vm6998_vm8, 0, %v6970_v12 }
 0x292   : > { %v2176_v31 = vsel %vm2169_vm9, %v2172_v18, %v2175_v6  ;;  %v3868_v54 = vsel %vm3861_vm10, %v3864_v19, %v3867_v17  ;;  %v2339_v5 = vadd.s32 1, %v7021_v21  ;;  %v2387_v9 = vand.u32 2139095040, %v6979_v38 }
 0x293   : > { %v2177_v29 = vsel %vm2167_vm12, nan, %v2176_v31  ;;  %v3869_v10 = vsel %vm2167_vm12, nan, %v3868_v54  ;;  %v2263_v12 = vsel %vm2180_vm15, %v2262_v61, %v2261_v59  ;;  %v2336_v3 = vmul.u32 %v6976_v30, %v2320_v52 }
 0x294   : > { %v2601_v44 = vmul.f32 %v4871_v34, %v2177_v29  ;;  %v4297_v58 = vmul.f32 %v4871_v34, %v3869_v10  ;;  %v2266_v50 = vsel %vm6998_vm8, %v6696_v25, %v2263_v12  ;;  %vm2338_vm0 = vc.u32 %v7026_v1, %v7020_v24 }
 0x295   : > { %4876 = vcosq.f32 %v2266_v50  ;;  %v2340_v39 = vsel %vm2338_vm0, %v2339_v5, %v7021_v21  ;;  %v2384_v35 = vand.u32 2147483647, %v6979_v38  ;;  %v2388_v57 = vshrl.u32 %v2387_v9, 23 }
 0x296   : > { %2617 = vst [vmem:[%s5613_s9 + $0x58] sm:$0xff] %v2601_v44  ;;  %4313 = vst [vmem:[%s5618_s10 + $0x58] sm:$0xff] %v4297_v58  ;;  %4878 = vsinq.f32 %v2266_v50  ;;  %v2341_v40 = vadd.s32 %v2340_v39, %v2336_v3  ;;  %v828_v30 = vmul.f32 %v6956_v27, %v6956_v27  ;;  %v795_v7 = vadd.f32 %v5250_v2, %v6948_v48 }
 0x297   : > { %v3963_v34 = vadd.s32 3, %v2267_v47  ;;  %v4557_v23 = vadd.s32 4294967169, %v2388_v57  ;;  %v750_v15 = vadd.f32 %v7465_v41, %v7464_v43  ;;  %v752_v14 = vadd.f32 %v7467_v13, %v7466_v8 }
 0x298   : > { %v2342_v33 = vadd.s32 536870912, %v2341_v40  ;;  %v844_v11 = vmul.f32 %v795_v7, %v795_v7  ;;  %v2391_v51 = vand.u32 8388607, %v2384_v35  ;;  %v2271_v4 = vand.u32 3, %v2267_v47 }
 0x299   : > { %v2394_v53 = vadd.s32 1, %v4557_v23  ;;  %v3964_v46 = vand.u32 3, %v3963_v34  ;;  %4880 = vpow2.f32 %v934_v37  ;;  %v7079_v21 = vmul.f32 -20.0, %v795_v7 }
 0x29a   : > { %v7076_v49 = vshrl.u32 %v2342_v33, 30  ;;  %v860_v27 = vadd.f32 %v844_v11, %v828_v30  ;;  %v2392_v59 = vor.u32 8388608, %v2391_v51  ;;  %vm2270_vm1 = vweird.f32 %v6696_v25 }
 0x29b   : > { %vm2395_vm15 = vcmp.gt.s32.totalorder %v2394_v53, 0  ;;  %vm2272_vm2 = vcmp.lt.s32.totalorder %v2271_v4, 2  ;;  %vm2273_vm3 = vcmp.eq.s32.totalorder %v2271_v4, 0  ;;  %vm2276_vm4 = vcmp.eq.s32.totalorder %v2271_v4, 2 }
 0x29c   : > { %v2344_v48 = vshll.u32 %v7076_v49, 30  ;;  %v2396_v26 = vsel %vm2395_vm15, %v2394_v53, 0  ;;  %v7081_v45 = vmul.f32 100.0, %v860_v27  ;;  %v7089_v18 = vadd.f32 %v5248_v63, %v750_v15 }
 0x29d   : > { %v2398_v55 = vand.u32 31, %v2396_v26  ;;  %vm3965_vm5 = vcmp.lt.s32.totalorder %v3964_v46, 2  ;;  %vm3966_vm6 = vcmp.eq.s32.totalorder %v3964_v46, 0  ;;  %vm3969_vm7 = vcmp.eq.s32.totalorder %v3964_v46, 2 }
 0x29e   : > { %v7084_v6 = vsub.s32 %v2341_v40, %v2344_v48  ;;  %v892_v17 = vsub.f32 %v7079_v21, %v7081_v45  ;;  %v2337_v54 = vadd.s32 %v7020_v24, %v7026_v1  ;;  %v7094_v5 = vshll.u32 %v2392_v59, 8 }
 0x29f   : > { %v4877_v52 = vpop.eup %4876  ;;  %v2399_v37 = vsub.s32 32, %v2398_v55  ;;  %v7098_v63 = vadd.f32 %v5250_v2, %v752_v14  ;;  %v7103_v58 = vmul.f32 20.0, %v7089_v18  ;;  %v2367_v30 = vsub.s32 4, %v7076_v49 }
 0x2a0   : > { %v4879_v19 = vpop.eup %4878  ;;  %v2277_v61 = vxor.u32 2147483648, %v4877_v52  ;;  %v2347_v47 = vsub.s32 0, %v7084_v6  ;;  %v2401_v7 = vshll.u32 %v7415_v56, %v2398_v55  ;;  %vm2283_vm8 = vcmp.lt.s32.totalorder %v6903_v16, 0 }
 0x2a1   : > { %v2274_v31 = vxor.u32 2147483648, %v4879_v19  ;;  %v2402_v44 = vshrl.u32 %v7411_v0, %v2399_v37  ;;  %v2405_v39 = vshrl.u32 %v7407_v42, %v2399_v37  ;;  %v2404_v41 = vshll.u32 %v7411_v0, %v2398_v55 }
 0x2a2   : > { %v2278_v9 = vsel %vm2276_vm4, %v2277_v61, %v4879_v19  ;;  %v3971_v29 = vsel %vm3969_vm7, %v2277_v61, %v4879_v19  ;;  %v4554_v10 = vmin.u32 %v2347_v47, %v7084_v6  ;;  %v2397_v15 = vshrl.u32 %v2396_v26, 5 }
 0x2a3   : > { %v2275_v12 = vsel %vm2273_vm3, %v4877_v52, %v2274_v31  ;;  %v3968_v3 = vsel %vm3966_vm6, %v4877_v52, %v2274_v31  ;;  %v4881_v57 = vpop.eup %4880  ;;  %v2403_v8 = vor.u32 %v2402_v44, %v2401_v7  ;;  %v2407_v13 = vshll.u32 %v7407_v42, %v2398_v55 }
 0x2a4   : > { %v2279_v50 = vsel %vm2272_vm2, %v2275_v12, %v2278_v9  ;;  %v3972_v24 = vsel %vm3965_vm5, %v3968_v3, %v3971_v29  ;;  %v2349_v1 = vclz %v4554_v10  ;;  %v2408_v14 = vshrl.u32 %v7406_v60, %v2399_v37 }
 0x2a5   : > { %v2280_v2 = vsel %vm2270_vm1, nan, %v2279_v50  ;;  %v3973_v40 = vsel %vm2270_vm1, nan, %v3972_v24  ;;  %v2406_v25 = vor.u32 %v2405_v39, %v2404_v41  ;;  %v2410_v33 = vshll.u32 %v7406_v60, %v2398_v55 }
 0x2a6   : > { %v2602_v34 = vmul.f32 %v4881_v57, %v2280_v2  ;;  %v4298_v23 = vmul.f32 %v4881_v57, %v3973_v40  ;;  %v4555_v43 = vadd.s32 4294967294, %v2349_v1  ;;  %v2411_v11 = vshrl.u32 %v7429_v22, %v2399_v37 }
 0x2a7   : > { %v2409_v53 = vor.u32 %v2408_v14, %v2407_v13  ;;  %v2413_v4 = vshll.u32 %v7429_v22, %v2398_v55  ;;  %v2414_v27 = vshrl.u32 %v7430_v20, %v2399_v37  ;;  %v2490_v59 = vand.u32 2139095040, %v7103_v58 }
 0x2a8   : > { %2618 = vst [vmem:[%s5613_s9 + $0x60] sm:$0xff] %v2602_v34  ;;  %4314 = vst [vmem:[%s5618_s10 + $0x60] sm:$0xff] %v4298_v23  ;;  %vm4556_vm9 = vcmp.lt.s32.totalorder %v4555_v43, 0  ;;  %v2412_v26 = vor.u32 %v2411_v11, %v2410_v33  ;;  %v2400_v19 = vshrl.u32 %v7415_v56, %v2399_v37  ;;  %vm2416_vm10 = vcmp.lt.s32.totalorder %v2397_v15, 1 }
 0x2a9   : > { %v2352_v51 = vsel %vm4556_vm9, 0, %v4555_v43  ;;  %v2415_v61 = vor.u32 %v2414_v27, %v2413_v4  ;;  %vm2417_vm11 = vcmp.lt.s32.totalorder %v2397_v15, 2  ;;  %vm2419_vm12 = vcmp.lt.s32.totalorder %v2397_v15, 4 }
 0x2aa   : > { %v2353_v46 = vsub.s32 32, %v2352_v51  ;;  %v2357_v48 = vsub.s32 4294967266, %v2352_v51  ;;  %v2354_v52 = vshll.u32 %v7084_v6, %v2352_v51  ;;  %vm2418_vm13 = vcmp.lt.s32.totalorder %v2397_v15, 3 }
 0x2ab   : > { %v2421_v9 = vsel %vm2419_vm12, %v2409_v53, 2102212464  ;;  %v2424_v55 = vsel %vm2416_vm10, %v2403_v8, %v2406_v25  ;;  %v2425_v29 = vsel %vm2419_vm12, %v2412_v26, 920167782  ;;  %v2428_v44 = vsel %vm2416_vm10, %v2406_v25, %v2409_v53 }
 0x2ac   : > { %v2355_v47 = vshrl.u32 %v2337_v54, %v2353_v46  ;;  %v2358_v31 = vadd.s32 127, %v2357_v48  ;;  %v2426_v3 = vsel %vm2418_vm13, %v2409_v53, %v2425_v29  ;;  %v2368_v6 = vsel %vm2283_vm8, %v2367_v30, %v7076_v49 }
 0x2ad   : > { %v2427_v37 = vsel %vm2417_vm11, %v2424_v55, %v2426_v3  ;;  %v2429_v54 = vsel %vm2419_vm12, %v2415_v61, 1326507024  ;;  %v829_v50 = vmul.f32 %v7089_v18, %v7089_v18  ;;  %v2420_v1 = vsel %vm2416_vm10, %v2400_v19, %v2403_v8 }
 0x2ae   : > { %v2356_v10 = vor.u32 %v2355_v47, %v2354_v52  ;;  %v2359_v12 = vshll.u32 %v2358_v31, 23  ;;  %v2422_v39 = vsel %vm2418_vm13, %v2406_v25, %v2421_v9  ;;  %v2430_v57 = vsel %vm2418_vm13, %v2412_v26, %v2429_v54 }
 0x2af   : > { %v2431_v40 = vsel %vm2417_vm11, %v2428_v44, %v2430_v57  ;;  %v7138_v7 = vmul.u32.u64.low %v7094_v5, %v2427_v37  ;;  %v7139_v34 = vmul.u32.u64.high %v7094_v5, %v2427_v37, %v7138_v7  ;;  %v2491_v43 = vshrl.u32 %v2490_v59, 23 }
 0x2b0   : > { %v2360_v24 = vor.u32 4788187, %v2359_v12  ;;  %v2363_v2 = vcvt.s32.f32 %v2356_v10  ;;  %v7143_v30 = vmul.u32.u64.low %v7094_v5, %v2431_v40  ;;  %v7144_v23 = vmul.u32.u64.high %v7094_v5, %v2431_v40, %v7143_v30 }
 0x2b1   : > { %v2423_v18 = vsel %vm2417_vm11, %v2420_v1, %v2422_v39  ;;  %v845_v41 = vmul.f32 %v7098_v63, %v7098_v63  ;;  %vm7151_vm14 = vcmp.le.f32.partialorder %v2281_v28, 0.7853982  ;;  %v4561_v14 = vadd.s32 4294967169, %v2491_v43 }
 0x2b2   : > { %v2361_v49 = vand.u32 2147483647, %v2360_v24  ;;  %v2370_v25 = vsel %vm7151_vm14, 0, %v2368_v6  ;;  %v2442_v33 = vadd.s32 1, %v7139_v34  ;;  %v2487_v11 = vand.u32 2147483647, %v7103_v58 }
 0x2b3   : > { %v861_v15 = vadd.f32 %v845_v41, %v829_v50  ;;  %v2439_v53 = vmul.u32 %v7094_v5, %v2423_v18  ;;  %vm2441_vm0 = vc.u32 %v7144_v23, %v7138_v7  ;;  %v2497_v28 = vadd.s32 1, %v4561_v14 }
 0x2b4   : > { %v2364_v13 = vmul.f32 %v2363_v2, %v2361_v49  ;;  %v2443_v4 = vsel %vm2441_vm0, %v2442_v33, %v7139_v34  ;;  %v7164_v27 = vmul.f32 -20.0, %v7098_v63  ;;  %v936_v26 = vmul.f32 1.442695, %v891_v62 }
 0x2b5   : > { %v7166_v46 = vmul.f32 100.0, %v861_v15  ;;  %v2444_v59 = vadd.s32 %v2443_v4, %v2439_v53  ;;  %vm2498_vm15 = vcmp.gt.s32.totalorder %v2497_v28, 0  ;;  %v4067_v52 = vadd.s32 3, %v2370_v25 }
 0x2b6   : > { %v2365_v51 = vxor.u32 2147483648, %v2364_v13  ;;  %v2499_v19 = vsel %vm2498_vm15, %v2497_v28, 0  ;;  %v2494_v47 = vand.u32 8388607, %v2487_v11  ;;  %v2374_v32 = vand.u32 3, %v2370_v25 }
 0x2b7   : > { %v893_v63 = vsub.f32 %v7164_v27, %v7166_v46  ;;  %v2445_v61 = vadd.s32 536870912, %v2444_v59  ;;  %v2501_v31 = vand.u32 31, %v2499_v19  ;;  %v4068_v9 = vand.u32 3, %v4067_v52 }
 0x2b8   : > { %v2366_v48 = vsel %vm2283_vm8, %v2365_v51, %v2364_v13  ;;  %v2495_v29 = vor.u32 8388608, %v2494_v47  ;;  %v7183_v10 = vshrl.u32 %v2499_v19, 5  ;;  %vm2376_vm1 = vcmp.eq.s32.totalorder %v2374_v32, 0 }
 0x2b9   : > { %v2369_v5 = vsel %vm7151_vm14, %v6903_v16, %v2366_v48  ;;  %v7180_v36 = vshrl.u32 %v2445_v61, 30  ;;  %v2502_v62 = vsub.s32 32, %v2501_v31  ;;  %v2513_v6 = vshll.u32 %v7406_v60, %v2501_v31 }
 0x2ba   : > { %4882 = vcosq.f32 %v2369_v5  ;;  %vm2375_vm2 = vcmp.lt.s32.totalorder %v2374_v32, 2  ;;  %v2504_v50 = vshll.u32 %v7415_v56, %v2501_v31  ;;  %v2507_v24 = vshll.u32 %v7411_v0, %v2501_v31 }
 0x2bb   : > { %4884 = vsinq.f32 %v2369_v5  ;;  %v2447_v55 = vshll.u32 %v7180_v36, 30  ;;  %v2505_v12 = vshrl.u32 %v7411_v0, %v2502_v62  ;;  %v2508_v3 = vshrl.u32 %v7407_v42, %v2502_v62 }
 0x2bc   : > { %4886 = vpow2.f32 %v936_v26  ;;  %v2511_v44 = vshrl.u32 %v7406_v60, %v2502_v62  ;;  %v2514_v37 = vshrl.u32 %v7429_v22, %v2502_v62  ;;  %v2510_v1 = vshll.u32 %v7407_v42, %v2501_v31 }
 0x2bd   : > { %v7190_v54 = vsub.s32 %v2444_v59, %v2447_v55  ;;  %vm2373_vm3 = vweird.f32 %v6903_v16  ;;  %vm2379_vm4 = vcmp.eq.s32.totalorder %v2374_v32, 2  ;;  %vm4069_vm5 = vcmp.lt.s32.totalorder %v4068_v9, 2 }
 0x2be   : > { %vm4070_vm6 = vcmp.eq.s32.totalorder %v4068_v9, 0  ;;  %v2515_v39 = vor.u32 %v2514_v37, %v2513_v6  ;;  %v2506_v60 = vor.u32 %v2505_v12, %v2504_v50  ;;  %v2509_v2 = vor.u32 %v2508_v3, %v2507_v24 }
 0x2bf   : > { %v2450_v57 = vsub.s32 0, %v7190_v54  ;;  %v2512_v40 = vor.u32 %v2511_v44, %v2510_v1  ;;  %vm4073_vm7 = vcmp.eq.s32.totalorder %v4068_v9, 2  ;;  %v2440_v34 = vadd.s32 %v7138_v7, %v7144_v23 }
 0x2c0   : > { %v2517_v49 = vshrl.u32 %v7430_v20, %v2502_v62  ;;  %v2535_v0 = vshll.u32 %v2495_v29, 8  ;;  %v2516_v43 = vshll.u32 %v7429_v22, %v2501_v31  ;;  %vm2519_vm8 = vcmp.lt.s32.totalorder %v7183_v10, 1 }
 0x2c1   : > { %v4558_v42 = vmin.u32 %v2450_v57, %v7190_v54  ;;  %vm2522_vm9 = vcmp.lt.s32.totalorder %v7183_v10, 4  ;;  %v2503_v8 = vshrl.u32 %v7415_v56, %v2502_v62  ;;  %vm2521_vm10 = vcmp.lt.s32.totalorder %v7183_v10, 3 }
 0x2c2   : > { %v2528_v7 = vsel %vm2522_vm9, %v2515_v39, 920167782  ;;  %v2527_v13 = vsel %vm2519_vm8, %v2506_v60, %v2509_v2  ;;  %v2518_v15 = vor.u32 %v2517_v49, %v2516_v43  ;;  %vm2520_vm11 = vcmp.lt.s32.totalorder %v7183_v10, 2 }
 0x2c3   : > { %v2452_v23 = vclz %v4558_v42  ;;  %v2529_v22 = vsel %vm2521_vm10, %v2512_v40, %v2528_v7  ;;  %v2523_v28 = vsel %vm2519_vm8, %v2503_v8, %v2506_v60  ;;  %v2524_v26 = vsel %vm2522_vm9, %v2512_v40, 2102212464 }
 0x2c4   : > { %v4883_v30 = vpop.eup %4882  ;;  %v2530_v59 = vsel %vm2520_vm11, %v2527_v13, %v2529_v22  ;;  %v2531_v19 = vsel %vm2519_vm8, %v2509_v2, %v2512_v40  ;;  %v2532_v32 = vsel %vm2522_vm9, %v2518_v15, 1326507024  ;;  %v2525_v55 = vsel %vm2521_vm10, %v2509_v2, %v2524_v26 }
 0x2c5   : > { %v4885_v18 = vpop.eup %4884  ;;  %v2380_v41 = vxor.u32 2147483648, %v4883_v30  ;;  %v4559_v53 = vadd.s32 4294967294, %v2452_v23  ;;  %v2533_v29 = vsel %vm2521_vm10, %v2515_v39, %v2532_v32  ;;  %v2526_v1 = vsel %vm2520_vm11, %v2523_v28, %v2525_v55 }
 0x2c6   : > { %v2377_v20 = vxor.u32 2147483648, %v4885_v18  ;;  %v4887_v14 = vpop.eup %4886  ;;  %v2534_v12 = vsel %vm2520_vm11, %v2531_v19, %v2533_v29  ;;  %v7242_v3 = vmul.u32.u64.low %v2535_v0, %v2530_v59  ;;  %v7243_v44 = vmul.u32.u64.high %v2535_v0, %v2530_v59, %v7242_v3 }
 0x2c7   : > { %v2381_v25 = vsel %vm2379_vm4, %v2380_v41, %v4885_v18  ;;  %v4075_v33 = vsel %vm4073_vm7, %v2380_v41, %v4885_v18  ;;  %vm4560_vm12 = vcmp.lt.s32.totalorder %v4559_v53, 0  ;;  %v2470_v42 = vsub.s32 4, %v7180_v36 }
 0x2c8   : > { %v2378_v56 = vsel %vm2376_vm1, %v4883_v30, %v2377_v20  ;;  %v4072_v51 = vsel %vm4070_vm6, %v4883_v30, %v2377_v20  ;;  %v2455_v31 = vsel %vm4560_vm12, 0, %v4559_v53  ;;  %v2545_v60 = vadd.s32 1, %v7243_v44 }
 0x2c9   : > { %v2382_v4 = vsel %vm2375_vm2, %v2378_v56, %v2381_v25  ;;  %v4076_v48 = vsel %vm4069_vm5, %v4072_v51, %v4075_v33  ;;  %v2456_v62 = vsub.s32 32, %v2455_v31  ;;  %v2460_v9 = vsub.s32 4294967266, %v2455_v31 }
 0x2ca   : > { %v2383_v5 = vsel %vm2373_vm3, nan, %v2382_v4  ;;  %v4077_v52 = vsel %vm2373_vm3, nan, %v4076_v48  ;;  %v2457_v16 = vshll.u32 %v7190_v54, %v2455_v31  ;;  %v2542_v54 = vmul.u32 %v2535_v0, %v2526_v1 }
 0x2cb   : > { %v2603_v61 = vmul.f32 %v4887_v14, %v2383_v5  ;;  %v4299_v47 = vmul.f32 %v4887_v14, %v4077_v52  ;;  %v2458_v6 = vshrl.u32 %v2440_v34, %v2456_v62  ;;  %v2461_v37 = vadd.s32 127, %v2460_v9 }
 0x2cc   : > { %v7245_v50 = vmul.u32.u64.low %v2535_v0, %v2534_v12  ;;  %v7246_v24 = vmul.u32.u64.high %v2535_v0, %v2534_v12, %v7245_v50  ;;  %vm2386_vm14 = vcmp.lt.s32.totalorder %v6979_v38, 0  ;;  %vm2385_vm0 = vcmp.le.f32.partialorder %v2384_v35, 0.7853982 }
 0x2cd   : > { %2619 = vst [vmem:[%s5613_s9 + $0x68] sm:$0xff] %v2603_v61  ;;  %4315 = vst [vmem:[%s5618_s10 + $0x68] sm:$0xff] %v4299_v47  ;;  %v2459_v57 = vor.u32 %v2458_v6, %v2457_v16  ;;  %v2462_v39 = vshll.u32 %v2461_v37, 23  ;;  %v2471_v8 = vsel %vm2386_vm14, %v2470_v42, %v7180_v36  ;;  %v938_v22 = vmul.f32 1.442695, %v892_v17 }
 0x2ce   : > { %vm2544_vm13 = vc.u32 %v7246_v24, %v7242_v3  ;;  %v2473_v23 = vsel %vm2385_vm0, 0, %v2471_v8  ;;  %v2543_v45 = vadd.s32 %v7242_v3, %v7246_v24  ;;  %vm2476_vm7 = vweird.f32 %v6979_v38 }
 0x2cf   : > { %v2463_v2 = vor.u32 4788187, %v2462_v39  ;;  %v2546_v40 = vsel %vm2544_vm13, %v2545_v60, %v7243_v44  ;;  %v2466_v30 = vcvt.s32.f32 %v2459_v57  ;;  %v4171_v25 = vadd.s32 3, %v2473_v23 }
 0x2d0   : > { %v2547_v34 = vadd.s32 %v2546_v40, %v2542_v54  ;;  %v2477_v36 = vand.u32 3, %v2473_v23  ;;  %vm2489_vm8 = vcmp.lt.s32.totalorder %v7103_v58, 0  ;;  %vm2488_vm9 = vcmp.le.f32.partialorder %v2487_v11, 0.7853982 }
 0x2d1   : > { %v2464_v49 = vand.u32 2147483647, %v2463_v2  ;;  %v4172_v35 = vand.u32 3, %v4171_v25  ;;  %v940_v2 = vmul.f32 1.442695, %v893_v63 }
 0x2d2   : > { %v2548_v18 = vadd.s32 536870912, %v2547_v34  ;;  %vm2478_vm15 = vcmp.lt.s32.totalorder %v2477_v36, 2  ;;  %vm2479_vm1 = vcmp.eq.s32.totalorder %v2477_v36, 0  ;;  %vm2482_vm2 = vcmp.eq.s32.totalorder %v2477_v36, 2 }
 0x2d3   : > { %v2467_v43 = vmul.f32 %v2466_v30, %v2464_v49  ;;  %vm4173_vm4 = vcmp.lt.s32.totalorder %v4172_v35, 2  ;;  %vm4177_vm5 = vcmp.eq.s32.totalorder %v4172_v35, 2  ;;  %vm4174_vm6 = vcmp.eq.s32.totalorder %v4172_v35, 0 }
 0x2d4   : > { %v7255_v41 = vshrl.u32 %v2548_v18, 30 }
 0x2d5   : > { %v2468_v10 = vxor.u32 2147483648, %v2467_v43 }
 0x2d6   : > { %v2550_v7 = vshll.u32 %v7255_v41, 30  ;;  %v2573_v24 = vsub.s32 4, %v7255_v41 }
 0x2d7   : > { %v2469_v0 = vsel %vm2386_vm14, %v2468_v10, %v2467_v43 }
 0x2d8   : > { %v2472_v20 = vsel %vm2385_vm0, %v6979_v38, %v2469_v0  ;;  %v2551_v13 = vsub.s32 %v2547_v34, %v2550_v7  ;;  %v2574_v57 = vsel %vm2489_vm8, %v2573_v24, %v7255_v41 }
 0x2d9   : > { %4888 = vcosq.f32 %v2472_v20  ;;  %v2576_v60 = vsel %vm2488_vm9, 0, %v2574_v57 }
 0x2da   : > { %4890 = vsinq.f32 %v2472_v20  ;;  %v2553_v14 = vsub.s32 0, %v2551_v13  ;;  %v4275_v54 = vadd.s32 3, %v2576_v60  ;;  %v2580_v40 = vand.u32 3, %v2576_v60 }
 0x2db   : > { %4892 = vpow2.f32 %v938_v22 }
 0x2dc   : > { %v4562_v33 = vmin.u32 %v2553_v14, %v2551_v13  ;;  %v4276_v49 = vand.u32 3, %v4275_v54  ;;  %vm2585_vm10 = vcmp.eq.s32.totalorder %v2580_v40, 2  ;;  %vm2582_vm12 = vcmp.eq.s32.totalorder %v2580_v40, 0 }
 0x2dd   : > { %vm2581_vm14 = vcmp.lt.s32.totalorder %v2580_v40, 2 }
 0x2de   : > { %v2555_v15 = vclz %v4562_v33  ;;  %vm4281_vm11 = vcmp.eq.s32.totalorder %v4276_v49, 2  ;;  %vm4278_vm13 = vcmp.eq.s32.totalorder %v4276_v49, 0  ;;  %vm4277_vm0 = vcmp.lt.s32.totalorder %v4276_v49, 2 }
 0x2e0   : > { %v4563_v56 = vadd.s32 4294967294, %v2555_v15 }
 0x2e2   : > { %vm4564_vm3 = vcmp.lt.s32.totalorder %v4563_v56, 0 }
 0x2e3   : > { %v4889_v51 = vpop.eup %4888  ;;  %v2558_v4 = vsel %vm4564_vm3, 0, %v4563_v56 }
 0x2e4   : > { %v4891_v53 = vpop.eup %4890  ;;  %v2483_v28 = vxor.u32 2147483648, %v4889_v51  ;;  %v2559_v17 = vsub.s32 32, %v2558_v4  ;;  %v2563_v48 = vsub.s32 4294967266, %v2558_v4  ;;  %v2560_v5 = vshll.u32 %v2551_v13, %v2558_v4 }
 0x2e5   : > { %v2480_v21 = vxor.u32 2147483648, %v4891_v53  ;;  %v4893_v62 = vpop.eup %4892 }
 0x2e6   : > { %v2484_v26 = vsel %vm2482_vm2, %v2483_v28, %v4891_v53  ;;  %v4179_v59 = vsel %vm4177_vm5, %v2483_v28, %v4891_v53  ;;  %v2561_v61 = vshrl.u32 %v2543_v45, %v2559_v17  ;;  %v2564_v47 = vadd.s32 127, %v2563_v48 }
 0x2e7   : > { %v2481_v52 = vsel %vm2479_vm1, %v4889_v51, %v2480_v21  ;;  %v4176_v19 = vsel %vm4174_vm6, %v4889_v51, %v2480_v21 }
 0x2e8   : > { %v2485_v31 = vsel %vm2478_vm15, %v2481_v52, %v2484_v26  ;;  %v4180_v32 = vsel %vm4173_vm4, %v4176_v19, %v4179_v59  ;;  %v2562_v29 = vor.u32 %v2561_v61, %v2560_v5  ;;  %v2565_v16 = vshll.u32 %v2564_v47, 23 }
 0x2e9   : > { %v2486_v9 = vsel %vm2476_vm7, nan, %v2485_v31  ;;  %v4181_v55 = vsel %vm2476_vm7, nan, %v4180_v32  ;;  %vm2579_vm15 = vweird.f32 %v7103_v58 }
 0x2ea   : > { %v2604_v12 = vmul.f32 %v4893_v62, %v2486_v9  ;;  %v4300_v3 = vmul.f32 %v4893_v62, %v4181_v55  ;;  %v2566_v44 = vor.u32 4788187, %v2565_v16  ;;  %v2569_v37 = vcvt.s32.f32 %v2562_v29 }
 0x2ec   : > { %2620 = vst [vmem:[%s5613_s9 + $0x70] sm:$0xff] %v2604_v12  ;;  %4316 = vst [vmem:[%s5618_s10 + $0x70] sm:$0xff] %v4300_v3  ;;  %v2567_v6 = vand.u32 2147483647, %v2566_v44 }
 0x2ee   : > { %v2570_v50 = vmul.f32 %v2569_v37, %v2567_v6 }
 0x2f0   : > { %v2571_v38 = vxor.u32 2147483648, %v2570_v50 }
 0x2f2   : > { %v2572_v1 = vsel %vm2489_vm8, %v2571_v38, %v2570_v50 }
 0x2f3   : > { %v2575_v39 = vsel %vm2488_vm9, %v7103_v58, %v2572_v1 }
 0x2f4   : > { %4894 = vcosq.f32 %v2575_v39 }
 0x2f5   : > { %4896 = vsinq.f32 %v2575_v39 }
 0x2f6   : > { %4898 = vpow2.f32 %v940_v2 }
 0x2fe   : > { %v4895_v30 = vpop.eup %4894 }
 0x2ff   : > { %v4897_v11 = vpop.eup %4896  ;;  %v2586_v34 = vxor.u32 2147483648, %v4895_v30 }
 0x300   : > { %v2583_v42 = vxor.u32 2147483648, %v4897_v11  ;;  %v4899_v41 = vpop.eup %4898 }
 0x301   : > { %v2587_v43 = vsel %vm2585_vm10, %v2586_v34, %v4897_v11  ;;  %v4283_v18 = vsel %vm4281_vm11, %v2586_v34, %v4897_v11 }
 0x302   : > { %v2584_v27 = vsel %vm2582_vm12, %v4895_v30, %v2583_v42  ;;  %v4280_v46 = vsel %vm4278_vm13, %v4895_v30, %v2583_v42 }
 0x303   : > { %v2588_v63 = vsel %vm2581_vm14, %v2584_v27, %v2587_v43  ;;  %v4284_v10 = vsel %vm4277_vm0, %v4280_v46, %v4283_v18 }
 0x304   : > { %v2589_v8 = vsel %vm2579_vm15, nan, %v2588_v63  ;;  %v4285_v0 = vsel %vm2579_vm15, nan, %v4284_v10 }
 0x305   : > { %v2605_v7 = vmul.f32 %v4899_v41, %v2589_v8  ;;  %v4301_v20 = vmul.f32 %v4899_v41, %v4285_v0 }
 0x307   : > { %2621 = vst [vmem:[%s5613_s9 + $0x78] sm:$0xff] %v2605_v7  ;;  %4317 = vst [vmem:[%s5618_s10 + $0x78] sm:$0xff] %v4301_v20 }
 0x308   : > { %4913 = shalt.err (!%p4910_p3)
}
 0x309   : > { %s4914_s9 = scalar_lea.hbm %s7288_s25, 2048  ;;  %s4918_s16 = scalar_lea.hbm %s7377_s5, 8192 }
 0x30a   : > { %p4915_p4 = scmp.ne.s32.totalorder %s7288_s25, %s4914_s9  ;;  %p4919_p9 = scmp.lt.u32.totalorder %s7288_s25, %s7377_s5 }
 0x30b   : > { %p4920_p10 = scmp.lt.u32.totalorder %s4918_s16, %s4914_s9  ;;  %p4922_p12 = scmp.lt.u32.totalorder %s4914_s9, %s7288_s25 }
 0x30c   : > { %p4916_p7 = pnand %p4915_p4, %p5080_p5 }
 0x30d   : > { %p4921_p11 = por %p4920_p10, %p4919_p9 }
 0x30e   : > { %p4917_p8 = pneg %p4916_p7 }
 0x30f   : > { %p4923_p13 = por %p4922_p12, %p4921_p11 }
 0x311   : > { %p4924_p0 = pnand %p4923_p13, %p4917_p8 }
 0x313   : > { %4927 = shalt.err (!%p4924_p0)
}
 0x314   : > { %s5004_s15 = smov 128   ;;  %s5005_s26 = smov 8  }
 0x315   : > { %4751 = dma.vmem_to_hbm [thread:$0]  (%p5080_p5), %s7290_s12, 2048, %s7288_s25, %s4319_s20, %s5004_s15, %s5004_s15, %s5005_s26  }
 0x316   : > { %s4324_s29 = scalar_lea.sflag [#allocation5], %s5564_s28  ;;  %s4928_s14 = scalar_lea.vmem %s7297_s13, 2048 }
 0x317   : > { %p4929_p1 = scmp.ne.s32.totalorder %s7297_s13, %s4928_s14  ;;  %s5006_s9 = smov [#allocation4]  }
 0x318   : > { %s4932_s10 = sshll.u32 %s5006_s9, 4  ;;  %s4933_s10 = int_to_ptr.vmem [resolvable:$false] %s4932_s10 }
 0x319   : > { %p4930_p2 = pnand %p4929_p1, %p5080_p5  ;;  %s4934_s11 = scalar_lea.vmem %s4933_s10, 4096 }
 0x31a   : > { %p4935_p4 = scmp.lt.s32.totalorder %s7297_s13, %s4933_s10  ;;  %p4936_p7 = scmp.lt.s32.totalorder %s4934_s11, %s4928_s14 }
 0x31b   : > { %p4931_p3 = pneg %p4930_p2 }
 0x31c   : > { %p4937_p8 = por %p4936_p7, %p4935_p4 }
 0x31e   : > { %p4938_p9 = pnand %p4937_p8, %p4931_p3 }
 0x320   : > { %4941 = shalt.err (!%p4938_p9)
}
 0x321   : > { %s4942_s12 = scalar_lea.hbm %s7295_s19, 2048  ;;  %s4946_s16 = scalar_lea.hbm %s7378_s6, 8192 }
 0x322   : > { %p4943_p10 = scmp.ne.s32.totalorder %s7295_s19, %s4942_s12  ;;  %p4947_p13 = scmp.lt.u32.totalorder %s7295_s19, %s7378_s6 }
 0x323   : > { %p4948_p0 = scmp.lt.u32.totalorder %s4946_s16, %s4942_s12  ;;  %p4950_p2 = scmp.lt.u32.totalorder %s4942_s12, %s7295_s19 }
 0x324   : > { %p4944_p11 = pnand %p4943_p10, %p5080_p5 }
 0x325   : > { %p4949_p1 = por %p4948_p0, %p4947_p13 }
 0x326   : > { %p4945_p12 = pneg %p4944_p11 }
 0x327   : > { %p4951_p3 = por %p4950_p2, %p4949_p1 }
 0x329   : > { %p4952_p4 = pnand %p4951_p3, %p4945_p12 }
 0x32b   : > { %4955 = shalt.err (!%p4952_p4)
}
 0x32c   : > { %4752 = dma.vmem_to_hbm [thread:$0]  (%p5080_p5), %s7297_s13, 2048, %s7295_s19, %s4324_s29, %s5004_s15, %s5004_s15, %s5005_s26  }
 0x32d PF: > { %p4762_p7 = scmp.ge.s32.totalorder %s4994_s24, 2  ;;  %s4368_s14 = sand.u32 1, %s4982_s21  }
 0x32e   : > { %s4369_s9 = scalar_lea.sflag [#allocation3], %s4368_s14 }
 0x32f   : > { %p4756_p8 = pnand %p4762_p7, %p5084_p6 }
 0x331   : > { %4973 = dma.done.wait (!%p4756_p8), %s4369_s9, 2048  }
 0x332   : > { %4975 = vsyncadd (!%p4756_p8), %s4369_s9, 4294965248  ;;  %s4378_s7 = scalar_lea.sflag [#allocation5], %s4368_s14 }
 0x333   : > { %4977 = dma.done.wait (!%p4756_p8), %s4378_s7, 2048  }
 0x334   : > { %4979 = vsyncadd (!%p4756_p8), %s4378_s7, 4294965248  ;;  %p20_p5 = scmp.ge.s32.totalorder %s5067_s27, 6   ;;  %s7470_s21 = smov %s4986_s22 }
 0x335   : > { %s7471_s22 = smov %s4990_s23  ;;  %s7472_s23 = smov %s5078_s30 }
 0x336   : > { %s7473_s24 = smov %s5067_s27  ;;  %22 = sbr.rel (!%p20_p5) target bundleno = 5 (0x5), region = 95 }
 0x33d   :  { %4383 = vsyncpa [#allocation3], 1 }
 0x33e   :  { %4385 = vsyncpa [#allocation3 + $0x1], 1 }
 0x33f   :  { %4386 = vsyncpa [#allocation5], 1 }
 0x340   :  { %4388 = vsyncpa [#allocation5 + $0x1], 1 }

</bundles_post_ra>
